<compile_context>
chip_gen: v6e
topology: v6e:2x2x1
jax: 0.10.0
libtpu: 0.0.40
codegen_flags: <defaults>
</compile_context>

<pallas_src>
import functools
import numpy as np

import jax
import jax.numpy as jnp
from jax.experimental import pallas as pl
from jax.experimental.pallas import tpu as pltpu


def _round_up(x, m):
    return (x + m - 1) // m * m


def _device_kind():
    try:
        return jax.devices()[0].device_kind.lower()
    except Exception:
        return ""


def _pick_tn(Pp, kind):
    # v7x (2 TensorCores): tn=256 -> 10 steps = 5/5 per core; tn=512 would
    # split 3/2 (load imbalance) and starve the double-buffered pipeline.
    # v5e/v6e (1 TC): tn=512 halves the fixed per-step overhead; per-step
    # VMEM (~17 MiB with double-buffered bf16 sel) still fits comfortably.
    if ("v5" in kind or "v6" in kind) and Pp % 512 == 0:
        return 512
    for c in (256, 128):
        if Pp % c == 0:
            return c
    return Pp


def _policy_filter_kernel(x_ref, sel_ref, o_ref):
    # x_ref: (3*Bp, Lp) bf16 -- hi/mid/lo pieces of the f32 logits, stacked.
    # sel_ref: (Lp, tn) bf16 one-hot column slab (entries exactly 0/1).
    # One native bf16 MXU pass streams sel once; f32 accumulation plus the
    # hi+mid+lo re-sum reproduces the f32 logits exactly (0/1 weights).
    b = o_ref.shape[0]
    acc = jnp.dot(x_ref[...], sel_ref[...], preferred_element_type=jnp.float32)
    o_ref[...] = (acc[:b, :] + acc[b:2 * b, :] + acc[2 * b:, :]).astype(o_ref.dtype)


@functools.partial(jax.jit, static_argnames=("num_possible_policies",))
def _policy_filter_apply(policy_logits, sel, *, num_possible_policies):
    B, L = policy_logits.shape
    Lp, Pp = sel.shape
    Bp = _round_up(B, 8)

    x = jnp.pad(policy_logits.astype(jnp.float32), ((0, Bp - B), (0, Lp - L)))

    # Exact 3-way bf16 decomposition of the tiny LHS (hi + mid + lo == x up to
    # f32 rounding of the final re-sum); built in the wrapper -- it is a few
    # elementwise ops on ~256 KiB, negligible next to the 20 MiB sel stream.
    x_hi = x.astype(jnp.bfloat16)
    r1 = x - x_hi.astype(jnp.float32)
    x_mid = r1.astype(jnp.bfloat16)
    r2 = r1 - x_mid.astype(jnp.float32)
    x_lo = r2.astype(jnp.bfloat16)
    x_split = jnp.concatenate([x_hi, x_mid, x_lo], axis=0)  # (3*Bp, Lp) bf16

    kind = _device_kind()
    tn = _pick_tn(Pp, kind)
    grid = (Pp // tn,)

    sel_spec_kwargs = {}
    if "v7" in kind or "7x" in kind:
        # At ~3.2 TB/s the per-step sel DMA (~1.3 us) is close to per-step
        # compute + fixed overhead; a third buffer (+4 MiB) smooths DMA jitter.
        sel_spec_kwargs["pipeline_mode"] = pl.Buffered(3)

    out = pl.pallas_call(
        _policy_filter_kernel,
        out_shape=jax.ShapeDtypeStruct((Bp, Pp), jnp.float32),
        grid_spec=pltpu.PrefetchScalarGridSpec(
            num_scalar_prefetch=0,
            grid=grid,
            in_specs=[
                # stacked hi/mid/lo logits: resident across all grid steps
                pl.BlockSpec((3 * Bp, Lp), lambda n: (0, 0)),
                # one-hot column slab: the streamed operand
                pl.BlockSpec((Lp, tn), lambda n: (0, n), **sel_spec_kwargs),
            ],
            out_specs=pl.BlockSpec((Bp, tn), lambda n: (0, n)),
        ),
        compiler_params=pltpu.CompilerParams(
            dimension_semantics=("parallel",),
            # sel double/triple buffers (8-16 MiB) + resident logits + output
            # tiles: ~17 MiB worst case (tn=512) -- within the 32 MiB scoped
            # budget on every generation (v7x physical VMEM is 64 MiB/TC).
            vmem_limit_bytes=32 * 1024 * 1024,
        ),
    )(x_split, sel)

    return out[:B, :num_possible_policies].astype(policy_logits.dtype)


def make_policy_filter(policy_index_array, num_possible_policies=2550):
    """Builds the PolicyFilter apply fn.

    Mirrors the PyTorch module: the static index array is converted to a
    one-hot selection matrix once at construction time; forward() is then a
    single Pallas matmul call.
    """
    idx = np.asarray(policy_index_array, dtype=np.int64)
    (L,) = idx.shape
    P = int(num_possible_policies)

    valid = idx >= 0
    targets = idx[valid]
    # The PyTorch scatter assumes each valid raw slot maps to a unique policy
    # index; the matmul form would SUM duplicates, so assert uniqueness.
    assert targets.size == np.unique(targets).size, "duplicate policy indices"
    if targets.size:
        assert targets.min() >= 0 and targets.max() < P, "policy index out of range"

    Lp = _round_up(L, 128)   # lane dim of x / sublane dim of sel
    Pp = _round_up(P, 128)   # lane dim of sel and of the output

    # Explicit host-side one-hot (row j, column idx[j]); rows for invalid
    # moves (idx == -1) and padding rows stay all-zero.
    sel_np = np.zeros((Lp, Pp), dtype=np.float32)
    sel_np[np.nonzero(valid)[0], targets] = 1.0
    # 0/1 are exactly representable in bf16 -> halves the dominant HBM stream
    # and lets the MXU consume it natively (single bf16 pass).
    sel = jnp.asarray(sel_np, dtype=jnp.bfloat16)

    def apply(policy_logits):
        return _policy_filter_apply(policy_logits, sel, num_possible_policies=P)

    return apply


if __name__ == "__main__":
    NUM_RAW = 8100        # raw policy logits (matches the module)
    NUM_POLICIES = 2550   # valid policies (module default)
    BATCH = 2

    key = jax.random.PRNGKey(0)
    k_pos, k_perm, k_x = jax.random.split(key, 3)

    # Deterministic synthetic policy_index_array: NUM_POLICIES unique target
    # indices scattered over NUM_RAW raw slots, -1 everywhere else.
    valid_pos = np.asarray(jax.random.permutation(k_pos, NUM_RAW))[:NUM_POLICIES]
    targets = np.asarray(jax.random.permutation(k_perm, NUM_POLICIES))
    policy_index_array = np.full((NUM_RAW,), -1, dtype=np.int64)
    policy_index_array[valid_pos] = targets

    x = jax.random.normal(k_x, (BATCH, NUM_RAW), dtype=jnp.float32)

    policy_filter = make_policy_filter(policy_index_array, NUM_POLICIES)
    out = jax.block_until_ready(policy_filter(x))

    # Pure-numpy reference mirroring the PyTorch forward exactly.
    x_np = np.asarray(x)
    ref = np.zeros((BATCH, NUM_POLICIES), dtype=np.float32)
    valid = policy_index_array >= 0
    ref[:, policy_index_array[valid]] = x_np[:, valid]

    assert out.shape == (BATCH, NUM_POLICIES)
    np.testing.assert_allclose(np.asarray(out), ref, rtol=1e-6, atol=1e-6)
    print("KERNEL_OK")
</pallas_src>

<mosaic_0001>
module attributes {stable_mosaic.version = 11 : i64} {
  func.func @_policy_filter_kernel(%arg0: i32, %arg1: memref<24x8192xbf16, #tpu.memory_space<vmem>>, %arg2: memref<8192x256xbf16, #tpu.memory_space<vmem>>, %arg3: memref<8x256xf32, #tpu.memory_space<vmem>>) attributes {dimension_semantics = [#tpu.dimension_semantics<parallel>], iteration_bounds = array<i64: 10>, scalar_prefetch = 0 : i64, scratch_operands = 0 : i64, tpu.core_type = #tpu.core_type<tc>, window_params = [{pipeline_mode = #tpu.pipeline_mode<synchronous>, transform_indices = @transform_0, window_bounds = array<i64: 24, 8192>}, {transform_indices = @transform_1, window_bounds = array<i64: 8192, 256>}, {transform_indices = @transform_2, window_bounds = array<i64: 8, 256>}]} {
    %c0 = arith.constant 0 : index
    %c0_0 = arith.constant 0 : index
    %0 = vector.load %arg1[%c0, %c0_0] : memref<24x8192xbf16, #tpu.memory_space<vmem>>, vector<24x8192xbf16>
    %c0_1 = arith.constant 0 : index
    %c0_2 = arith.constant 0 : index
    %1 = vector.load %arg2[%c0_1, %c0_2] : memref<8192x256xbf16, #tpu.memory_space<vmem>>, vector<8192x256xbf16>
    %cst = arith.constant dense<0.000000e+00> : vector<24x256xf32>
    %2 = tpu.matmul %0, %1, %cst {dimension_numbers = #tpu.dot_dimension_numbers<[1], [0], [0], [1], [0, 0, 1, 1], [], []>} : vector<24x8192xbf16>, vector<8192x256xbf16>, vector<24x256xf32> -> vector<24x256xf32>
    %3 = vector.extract_strided_slice %2 {offsets = [0, 0], sizes = [8, 256], strides = [1, 1]} : vector<24x256xf32> to vector<8x256xf32>
    %4 = vector.extract_strided_slice %2 {offsets = [8, 0], sizes = [8, 256], strides = [1, 1]} : vector<24x256xf32> to vector<8x256xf32>
    %5 = arith.addf %3, %4 : vector<8x256xf32>
    %6 = vector.extract_strided_slice %2 {offsets = [16, 0], sizes = [8, 256], strides = [1, 1]} : vector<24x256xf32> to vector<8x256xf32>
    %7 = arith.addf %5, %6 : vector<8x256xf32>
    %c0_3 = arith.constant 0 : index
    %c0_4 = arith.constant 0 : index
    %8 = vector.load %arg3[%c0_3, %c0_4] : memref<8x256xf32, #tpu.memory_space<vmem>>, vector<8x256xf32>
    tpu.vector_store %arg3[%c0_3, %c0_4], %7 {strides = array<i32>} : memref<8x256xf32, #tpu.memory_space<vmem>>, vector<8x256xf32>,
    return
  }
  func.func @transform_0(%arg0: i32) -> (i32, i32) {
    %c0_i32 = arith.constant 0 : i32
    %c0_i32_0 = arith.constant 0 : i32
    %c0_i32_1 = arith.constant 0 : i32
    return %c0_i32, %c0_i32_0 : i32, i32
  }
  func.func @transform_1(%arg0: i32) -> (i32, i32) {
    %c0_i32 = arith.constant 0 : i32
    %c0_i32_0 = arith.constant 0 : i32
    return %c0_i32, %arg0 : i32, i32
  }
  func.func @transform_2(%arg0: i32) -> (i32, i32) {
    %c0_i32 = arith.constant 0 : i32
    %c0_i32_0 = arith.constant 0 : i32
    return %c0_i32, %arg0 : i32, i32
  }
}

</mosaic_0001>

<bundles_post_ra>
// kernel: _policy_filter_apply.1
= control target key start
LH: loop header
LB: loop body
LE: loop exit
PB: predicated region body
PF: predicated region fallthrough
CT: control target
= control target key end

     0   :  { %7 = vsyncpa [#allocation3], 0  ;;  %s13420_s0 = inlined_call_operand.vmem [shape: bf16[24,8192], index: 0, kind: input, shape index: {}]   ;;  %s13421_s1 = inlined_call_operand.hbm [shape: bf16[8192,2560], index: 1, kind: input, shape index: {}]   ;;  %s13422_s2 = inlined_call_operand.vmem [shape: f32[8,2560], index: 2, kind: output, shape index: {}]  }
   0x1   :  { %9 = vsyncpa [#allocation3 + $0x1], 0  ;;  %s11546_s9 = smov 0   ;;  %s11548_s10 = smov 0  }
   0x2   :  { %s11550_s11 = smov 0   ;;  %s11552_s12 = smov 0  }
   0x3 LB: > { %s8655_s13 = sadd.s32 4294967295, %s11525_s12   ;;  %s11566_s14 = sadd.s32 1, %s11525_s12   ;;  %s11525_s12 = sphi %s11552_s12, %s13430_s12   ;;  %s11521_s11 = sphi %s11550_s11, %s13429_s11   ;;  %s11517_s10 = sphi %s11548_s10, %s13428_s10   ;;  %s11513_s9 = sphi %s11546_s9, %s13427_s9  }
   0x4   : > { %s40_s15 = ssub.s32 %s11525_s12, %s11566_s14  ;;  %s43_s16 = sadd.s32 1, %s11521_s11 }
   0x5   : > { %p41_p0 = scmp.eq.s32.totalorder %s40_s15, 0  ;;  %p50_p1 = scmp.ne.s32.totalorder %s11521_s11, %s11517_s10 }
   0x6   : > { %p51_p2 = scmp.eq.s32.totalorder %s11525_s12, 0  ;;  %p56_p3 = scmp.ne.s32.totalorder %s11517_s10, %s11513_s9 }
   0x7   : > { %s11576_s17 = scalar_select %p41_p0, %s11521_s11, %s43_s16  }
   0x8   : > { %p52_p4 = por %p51_p2, %p50_p1  ;;  %p57_p5 = scmp.eq.s32.totalorder %s8655_s13, 0 }
   0x9   : > { %p9827_p6 = scmp.lt.s32.totalorder %s11525_s12, 10  ;;  %s109_s19 = sand.u32 1, %s11521_s11  }
   0xa   : > { %p11581_p7 = por %p57_p5, %p56_p3  ;;  %s8659_s20 = sshll.u32 %s109_s19, 13 }
   0xb   : > { %s9820_s21 = sshll.u32 %s11525_s12, 7  ;;  %s113_s25 = scalar_lea.vmem [#allocation2], %s8659_s20 }
   0xc   : > { %s13424_s18 = scalar_select %p11581_p7, 1, 0 }
   0xd   : > { %s11590_s24 = scalar_lea.hbm %s13421_s1, %s9820_s21  ;;  %s120_s26 = sshll.u32 %s113_s25, 4  ;;  %s11592_s26 = int_to_ptr.vmem [resolvable:$true] %s120_s26 }
   0xe   : > { %p11594_p8 = pnand %p9827_p6, %p52_p4  ;;  %s11598_s28 = scalar_lea.sflag [#allocation3], %s109_s19 }
   0xf   : > { %s11463_s29 = scalar_lea.hbm %s11590_s24, 131072  ;;  %s11468_s4 = scalar_lea.hbm %s13421_s1, 1310720 }
  0x10   : > { %p11464_p9 = scmp.ne.s32.totalorder %s11590_s24, %s11463_s29  ;;  %p11465_p10 = pneg %p11594_p8 }
  0x11   : > { %p11469_p13 = scmp.lt.s32.totalorder %s11590_s24, %s13421_s1  ;;  %p11470_p0 = scmp.lt.s32.totalorder %s11468_s4, %s11463_s29 }
  0x12   : > { %p11466_p11 = pnand %p11465_p10, %p11464_p9 }
  0x13   : > { %p11471_p1 = por %p11470_p0, %p11469_p13 }
  0x14   : > { %p11467_p12 = pneg %p11466_p11 }
  0x16   : > { %p11472_p2 = pnand %p11471_p1, %p11467_p12 }
  0x18   : > { %11475 = shalt.err (!%p11472_p2)
}
  0x19   : > { %s11476_s7 = scalar_lea.vmem %s11592_s26, 131072  ;;  %s11527_s8 = smov [#allocation2]  }
  0x1a   : > { %p11477_p3 = scmp.ne.s32.totalorder %s11592_s26, %s11476_s7  ;;  %s11481_s9 = sshll.u32 %s11527_s8, 4  ;;  %s11482_s9 = int_to_ptr.vmem [resolvable:$false] %s11481_s9 }
  0x1b   : > { %s11483_s15 = scalar_lea.vmem %s11482_s9, 262144  ;;  %p11484_p6 = scmp.lt.s32.totalorder %s11592_s26, %s11482_s9 }
  0x1c   : > { %p11479_p4 = pnand %p11477_p3, %p11465_p10  ;;  %p11485_p9 = scmp.lt.s32.totalorder %s11483_s15, %s11476_s7 }
  0x1e   : > { %p11480_p5 = pneg %p11479_p4  ;;  %p11486_p11 = por %p11485_p9, %p11484_p6 }
  0x20   : > { %p11487_p7 = pnand %p11486_p11, %p11480_p5 }
  0x22   : > { %11490 = shalt.err (!%p11487_p7)
}
  0x23   : > { %s11528_s16 = smov 1280   ;;  %s11529_s19 = smov 128  }
  0x24   : > { %s11530_s20 = smov 8   ;;  %p8662_p10 = scmp.ge.s32.totalorder %s11525_s12, 1 }
  0x25   : > { %9826 = dma.hbm_to_vmem [thread:$0]  (!%p11594_p8), %s11590_s24, 131072, %s11592_s26, %s11598_s28, %s11528_s16, %s11529_s19, %s11530_s20  }
  0x26   : > { %p128_p12 = scmp.lt.s32.totalorder %s11525_s12, 11 }
  0x28   : > { %p129_p13 = pnand %p8662_p10, %p128_p12 }
  0x29   : > { %s134_s21 = sand.u32 (!%p129_p13), 1, %s11517_s10   ;;  %p13426_p7 = scmp.ne.s32.totalorder (!%p129_p13), %s13424_s18, 0 }
  0x2a   : > { %132 = sbr.rel (%p129_p13) target bundleno = 1283 (0x503), region = 28  ;;  %s8663_s22 = sshll.u32 (!%p129_p13), %s134_s21, 13 }
  0x2b   : > { %s135_s23 = scalar_lea.sflag (!%p129_p13), [#allocation3], %s134_s21  ;;  %s11622_s25 = scalar_lea.vmem (!%p129_p13), [#allocation2], %s8663_s22 }
  0x2f   : > { %11508 = dma.done.wait (%p13426_p7), %s135_s23, 131072  }
  0x30   : > { %11510 = vsyncadd (%p13426_p7), %s135_s23, 4294836224  ;;  %v9863_v0 = vld [vmem:[%s11622_s25 + $0x74] ss:$8 sps:$4 sm:$0xff]   ;;  %v9867_v2 = vld [vmem:[%s11622_s25 + $0x70] ss:$8 sps:$4 sm:$0xff]  }
  0x31   : > { %v9865_v1 = vld [vmem:[%s11622_s25 + $0x174] ss:$8 sps:$4 sm:$0xff]   ;;  %6950 = vmatprep.subr.bf16.mxu0 %v9863_v0  ;;  %v9868_v3 = vld [vmem:[%s11622_s25 + $0x170] ss:$8 sps:$4 sm:$0xff]   ;;  %v9869_v4 = vld [vmem:[%s11622_s25 + $0x64] ss:$8 sps:$4 sm:$0xff]  }
  0x32   : > { %7001 = vmatprep.subr.bf16.mxu1 %v9865_v1  ;;  %6951 = vmatpush1.bf16.msra.mxu0 %v9867_v2  ;;  %v9871_v5 = vld [vmem:[%s11622_s25 + $0x164] ss:$8 sps:$4 sm:$0xff]   ;;  %v9873_v6 = vld [vmem:[%s11622_s25 + $0x60] ss:$8 sps:$4 sm:$0xff]   ;;  %v9875_v8 = vld [vmem:[%s11622_s25 + $0x54] ss:$8 sps:$4 sm:$0xff]  }
  0x33   : > { %7002 = vmatpush1.bf16.msra.mxu1 %v9868_v3  ;;  %6952 = vmatprep.subr.bf16.mxu0 %v9869_v4  ;;  %v9874_v7 = vld [vmem:[%s11622_s25 + $0x160] ss:$8 sps:$4 sm:$0xff]   ;;  %v9877_v9 = vld [vmem:[%s11622_s25 + $0x154] ss:$8 sps:$4 sm:$0xff]   ;;  %v9879_v10 = vld [vmem:[%s11622_s25 + $0x50] ss:$8 sps:$4 sm:$0xff]  }
  0x34   : > { %7003 = vmatprep.subr.bf16.mxu1 %v9871_v5  ;;  %v9880_v11 = vld [vmem:[%s11622_s25 + $0x150] ss:$8 sps:$4 sm:$0xff]   ;;  %v9881_v12 = vld [vmem:[%s11622_s25 + $0x44] ss:$8 sps:$4 sm:$0xff]   ;;  %v9885_v14 = vld [vmem:[%s11622_s25 + $0x40] ss:$8 sps:$4 sm:$0xff]  }
  0x35   : > { %v9883_v13 = vld [vmem:[%s11622_s25 + $0x144] ss:$8 sps:$4 sm:$0xff]   ;;  %v9886_v15 = vld [vmem:[%s11622_s25 + $0x140] ss:$8 sps:$4 sm:$0xff]   ;;  %v9887_v16 = vld [vmem:[%s11622_s25 + $0x34] ss:$8 sps:$4 sm:$0xff]  }
  0x36   : > { %6953 = vmatpush1.bf16.msra.mxu0 %v9873_v6  ;;  %v9889_v17 = vld [vmem:[%s11622_s25 + $0x134] ss:$8 sps:$4 sm:$0xff]   ;;  %v9891_v18 = vld [vmem:[%s11622_s25 + $0x30] ss:$8 sps:$4 sm:$0xff]   ;;  %v9893_v20 = vld [vmem:[%s11622_s25 + $0x24] ss:$8 sps:$4 sm:$0xff]  }
  0x37   : > { %7004 = vmatpush1.bf16.msra.mxu1 %v9874_v7  ;;  %6954 = vmatprep.subr.bf16.mxu0 %v9875_v8  ;;  %v9892_v19 = vld [vmem:[%s11622_s25 + $0x130] ss:$8 sps:$4 sm:$0xff]   ;;  %v9895_v21 = vld [vmem:[%s11622_s25 + $0x124] ss:$8 sps:$4 sm:$0xff]   ;;  %v9897_v22 = vld [vmem:[%s11622_s25 + $0x20] ss:$8 sps:$4 sm:$0xff]  }
  0x38   : > { %7005 = vmatprep.subr.bf16.mxu1 %v9877_v9  ;;  %v9898_v23 = vld [vmem:[%s11622_s25 + $0x120] ss:$8 sps:$4 sm:$0xff]   ;;  %v9899_v24 = vld [vmem:[%s11622_s25 + $0x14] ss:$8 sps:$4 sm:$0xff]   ;;  %v9903_v26 = vld [vmem:[%s11622_s25 + $0x10] ss:$8 sps:$4 sm:$0xff]  }
  0x39   : > { %v9901_v25 = vld [vmem:[%s11622_s25 + $0x114] ss:$8 sps:$4 sm:$0xff]   ;;  %v9904_v27 = vld [vmem:[%s11622_s25 + $0x110] ss:$8 sps:$4 sm:$0xff]   ;;  %v9905_v28 = vld [vmem:[%s11622_s25 + $0x4] ss:$8 sps:$4 sm:$0xff]  }
  0x3a   : > { %6955 = vmatpush1.bf16.msra.mxu0 %v9879_v10  ;;  %v9907_v29 = vld [vmem:[%s11622_s25 + $0x104] ss:$8 sps:$4 sm:$0xff]   ;;  %v9909_v30 = vld [vmem:[%s11622_s25] ss:$8 sps:$4 sm:$0xff]   ;;  %v9911_v32 = vld [vmem:[%s11622_s25 + $0xf4] ss:$8 sps:$4 sm:$0xff]  }
  0x3b   : > { %7006 = vmatpush1.bf16.msra.mxu1 %v9880_v11  ;;  %6956 = vmatprep.subr.bf16.mxu0 %v9881_v12  ;;  %v9910_v31 = vld [vmem:[%s11622_s25 + $0x100] ss:$8 sps:$4 sm:$0xff]   ;;  %v9913_v33 = vld [vmem:[%s11622_s25 + $0x1f4] ss:$8 sps:$4 sm:$0xff]   ;;  %v9915_v34 = vld [vmem:[%s11622_s25 + $0xf0] ss:$8 sps:$4 sm:$0xff]  }
  0x3c   : > { %7007 = vmatprep.subr.bf16.mxu1 %v9883_v13  ;;  %v9916_v35 = vld [vmem:[%s11622_s25 + $0x1f0] ss:$8 sps:$4 sm:$0xff]   ;;  %v9917_v36 = vld [vmem:[%s11622_s25 + $0xe4] ss:$8 sps:$4 sm:$0xff]   ;;  %v9921_v38 = vld [vmem:[%s11622_s25 + $0xe0] ss:$8 sps:$4 sm:$0xff]  }
  0x3d   : > { %v9919_v37 = vld [vmem:[%s11622_s25 + $0x1e4] ss:$8 sps:$4 sm:$0xff]   ;;  %v9922_v39 = vld [vmem:[%s11622_s25 + $0x1e0] ss:$8 sps:$4 sm:$0xff]   ;;  %v9923_v40 = vld [vmem:[%s11622_s25 + $0xd4] ss:$8 sps:$4 sm:$0xff]  }
  0x3e   : > { %6957 = vmatpush1.bf16.msra.mxu0 %v9885_v14  ;;  %v9925_v41 = vld [vmem:[%s11622_s25 + $0x1d4] ss:$8 sps:$4 sm:$0xff]   ;;  %v9927_v42 = vld [vmem:[%s11622_s25 + $0xd0] ss:$8 sps:$4 sm:$0xff]   ;;  %v9929_v44 = vld [vmem:[%s11622_s25 + $0xc4] ss:$8 sps:$4 sm:$0xff]  }
  0x3f   : > { %7008 = vmatpush1.bf16.msra.mxu1 %v9886_v15  ;;  %6958 = vmatprep.subr.bf16.mxu0 %v9887_v16  ;;  %v9928_v43 = vld [vmem:[%s11622_s25 + $0x1d0] ss:$8 sps:$4 sm:$0xff]   ;;  %v9931_v45 = vld [vmem:[%s11622_s25 + $0x1c4] ss:$8 sps:$4 sm:$0xff]   ;;  %v9933_v46 = vld [vmem:[%s11622_s25 + $0xc0] ss:$8 sps:$4 sm:$0xff]  }
  0x40   : > { %7009 = vmatprep.subr.bf16.mxu1 %v9889_v17  ;;  %v9934_v47 = vld [vmem:[%s11622_s25 + $0x1c0] ss:$8 sps:$4 sm:$0xff]   ;;  %v9935_v52 = vld [vmem:[%s11622_s25 + $0xb4] ss:$8 sps:$4 sm:$0xff]   ;;  %v9939_v56 = vld [vmem:[%s11622_s25 + $0xb0] ss:$8 sps:$4 sm:$0xff]  }
  0x41   : > { %v166_v48 = vld [vmem:[%s13420_s0] sm:$0xff]  ;;  %v167_v50 = vld [vmem:[%s13420_s0 + $0x8] sm:$0xff]  ;;  %v9937_v54 = vld [vmem:[%s11622_s25 + $0x1b4] ss:$8 sps:$4 sm:$0xff]  }
  0x42   : > { %6959 = vmatpush1.bf16.msra.mxu0 %v9891_v18  ;;  %v198_v49 = vld [vmem:[%s13420_s0 + $0x100] sm:$0xff]  ;;  %v199_v51 = vld [vmem:[%s13420_s0 + $0x108] sm:$0xff]  ;;  %v9940_v57 = vld [vmem:[%s11622_s25 + $0x1b0] ss:$8 sps:$4 sm:$0xff]  }
  0x43   : > { %7010 = vmatpush1.bf16.msra.mxu1 %v9892_v19  ;;  %6960 = vmatprep.subr.bf16.mxu0 %v9893_v20  ;;  %v8667_v53 = vcombine.high %v166_v48, %v198_v49  ;;  %v8669_v55 = vcombine.high %v167_v50, %v199_v51  ;;  %v9941_v58 = vld [vmem:[%s11622_s25 + $0xa4] ss:$8 sps:$4 sm:$0xff]   ;;  %v9945_v60 = vld [vmem:[%s11622_s25 + $0xa0] ss:$8 sps:$4 sm:$0xff]   ;;  %v9947_v62 = vld [vmem:[%s11622_s25 + $0x94] ss:$8 sps:$4 sm:$0xff]   ;;  %v8666_v8 = vcombine.low %v166_v48, %v198_v49 }
  0x44   : > { %7011 = vmatprep.subr.bf16.mxu1 %v9895_v21  ;;  %v9943_v59 = vld [vmem:[%s11622_s25 + $0x1a4] ss:$8 sps:$4 sm:$0xff]   ;;  %v9946_v61 = vld [vmem:[%s11622_s25 + $0x1a0] ss:$8 sps:$4 sm:$0xff]   ;;  %v9949_v63 = vld [vmem:[%s11622_s25 + $0x194] ss:$8 sps:$4 sm:$0xff]   ;;  %v8668_v9 = vcombine.low %v167_v50, %v199_v51 }
  0x45   : > { %6982 = vmatprep.mubr.bf16.mxu0 %v8667_v53  ;;  %7033 = vmatprep.mubr.bf16.mxu1 %v8669_v55  ;;  %v9951_v0 = vld [vmem:[%s11622_s25 + $0x90] ss:$8 sps:$4 sm:$0xff]   ;;  %v9953_v2 = vld [vmem:[%s11622_s25 + $0x84] ss:$8 sps:$4 sm:$0xff]   ;;  %v9957_v4 = vld [vmem:[%s11622_s25 + $0x80] ss:$8 sps:$4 sm:$0xff]  }
  0x46   : > { %6961 = vmatpush1.bf16.msra.mxu0 %v9897_v22  ;;  %v9952_v1 = vld [vmem:[%s11622_s25 + $0x190] ss:$8 sps:$4 sm:$0xff]   ;;  %v9955_v3 = vld [vmem:[%s11622_s25 + $0x184] ss:$8 sps:$4 sm:$0xff]   ;;  %v9958_v5 = vld [vmem:[%s11622_s25 + $0x180] ss:$8 sps:$4 sm:$0xff]  }
  0x47   : > { %7012 = vmatpush1.bf16.msra.mxu1 %v9898_v23  ;;  %6962 = vmatprep.subr.bf16.mxu0 %v9899_v24  ;;  %v9961_v6 = vld [vmem:[%s11622_s25 + $0x274] ss:$8 sps:$4 sm:$0xff]   ;;  %v9959_v10 = vld [vmem:[%s11622_s25 + $0x270] ss:$8 sps:$4 sm:$0xff]   ;;  %v9967_v12 = vld [vmem:[%s11622_s25 + $0x264] ss:$8 sps:$4 sm:$0xff]  }
  0x48   : > { %7013 = vmatprep.subr.bf16.mxu1 %v9901_v25  ;;  %v9964_v7 = vld [vmem:[%s11622_s25 + $0x374] ss:$8 sps:$4 sm:$0xff]   ;;  %v9962_v11 = vld [vmem:[%s11622_s25 + $0x370] ss:$8 sps:$4 sm:$0xff]   ;;  %v9970_v13 = vld [vmem:[%s11622_s25 + $0x364] ss:$8 sps:$4 sm:$0xff]  }
  0x49   : > { %v9965_v14 = vld [vmem:[%s11622_s25 + $0x260] ss:$8 sps:$4 sm:$0xff]   ;;  %v9973_v16 = vld [vmem:[%s11622_s25 + $0x254] ss:$8 sps:$4 sm:$0xff]   ;;  %v9971_v18 = vld [vmem:[%s11622_s25 + $0x250] ss:$8 sps:$4 sm:$0xff]  }
  0x4a   : > { %6963 = vmatpush1.bf16.msra.mxu0 %v9903_v26  ;;  %v9968_v15 = vld [vmem:[%s11622_s25 + $0x360] ss:$8 sps:$4 sm:$0xff]   ;;  %v9976_v17 = vld [vmem:[%s11622_s25 + $0x354] ss:$8 sps:$4 sm:$0xff]   ;;  %v9974_v19 = vld [vmem:[%s11622_s25 + $0x350] ss:$8 sps:$4 sm:$0xff]  }
  0x4b   : > { %7014 = vmatpush1.bf16.msra.mxu1 %v9904_v27  ;;  %6964 = vmatprep.subr.bf16.mxu0 %v9905_v28  ;;  %v9979_v20 = vld [vmem:[%s11622_s25 + $0x244] ss:$8 sps:$4 sm:$0xff]   ;;  %v9977_v22 = vld [vmem:[%s11622_s25 + $0x240] ss:$8 sps:$4 sm:$0xff]   ;;  %v9985_v24 = vld [vmem:[%s11622_s25 + $0x234] ss:$8 sps:$4 sm:$0xff]  }
  0x4c   : > { %7015 = vmatprep.subr.bf16.mxu1 %v9907_v29  ;;  %v9982_v21 = vld [vmem:[%s11622_s25 + $0x344] ss:$8 sps:$4 sm:$0xff]   ;;  %v9980_v23 = vld [vmem:[%s11622_s25 + $0x340] ss:$8 sps:$4 sm:$0xff]   ;;  %v9988_v25 = vld [vmem:[%s11622_s25 + $0x334] ss:$8 sps:$4 sm:$0xff]  }
  0x4d   : > { %v230_v26 = vld [vmem:[%s13420_s0 + $0x200] sm:$0xff]  ;;  %v231_v29 = vld [vmem:[%s13420_s0 + $0x208] sm:$0xff]  ;;  %v10012_v53 = vld [vmem:[%s11622_s25 + $0x3f4] ss:$8 sps:$4 sm:$0xff]  }
  0x4e   : > { %6965 = vmatpush1.bf16.msra.mxu0 %v9909_v30  ;;  %v8731_v27 = vcombine.high %v230_v26, %v230_v26  ;;  %v8730_v28 = vcombine.low %v230_v26, %v230_v26  ;;  %v9983_v30 = vld [vmem:[%s11622_s25 + $0x230] ss:$8 sps:$4 sm:$0xff]   ;;  %v10006_v48 = vld [vmem:[%s11622_s25 + $0x304] ss:$8 sps:$4 sm:$0xff]   ;;  %v10001_v50 = vld [vmem:[%s11622_s25 + $0x200] ss:$8 sps:$4 sm:$0xff]  }
  0x4f   : > { %7016 = vmatpush1.bf16.msra.mxu1 %v9910_v31  ;;  %6966 = vmatprep.subr.bf16.mxu0 %v9911_v32  ;;  %v9986_v31 = vld [vmem:[%s11622_s25 + $0x330] ss:$8 sps:$4 sm:$0xff]   ;;  %v8733_v32 = vcombine.high %v231_v29, %v231_v29  ;;  %v10004_v51 = vld [vmem:[%s11622_s25 + $0x300] ss:$8 sps:$4 sm:$0xff]  }
  0x50   : > { %7017 = vmatprep.subr.bf16.mxu1 %v9913_v33  ;;  %v8732_v33 = vcombine.low %v231_v29, %v231_v29  ;;  %v10010_v55 = vld [vmem:[%s11622_s25 + $0x3f0] ss:$8 sps:$4 sm:$0xff]   ;;  %v10070_v29 = vld [vmem:[%s11622_s25 + $0x564] ss:$8 sps:$4 sm:$0xff]  }
  0x51   : > { %v232_v26 = vld [vmem:[%s13420_s0 + $0x210] sm:$0xff] }
  0x52   : > { %6967 = vmatpush2.bf16.msra.mxu0 %v9915_v34  ;;  %v9991_v34 = vld [vmem:[%s11622_s25 + $0x224] ss:$8 sps:$4 sm:$0xff]  }
  0x53   : > { %7018 = vmatpush2.bf16.msra.mxu1 %v9916_v35  ;;  %6968 = vmatprep.subr.bf16.mxu0 %v9917_v36  ;;  %v9994_v35 = vld [vmem:[%s11622_s25 + $0x324] ss:$8 sps:$4 sm:$0xff]   ;;  %v9989_v36 = vld [vmem:[%s11622_s25 + $0x220] ss:$8 sps:$4 sm:$0xff]  }
  0x54   : > { %7019 = vmatprep.subr.bf16.mxu1 %v9919_v37  ;;  %v9992_v37 = vld [vmem:[%s11622_s25 + $0x320] ss:$8 sps:$4 sm:$0xff]  }
  0x56   : > { %6969 = vmatpush2.bf16.msra.mxu0 %v9921_v38  ;;  %v9997_v38 = vld [vmem:[%s11622_s25 + $0x214] ss:$8 sps:$4 sm:$0xff]  }
  0x57   : > { %7020 = vmatpush2.bf16.msra.mxu1 %v9922_v39  ;;  %6970 = vmatprep.subr.bf16.mxu0 %v9923_v40  ;;  %v10000_v39 = vld [vmem:[%s11622_s25 + $0x314] ss:$8 sps:$4 sm:$0xff]   ;;  %v9995_v40 = vld [vmem:[%s11622_s25 + $0x210] ss:$8 sps:$4 sm:$0xff]  }
  0x58   : > { %7021 = vmatprep.subr.bf16.mxu1 %v9925_v41  ;;  %v9998_v41 = vld [vmem:[%s11622_s25 + $0x310] ss:$8 sps:$4 sm:$0xff]  }
  0x5a   : > { %6971 = vmatpush2.bf16.msra.mxu0 %v9927_v42  ;;  %v11741_v42 = vld [vmem:[%s13420_s0 + $0x10] sm:$0xff] }
  0x5b   : > { %7022 = vmatpush2.bf16.msra.mxu1 %v9928_v43  ;;  %6972 = vmatprep.subr.bf16.mxu0 %v9929_v44  ;;  %v11746_v43 = vld [vmem:[%s13420_s0 + $0x110] sm:$0xff] }
  0x5c   : > { %7023 = vmatprep.subr.bf16.mxu1 %v9931_v45  ;;  %v8671_v44 = vcombine.high %v11741_v42, %v11746_v43  ;;  %v11753_v45 = vld [vmem:[%s13420_s0 + $0x18] sm:$0xff] }
  0x5e   : > { %6973 = vmatpush2.bf16.msra.mxu0 %v9933_v46  ;;  %v11758_v46 = vld [vmem:[%s13420_s0 + $0x118] sm:$0xff] }
  0x5f   : > { %7024 = vmatpush2.bf16.msra.mxu1 %v9934_v47  ;;  %6974 = vmatprep.subr.bf16.mxu0 %v9935_v52  ;;  %v10003_v47 = vld [vmem:[%s11622_s25 + $0x204] ss:$8 sps:$4 sm:$0xff]   ;;  %v8673_v49 = vcombine.high %v11753_v45, %v11758_v46  ;;  %v10009_v52 = vld [vmem:[%s11622_s25 + $0x2f4] ss:$8 sps:$4 sm:$0xff]  }
  0x60   : > { %7025 = vmatprep.subr.bf16.mxu1 %v9937_v54  ;;  %v10007_v54 = vld [vmem:[%s11622_s25 + $0x2f0] ss:$8 sps:$4 sm:$0xff]  }
  0x62   : > { %6975 = vmatpush2.bf16.msra.mxu0 %v9939_v56  ;;  %v10015_v56 = vld [vmem:[%s11622_s25 + $0x2e4] ss:$8 sps:$4 sm:$0xff]  }
  0x63   : > { %7026 = vmatpush2.bf16.msra.mxu1 %v9940_v57  ;;  %6976 = vmatprep.subr.bf16.mxu0 %v9941_v58  ;;  %v10018_v57 = vld [vmem:[%s11622_s25 + $0x3e4] ss:$8 sps:$4 sm:$0xff]   ;;  %v10013_v58 = vld [vmem:[%s11622_s25 + $0x2e0] ss:$8 sps:$4 sm:$0xff]  }
  0x64   : > { %7027 = vmatprep.subr.bf16.mxu1 %v9943_v59  ;;  %v10016_v59 = vld [vmem:[%s11622_s25 + $0x3e0] ss:$8 sps:$4 sm:$0xff]  }
  0x66   : > { %6977 = vmatpush2.bf16.msra.mxu0 %v9945_v60  ;;  %v10021_v60 = vld [vmem:[%s11622_s25 + $0x2d4] ss:$8 sps:$4 sm:$0xff]  }
  0x67   : > { %7028 = vmatpush2.bf16.msra.mxu1 %v9946_v61  ;;  %6978 = vmatprep.subr.bf16.mxu0 %v9947_v62  ;;  %v10024_v61 = vld [vmem:[%s11622_s25 + $0x3d4] ss:$8 sps:$4 sm:$0xff]   ;;  %v10019_v62 = vld [vmem:[%s11622_s25 + $0x2d0] ss:$8 sps:$4 sm:$0xff]  }
  0x68   : > { %7029 = vmatprep.subr.bf16.mxu1 %v9949_v63  ;;  %v10022_v63 = vld [vmem:[%s11622_s25 + $0x3d0] ss:$8 sps:$4 sm:$0xff]  }
  0x6a   : > { %6979 = vmatpush2.bf16.msra.mxu0 %v9951_v0  ;;  %v10027_v0 = vld [vmem:[%s11622_s25 + $0x2c4] ss:$8 sps:$4 sm:$0xff]  }
  0x6b   : > { %7030 = vmatpush2.bf16.msra.mxu1 %v9952_v1  ;;  %6980 = vmatprep.subr.bf16.mxu0 %v9953_v2  ;;  %v10030_v1 = vld [vmem:[%s11622_s25 + $0x3c4] ss:$8 sps:$4 sm:$0xff]   ;;  %v10025_v2 = vld [vmem:[%s11622_s25 + $0x2c0] ss:$8 sps:$4 sm:$0xff]  }
  0x6c   : > { %7031 = vmatprep.subr.bf16.mxu1 %v9955_v3  ;;  %v10028_v3 = vld [vmem:[%s11622_s25 + $0x3c0] ss:$8 sps:$4 sm:$0xff]  }
  0x6e   : > { %6981 = vmatpush2.bf16.msra.mxu0 %v9957_v4  ;;  %v10033_v4 = vld [vmem:[%s11622_s25 + $0x2b4] ss:$8 sps:$4 sm:$0xff]  }
  0x6f   : > { %7032 = vmatpush2.bf16.msra.mxu1 %v9958_v5  ;;  %7052 = vmatprep.subr.bf16.mxu0 %v9961_v6  ;;  %v10036_v5 = vld [vmem:[%s11622_s25 + $0x3b4] ss:$8 sps:$4 sm:$0xff]   ;;  %v10031_v6 = vld [vmem:[%s11622_s25 + $0x2b0] ss:$8 sps:$4 sm:$0xff]  }
  0x70   : > { %7103 = vmatprep.subr.bf16.mxu1 %v9964_v7  ;;  %v10034_v7 = vld [vmem:[%s11622_s25 + $0x3b0] ss:$8 sps:$4 sm:$0xff]  }
  0x71   : > { %6983 = vmatmul.mubr.bf16.vlgmr.msra.gmra.mxu0 %v8666_v8  ;;  %v10042_v8 = vld [vmem:[%s11622_s25 + $0x2a4] ss:$8 sps:$4 sm:$0xff]  }
  0x72   : > { %7034 = vmatmul.mubr.bf16.vlgmr.msra.gmra.mxu1 %v8668_v9  ;;  %7053 = vmatpush1.bf16.msra.mxu0 %v9959_v10  ;;  %v10045_v9 = vld [vmem:[%s11622_s25 + $0x3a4] ss:$8 sps:$4 sm:$0xff]   ;;  %v10040_v10 = vld [vmem:[%s11622_s25 + $0x2a0] ss:$8 sps:$4 sm:$0xff]  }
  0x73   : > { %7104 = vmatpush1.bf16.msra.mxu1 %v9962_v11  ;;  %7054 = vmatprep.subr.bf16.mxu0 %v9967_v12  ;;  %v10043_v11 = vld [vmem:[%s11622_s25 + $0x3a0] ss:$8 sps:$4 sm:$0xff]   ;;  %v10049_v12 = vld [vmem:[%s11622_s25 + $0x294] ss:$8 sps:$4 sm:$0xff]  }
  0x74   : > { %7105 = vmatprep.subr.bf16.mxu1 %v9970_v13  ;;  %6992 = vmatprep.mubr.bf16.mxu0 %v8731_v27  ;;  %v10052_v13 = vld [vmem:[%s11622_s25 + $0x394] ss:$8 sps:$4 sm:$0xff]  }
  0x75   : > { %7043 = vmatprep.mubr.bf16.mxu1 %v8733_v32  ;;  %v233_v27 = vld [vmem:[%s13420_s0 + $0x218] sm:$0xff]  ;;  %v10065_v32 = vld [vmem:[%s11622_s25 + $0x460] ss:$8 sps:$4 sm:$0xff]  }
  0x76   : > { %7055 = vmatpush1.bf16.msra.mxu0 %v9965_v14  ;;  %v10047_v14 = vld [vmem:[%s11622_s25 + $0x290] ss:$8 sps:$4 sm:$0xff]  }
  0x77   : > { %7106 = vmatpush1.bf16.msra.mxu1 %v9968_v15  ;;  %7056 = vmatprep.subr.bf16.mxu0 %v9973_v16  ;;  %v10050_v15 = vld [vmem:[%s11622_s25 + $0x390] ss:$8 sps:$4 sm:$0xff]   ;;  %v10055_v16 = vld [vmem:[%s11622_s25 + $0x284] ss:$8 sps:$4 sm:$0xff]  }
  0x78   : > { %7107 = vmatprep.subr.bf16.mxu1 %v9976_v17  ;;  %v10058_v17 = vld [vmem:[%s11622_s25 + $0x384] ss:$8 sps:$4 sm:$0xff]  }
  0x79   : > { %6993 = vmatmul.mubr.bf16.gmra.mxu0 %v8730_v28  ;;  %v10067_v28 = vld [vmem:[%s11622_s25 + $0x464] ss:$8 sps:$4 sm:$0xff]  }
  0x7a   : > { %7057 = vmatpush1.bf16.msra.mxu0 %v9971_v18  ;;  %7044 = vmatmul.mubr.bf16.gmra.mxu1 %v8732_v33  ;;  %v10053_v18 = vld [vmem:[%s11622_s25 + $0x280] ss:$8 sps:$4 sm:$0xff]  }
  0x7b   : > { %7108 = vmatpush1.bf16.msra.mxu1 %v9974_v19  ;;  %7058 = vmatprep.subr.bf16.mxu0 %v9979_v20  ;;  %v10056_v19 = vld [vmem:[%s11622_s25 + $0x380] ss:$8 sps:$4 sm:$0xff]   ;;  %v10061_v20 = vld [vmem:[%s11622_s25 + $0x474] ss:$8 sps:$4 sm:$0xff]  }
  0x7c   : > { %7109 = vmatprep.subr.bf16.mxu1 %v9982_v21  ;;  %7084 = vmatprep.mubr.bf16.mxu0 %v8671_v44  ;;  %v10064_v21 = vld [vmem:[%s11622_s25 + $0x574] ss:$8 sps:$4 sm:$0xff]   ;;  %v10068_v33 = vld [vmem:[%s11622_s25 + $0x560] ss:$8 sps:$4 sm:$0xff]   ;;  %v10083_v44 = vld [vmem:[%s11622_s25 + $0x444] ss:$8 sps:$4 sm:$0xff]  }
  0x7d   : > { %7135 = vmatprep.mubr.bf16.mxu1 %v8673_v49  ;;  %v10084_v49 = vld [vmem:[%s11622_s25 + $0x540] ss:$8 sps:$4 sm:$0xff]  }
  0x7e   : > { %7059 = vmatpush1.bf16.msra.mxu0 %v9977_v22  ;;  %v10059_v22 = vld [vmem:[%s11622_s25 + $0x470] ss:$8 sps:$4 sm:$0xff]  }
  0x7f   : > { %7110 = vmatpush1.bf16.msra.mxu1 %v9980_v23  ;;  %7060 = vmatprep.subr.bf16.mxu0 %v9985_v24  ;;  %v10062_v23 = vld [vmem:[%s11622_s25 + $0x570] ss:$8 sps:$4 sm:$0xff]   ;;  %v8670_v24 = vcombine.low %v11741_v42, %v11746_v43  ;;  %v11833_v42 = vld [vmem:[%s13420_s0 + $0x28] sm:$0xff] }
  0x80   : > { %7111 = vmatprep.subr.bf16.mxu1 %v9988_v25  ;;  %v8672_v25 = vcombine.low %v11753_v45, %v11758_v46  ;;  %v11838_v43 = vld [vmem:[%s13420_s0 + $0x128] sm:$0xff] }
  0x81   : > { %v10086_v45 = vld [vmem:[%s11622_s25 + $0x544] ss:$8 sps:$4 sm:$0xff]  }
  0x82   : > { %7061 = vmatpush1.bf16.msra.mxu0 %v9983_v30  ;;  %v8735_v30 = vcombine.high %v232_v26, %v232_v26 }
  0x83   : > { %7112 = vmatpush1.bf16.msra.mxu1 %v9986_v31  ;;  %7062 = vmatprep.subr.bf16.mxu0 %v9991_v34  ;;  %v8737_v31 = vcombine.high %v233_v27, %v233_v27  ;;  %v10075_v34 = vld [vmem:[%s11622_s25 + $0x454] ss:$8 sps:$4 sm:$0xff]  }
  0x84   : > { %7113 = vmatprep.subr.bf16.mxu1 %v9994_v35  ;;  %v10078_v35 = vld [vmem:[%s11622_s25 + $0x554] ss:$8 sps:$4 sm:$0xff]  }
  0x86   : > { %7063 = vmatpush1.bf16.msra.mxu0 %v9989_v36  ;;  %v10073_v36 = vld [vmem:[%s11622_s25 + $0x450] ss:$8 sps:$4 sm:$0xff]  }
  0x87   : > { %7114 = vmatpush1.bf16.msra.mxu1 %v9992_v37  ;;  %7064 = vmatprep.subr.bf16.mxu0 %v9997_v38  ;;  %v10076_v37 = vld [vmem:[%s11622_s25 + $0x550] ss:$8 sps:$4 sm:$0xff]   ;;  %v11823_v38 = vld [vmem:[%s13420_s0 + $0x20] sm:$0xff] }
  0x88   : > { %7115 = vmatprep.subr.bf16.mxu1 %v10000_v39  ;;  %v11828_v39 = vld [vmem:[%s13420_s0 + $0x120] sm:$0xff] }
  0x89   : > { %v8675_v46 = vcombine.high %v11823_v38, %v11828_v39 }
  0x8a   : > { %7065 = vmatpush1.bf16.msra.mxu0 %v9995_v40  ;;  %v8734_v40 = vcombine.low %v232_v26, %v232_v26  ;;  %v10149_v26 = vld [vmem:[%s11622_s25 + $0x494] ss:$8 sps:$4 sm:$0xff]  }
  0x8b   : > { %7116 = vmatpush1.bf16.msra.mxu1 %v9998_v41  ;;  %7066 = vmatprep.subr.bf16.mxu0 %v10003_v47  ;;  %v8736_v41 = vcombine.low %v233_v27, %v233_v27  ;;  %v8677_v47 = vcombine.high %v11833_v42, %v11838_v43  ;;  %v10152_v27 = vld [vmem:[%s11622_s25 + $0x594] ss:$8 sps:$4 sm:$0xff]  }
  0x8c   : > { %7117 = vmatprep.subr.bf16.mxu1 %v10006_v48  ;;  %v10081_v48 = vld [vmem:[%s11622_s25 + $0x440] ss:$8 sps:$4 sm:$0xff]  }
  0x8e   : > { %7067 = vmatpush1.bf16.msra.mxu0 %v10001_v50  ;;  %v10089_v50 = vld [vmem:[%s11622_s25 + $0x434] ss:$8 sps:$4 sm:$0xff]  }
  0x8f   : > { %7118 = vmatpush1.bf16.msra.mxu1 %v10004_v51  ;;  %7068 = vmatprep.subr.bf16.mxu0 %v10009_v52  ;;  %v10092_v51 = vld [vmem:[%s11622_s25 + $0x534] ss:$8 sps:$4 sm:$0xff]   ;;  %v10087_v52 = vld [vmem:[%s11622_s25 + $0x430] ss:$8 sps:$4 sm:$0xff]  }
  0x90   : > { %7119 = vmatprep.subr.bf16.mxu1 %v10012_v53  ;;  %v10090_v53 = vld [vmem:[%s11622_s25 + $0x530] ss:$8 sps:$4 sm:$0xff]  }
  0x92   : > { %7069 = vmatpush2.bf16.msra.mxu0 %v10007_v54  ;;  %v10095_v54 = vld [vmem:[%s11622_s25 + $0x424] ss:$8 sps:$4 sm:$0xff]  }
  0x93   : > { %7120 = vmatpush2.bf16.msra.mxu1 %v10010_v55  ;;  %7070 = vmatprep.subr.bf16.mxu0 %v10015_v56  ;;  %v10098_v55 = vld [vmem:[%s11622_s25 + $0x524] ss:$8 sps:$4 sm:$0xff]   ;;  %v10093_v56 = vld [vmem:[%s11622_s25 + $0x420] ss:$8 sps:$4 sm:$0xff]  }
  0x94   : > { %7121 = vmatprep.subr.bf16.mxu1 %v10018_v57  ;;  %v10096_v57 = vld [vmem:[%s11622_s25 + $0x520] ss:$8 sps:$4 sm:$0xff]  }
  0x96   : > { %7071 = vmatpush2.bf16.msra.mxu0 %v10013_v58  ;;  %v10101_v58 = vld [vmem:[%s11622_s25 + $0x414] ss:$8 sps:$4 sm:$0xff]  }
  0x97   : > { %7122 = vmatpush2.bf16.msra.mxu1 %v10016_v59  ;;  %7072 = vmatprep.subr.bf16.mxu0 %v10021_v60  ;;  %v10104_v59 = vld [vmem:[%s11622_s25 + $0x514] ss:$8 sps:$4 sm:$0xff]   ;;  %v10099_v60 = vld [vmem:[%s11622_s25 + $0x410] ss:$8 sps:$4 sm:$0xff]  }
  0x98   : > { %7123 = vmatprep.subr.bf16.mxu1 %v10024_v61  ;;  %v10102_v61 = vld [vmem:[%s11622_s25 + $0x510] ss:$8 sps:$4 sm:$0xff]  }
  0x9a   : > { %7073 = vmatpush2.bf16.msra.mxu0 %v10019_v62  ;;  %v10107_v62 = vld [vmem:[%s11622_s25 + $0x404] ss:$8 sps:$4 sm:$0xff]  }
  0x9b   : > { %7124 = vmatpush2.bf16.msra.mxu1 %v10022_v63  ;;  %7074 = vmatprep.subr.bf16.mxu0 %v10027_v0  ;;  %v10110_v63 = vld [vmem:[%s11622_s25 + $0x504] ss:$8 sps:$4 sm:$0xff]   ;;  %v10105_v0 = vld [vmem:[%s11622_s25 + $0x400] ss:$8 sps:$4 sm:$0xff]  }
  0x9c   : > { %7125 = vmatprep.subr.bf16.mxu1 %v10030_v1  ;;  %v10108_v1 = vld [vmem:[%s11622_s25 + $0x500] ss:$8 sps:$4 sm:$0xff]  }
  0x9e   : > { %7075 = vmatpush2.bf16.msra.mxu0 %v10025_v2  ;;  %v10113_v2 = vld [vmem:[%s11622_s25 + $0x4f4] ss:$8 sps:$4 sm:$0xff]  }
  0x9f   : > { %7126 = vmatpush2.bf16.msra.mxu1 %v10028_v3  ;;  %7076 = vmatprep.subr.bf16.mxu0 %v10033_v4  ;;  %v10116_v3 = vld [vmem:[%s11622_s25 + $0x5f4] ss:$8 sps:$4 sm:$0xff]   ;;  %v10111_v4 = vld [vmem:[%s11622_s25 + $0x4f0] ss:$8 sps:$4 sm:$0xff]  }
  0xa0   : > { %7127 = vmatprep.subr.bf16.mxu1 %v10036_v5  ;;  %v10114_v5 = vld [vmem:[%s11622_s25 + $0x5f0] ss:$8 sps:$4 sm:$0xff]  }
  0xa2   : > { %7077 = vmatpush2.bf16.msra.mxu0 %v10031_v6  ;;  %v10119_v6 = vld [vmem:[%s11622_s25 + $0x4e4] ss:$8 sps:$4 sm:$0xff]  }
  0xa3   : > { %7128 = vmatpush2.bf16.msra.mxu1 %v10034_v7  ;;  %7078 = vmatprep.subr.bf16.mxu0 %v10042_v8  ;;  %v10122_v7 = vld [vmem:[%s11622_s25 + $0x5e4] ss:$8 sps:$4 sm:$0xff]   ;;  %v10117_v8 = vld [vmem:[%s11622_s25 + $0x4e0] ss:$8 sps:$4 sm:$0xff]  }
  0xa4   : > { %7129 = vmatprep.subr.bf16.mxu1 %v10045_v9  ;;  %v10120_v9 = vld [vmem:[%s11622_s25 + $0x5e0] ss:$8 sps:$4 sm:$0xff]  }
  0xa6   : > { %7079 = vmatpush2.bf16.msra.mxu0 %v10040_v10  ;;  %v10125_v10 = vld [vmem:[%s11622_s25 + $0x4d4] ss:$8 sps:$4 sm:$0xff]  }
  0xa7   : > { %7130 = vmatpush2.bf16.msra.mxu1 %v10043_v11  ;;  %7080 = vmatprep.subr.bf16.mxu0 %v10049_v12  ;;  %v10128_v11 = vld [vmem:[%s11622_s25 + $0x5d4] ss:$8 sps:$4 sm:$0xff]   ;;  %v10123_v12 = vld [vmem:[%s11622_s25 + $0x4d0] ss:$8 sps:$4 sm:$0xff]  }
  0xa8   : > { %7131 = vmatprep.subr.bf16.mxu1 %v10052_v13  ;;  %v10126_v13 = vld [vmem:[%s11622_s25 + $0x5d0] ss:$8 sps:$4 sm:$0xff]  }
  0xaa   : > { %7081 = vmatpush2.bf16.msra.mxu0 %v10047_v14  ;;  %v10131_v14 = vld [vmem:[%s11622_s25 + $0x4c4] ss:$8 sps:$4 sm:$0xff]  }
  0xab   : > { %7132 = vmatpush2.bf16.msra.mxu1 %v10050_v15  ;;  %7082 = vmatprep.subr.bf16.mxu0 %v10055_v16  ;;  %v10134_v15 = vld [vmem:[%s11622_s25 + $0x5c4] ss:$8 sps:$4 sm:$0xff]   ;;  %v10129_v16 = vld [vmem:[%s11622_s25 + $0x4c0] ss:$8 sps:$4 sm:$0xff]  }
  0xac   : > { %7133 = vmatprep.subr.bf16.mxu1 %v10058_v17  ;;  %v10132_v17 = vld [vmem:[%s11622_s25 + $0x5c0] ss:$8 sps:$4 sm:$0xff]  }
  0xae   : > { %7083 = vmatpush2.bf16.msra.mxu0 %v10053_v18  ;;  %v10137_v18 = vld [vmem:[%s11622_s25 + $0x4b4] ss:$8 sps:$4 sm:$0xff]  }
  0xaf   : > { %7134 = vmatpush2.bf16.msra.mxu1 %v10056_v19  ;;  %7154 = vmatprep.subr.bf16.mxu0 %v10061_v20  ;;  %v10140_v19 = vld [vmem:[%s11622_s25 + $0x5b4] ss:$8 sps:$4 sm:$0xff]   ;;  %v10135_v20 = vld [vmem:[%s11622_s25 + $0x4b0] ss:$8 sps:$4 sm:$0xff]  }
  0xb0   : > { %7205 = vmatprep.subr.bf16.mxu1 %v10064_v21  ;;  %v10138_v21 = vld [vmem:[%s11622_s25 + $0x5b0] ss:$8 sps:$4 sm:$0xff]  }
  0xb1   : > { %7085 = vmatmul.mubr.bf16.vlgmr.msra.gmra.mxu0 %v8670_v24  ;;  %v10141_v24 = vld [vmem:[%s11622_s25 + $0x4a0] ss:$8 sps:$4 sm:$0xff]  }
  0xb2   : > { %7136 = vmatmul.mubr.bf16.vlgmr.msra.gmra.mxu1 %v8672_v25  ;;  %7155 = vmatpush1.bf16.msra.mxu0 %v10059_v22  ;;  %v10143_v22 = vld [vmem:[%s11622_s25 + $0x4a4] ss:$8 sps:$4 sm:$0xff]   ;;  %v10144_v25 = vld [vmem:[%s11622_s25 + $0x5a0] ss:$8 sps:$4 sm:$0xff]  }
  0xb3   : > { %7206 = vmatpush1.bf16.msra.mxu1 %v10062_v23  ;;  %7156 = vmatprep.subr.bf16.mxu0 %v10067_v28  ;;  %v10146_v23 = vld [vmem:[%s11622_s25 + $0x5a4] ss:$8 sps:$4 sm:$0xff]   ;;  %v10147_v28 = vld [vmem:[%s11622_s25 + $0x490] ss:$8 sps:$4 sm:$0xff]  }
  0xb4   : > { %7207 = vmatprep.subr.bf16.mxu1 %v10070_v29  ;;  %7094 = vmatprep.mubr.bf16.mxu0 %v8735_v30  ;;  %v10150_v29 = vld [vmem:[%s11622_s25 + $0x590] ss:$8 sps:$4 sm:$0xff]   ;;  %v10155_v30 = vld [vmem:[%s11622_s25 + $0x484] ss:$8 sps:$4 sm:$0xff]  }
  0xb5   : > { %7145 = vmatprep.mubr.bf16.mxu1 %v8737_v31  ;;  %v10158_v31 = vld [vmem:[%s11622_s25 + $0x584] ss:$8 sps:$4 sm:$0xff]  }
  0xb6   : > { %7157 = vmatpush1.bf16.msra.mxu0 %v10065_v32  ;;  %v10153_v32 = vld [vmem:[%s11622_s25 + $0x480] ss:$8 sps:$4 sm:$0xff]  }
  0xb7   : > { %7208 = vmatpush1.bf16.msra.mxu1 %v10068_v33  ;;  %7158 = vmatprep.subr.bf16.mxu0 %v10075_v34  ;;  %v10156_v33 = vld [vmem:[%s11622_s25 + $0x580] ss:$8 sps:$4 sm:$0xff]   ;;  %v10161_v34 = vld [vmem:[%s11622_s25 + $0x674] ss:$8 sps:$4 sm:$0xff]  }
  0xb8   : > { %7209 = vmatprep.subr.bf16.mxu1 %v10078_v35  ;;  %v10164_v35 = vld [vmem:[%s11622_s25 + $0x774] ss:$8 sps:$4 sm:$0xff]  }
  0xb9   : > { %7095 = vmatmul.mubr.bf16.gmra.mxu0 %v8734_v40  ;;  %v8674_v40 = vcombine.low %v11823_v38, %v11828_v39  ;;  %v10170_v38 = vld [vmem:[%s11622_s25 + $0x764] ss:$8 sps:$4 sm:$0xff]  }
  0xba   : > { %7146 = vmatmul.mubr.bf16.gmra.mxu1 %v8736_v41  ;;  %7159 = vmatpush1.bf16.msra.mxu0 %v10073_v36  ;;  %v10159_v36 = vld [vmem:[%s11622_s25 + $0x670] ss:$8 sps:$4 sm:$0xff]   ;;  %v8676_v41 = vcombine.low %v11833_v42, %v11838_v43  ;;  %v10165_v43 = vld [vmem:[%s11622_s25 + $0x660] ss:$8 sps:$4 sm:$0xff]  }
  0xbb   : > { %7210 = vmatpush1.bf16.msra.mxu1 %v10076_v37  ;;  %7160 = vmatprep.subr.bf16.mxu0 %v10083_v44  ;;  %v10162_v37 = vld [vmem:[%s11622_s25 + $0x770] ss:$8 sps:$4 sm:$0xff]   ;;  %v234_v44 = vld [vmem:[%s13420_s0 + $0x220] sm:$0xff] }
  0xbc   : > { %7211 = vmatprep.subr.bf16.mxu1 %v10086_v45  ;;  %7186 = vmatprep.mubr.bf16.mxu0 %v8675_v46  ;;  %v235_v45 = vld [vmem:[%s13420_s0 + $0x228] sm:$0xff]  ;;  %v8739_v39 = vcombine.high %v234_v44, %v234_v44 }
  0xbd   : > { %7237 = vmatprep.mubr.bf16.mxu1 %v8677_v47  ;;  %v10167_v46 = vld [vmem:[%s11622_s25 + $0x664] ss:$8 sps:$4 sm:$0xff]   ;;  %v8741_v42 = vcombine.high %v235_v45, %v235_v45  ;;  %v10168_v47 = vld [vmem:[%s11622_s25 + $0x760] ss:$8 sps:$4 sm:$0xff]  }
  0xbe   : > { %7161 = vmatpush1.bf16.msra.mxu0 %v10081_v48  ;;  %v10175_v48 = vld [vmem:[%s11622_s25 + $0x654] ss:$8 sps:$4 sm:$0xff]  }
  0xbf   : > { %7212 = vmatpush1.bf16.msra.mxu1 %v10084_v49  ;;  %7162 = vmatprep.subr.bf16.mxu0 %v10089_v50  ;;  %v10178_v49 = vld [vmem:[%s11622_s25 + $0x754] ss:$8 sps:$4 sm:$0xff]   ;;  %v10173_v50 = vld [vmem:[%s11622_s25 + $0x650] ss:$8 sps:$4 sm:$0xff]  }
  0xc0   : > { %7213 = vmatprep.subr.bf16.mxu1 %v10092_v51  ;;  %v10176_v51 = vld [vmem:[%s11622_s25 + $0x750] ss:$8 sps:$4 sm:$0xff]  }
  0xc2   : > { %7163 = vmatpush1.bf16.msra.mxu0 %v10087_v52  ;;  %v11921_v52 = vld [vmem:[%s13420_s0 + $0x30] sm:$0xff] }
  0xc3   : > { %7214 = vmatpush1.bf16.msra.mxu1 %v10090_v53  ;;  %7164 = vmatprep.subr.bf16.mxu0 %v10095_v54  ;;  %v11926_v53 = vld [vmem:[%s13420_s0 + $0x130] sm:$0xff]  ;;  %v8738_v54 = vcombine.low %v234_v44, %v234_v44 }
  0xc4   : > { %7215 = vmatprep.subr.bf16.mxu1 %v10098_v55  ;;  %v8740_v55 = vcombine.low %v235_v45, %v235_v45  ;;  %v10249_v44 = vld [vmem:[%s11622_s25 + $0x694] ss:$8 sps:$4 sm:$0xff]  }
  0xc5   : > { %v10252_v45 = vld [vmem:[%s11622_s25 + $0x794] ss:$8 sps:$4 sm:$0xff]  }
  0xc6   : > { %7165 = vmatpush1.bf16.msra.mxu0 %v10093_v56  ;;  %v11931_v56 = vld [vmem:[%s13420_s0 + $0x38] sm:$0xff] }
  0xc7   : > { %7216 = vmatpush1.bf16.msra.mxu1 %v10096_v57  ;;  %7166 = vmatprep.subr.bf16.mxu0 %v10101_v58  ;;  %v11936_v57 = vld [vmem:[%s13420_s0 + $0x138] sm:$0xff]  ;;  %v10183_v58 = vld [vmem:[%s11622_s25 + $0x644] ss:$8 sps:$4 sm:$0xff]  }
  0xc8   : > { %7217 = vmatprep.subr.bf16.mxu1 %v10104_v59  ;;  %v10186_v59 = vld [vmem:[%s11622_s25 + $0x744] ss:$8 sps:$4 sm:$0xff]  }
  0xca   : > { %7167 = vmatpush1.bf16.msra.mxu0 %v10099_v60  ;;  %v8679_v60 = vcombine.high %v11921_v52, %v11926_v53 }
  0xcb   : > { %7218 = vmatpush1.bf16.msra.mxu1 %v10102_v61  ;;  %7168 = vmatprep.subr.bf16.mxu0 %v10107_v62  ;;  %v8681_v61 = vcombine.high %v11931_v56, %v11936_v57  ;;  %v10181_v62 = vld [vmem:[%s11622_s25 + $0x640] ss:$8 sps:$4 sm:$0xff]  }
  0xcc   : > { %7219 = vmatprep.subr.bf16.mxu1 %v10110_v63  ;;  %v10184_v63 = vld [vmem:[%s11622_s25 + $0x740] ss:$8 sps:$4 sm:$0xff]  }
  0xce   : > { %7169 = vmatpush1.bf16.msra.mxu0 %v10105_v0  ;;  %v10189_v0 = vld [vmem:[%s11622_s25 + $0x634] ss:$8 sps:$4 sm:$0xff]  }
  0xcf   : > { %7220 = vmatpush1.bf16.msra.mxu1 %v10108_v1  ;;  %7170 = vmatprep.subr.bf16.mxu0 %v10113_v2  ;;  %v10192_v1 = vld [vmem:[%s11622_s25 + $0x734] ss:$8 sps:$4 sm:$0xff]   ;;  %v10187_v2 = vld [vmem:[%s11622_s25 + $0x630] ss:$8 sps:$4 sm:$0xff]  }
  0xd0   : > { %7221 = vmatprep.subr.bf16.mxu1 %v10116_v3  ;;  %v10190_v3 = vld [vmem:[%s11622_s25 + $0x730] ss:$8 sps:$4 sm:$0xff]  }
  0xd2   : > { %7171 = vmatpush2.bf16.msra.mxu0 %v10111_v4  ;;  %v10195_v4 = vld [vmem:[%s11622_s25 + $0x624] ss:$8 sps:$4 sm:$0xff]  }
  0xd3   : > { %7222 = vmatpush2.bf16.msra.mxu1 %v10114_v5  ;;  %7172 = vmatprep.subr.bf16.mxu0 %v10119_v6  ;;  %v10198_v5 = vld [vmem:[%s11622_s25 + $0x724] ss:$8 sps:$4 sm:$0xff]   ;;  %v10193_v6 = vld [vmem:[%s11622_s25 + $0x620] ss:$8 sps:$4 sm:$0xff]  }
  0xd4   : > { %7223 = vmatprep.subr.bf16.mxu1 %v10122_v7  ;;  %v10196_v7 = vld [vmem:[%s11622_s25 + $0x720] ss:$8 sps:$4 sm:$0xff]  }
  0xd6   : > { %7173 = vmatpush2.bf16.msra.mxu0 %v10117_v8  ;;  %v10201_v8 = vld [vmem:[%s11622_s25 + $0x614] ss:$8 sps:$4 sm:$0xff]  }
  0xd7   : > { %7224 = vmatpush2.bf16.msra.mxu1 %v10120_v9  ;;  %7174 = vmatprep.subr.bf16.mxu0 %v10125_v10  ;;  %v10204_v9 = vld [vmem:[%s11622_s25 + $0x714] ss:$8 sps:$4 sm:$0xff]   ;;  %v10199_v10 = vld [vmem:[%s11622_s25 + $0x610] ss:$8 sps:$4 sm:$0xff]  }
  0xd8   : > { %7225 = vmatprep.subr.bf16.mxu1 %v10128_v11  ;;  %v10202_v11 = vld [vmem:[%s11622_s25 + $0x710] ss:$8 sps:$4 sm:$0xff]  }
  0xda   : > { %7175 = vmatpush2.bf16.msra.mxu0 %v10123_v12  ;;  %v10207_v12 = vld [vmem:[%s11622_s25 + $0x604] ss:$8 sps:$4 sm:$0xff]  }
  0xdb   : > { %7226 = vmatpush2.bf16.msra.mxu1 %v10126_v13  ;;  %7176 = vmatprep.subr.bf16.mxu0 %v10131_v14  ;;  %v10210_v13 = vld [vmem:[%s11622_s25 + $0x704] ss:$8 sps:$4 sm:$0xff]   ;;  %v10205_v14 = vld [vmem:[%s11622_s25 + $0x600] ss:$8 sps:$4 sm:$0xff]  }
  0xdc   : > { %7227 = vmatprep.subr.bf16.mxu1 %v10134_v15  ;;  %v10208_v15 = vld [vmem:[%s11622_s25 + $0x700] ss:$8 sps:$4 sm:$0xff]  }
  0xde   : > { %7177 = vmatpush2.bf16.msra.mxu0 %v10129_v16  ;;  %v10213_v16 = vld [vmem:[%s11622_s25 + $0x6f4] ss:$8 sps:$4 sm:$0xff]  }
  0xdf   : > { %7228 = vmatpush2.bf16.msra.mxu1 %v10132_v17  ;;  %7178 = vmatprep.subr.bf16.mxu0 %v10137_v18  ;;  %v10216_v17 = vld [vmem:[%s11622_s25 + $0x7f4] ss:$8 sps:$4 sm:$0xff]   ;;  %v10211_v18 = vld [vmem:[%s11622_s25 + $0x6f0] ss:$8 sps:$4 sm:$0xff]  }
  0xe0   : > { %7229 = vmatprep.subr.bf16.mxu1 %v10140_v19  ;;  %v10214_v19 = vld [vmem:[%s11622_s25 + $0x7f0] ss:$8 sps:$4 sm:$0xff]  }
  0xe2   : > { %7179 = vmatpush2.bf16.msra.mxu0 %v10135_v20  ;;  %v10219_v20 = vld [vmem:[%s11622_s25 + $0x6e4] ss:$8 sps:$4 sm:$0xff]  }
  0xe3   : > { %7230 = vmatpush2.bf16.msra.mxu1 %v10138_v21  ;;  %7180 = vmatprep.subr.bf16.mxu0 %v10143_v22  ;;  %v10222_v21 = vld [vmem:[%s11622_s25 + $0x7e4] ss:$8 sps:$4 sm:$0xff]   ;;  %v10217_v22 = vld [vmem:[%s11622_s25 + $0x6e0] ss:$8 sps:$4 sm:$0xff]  }
  0xe4   : > { %7231 = vmatprep.subr.bf16.mxu1 %v10146_v23  ;;  %v10220_v23 = vld [vmem:[%s11622_s25 + $0x7e0] ss:$8 sps:$4 sm:$0xff]  }
  0xe6   : > { %7181 = vmatpush2.bf16.msra.mxu0 %v10141_v24  ;;  %v10225_v24 = vld [vmem:[%s11622_s25 + $0x6d4] ss:$8 sps:$4 sm:$0xff]  }
  0xe7   : > { %7232 = vmatpush2.bf16.msra.mxu1 %v10144_v25  ;;  %7182 = vmatprep.subr.bf16.mxu0 %v10149_v26  ;;  %v10228_v25 = vld [vmem:[%s11622_s25 + $0x7d4] ss:$8 sps:$4 sm:$0xff]   ;;  %v10223_v26 = vld [vmem:[%s11622_s25 + $0x6d0] ss:$8 sps:$4 sm:$0xff]  }
  0xe8   : > { %7233 = vmatprep.subr.bf16.mxu1 %v10152_v27  ;;  %v10226_v27 = vld [vmem:[%s11622_s25 + $0x7d0] ss:$8 sps:$4 sm:$0xff]  }
  0xea   : > { %7183 = vmatpush2.bf16.msra.mxu0 %v10147_v28  ;;  %v10231_v28 = vld [vmem:[%s11622_s25 + $0x6c4] ss:$8 sps:$4 sm:$0xff]  }
  0xeb   : > { %7234 = vmatpush2.bf16.msra.mxu1 %v10150_v29  ;;  %7184 = vmatprep.subr.bf16.mxu0 %v10155_v30  ;;  %v10234_v29 = vld [vmem:[%s11622_s25 + $0x7c4] ss:$8 sps:$4 sm:$0xff]   ;;  %v10229_v30 = vld [vmem:[%s11622_s25 + $0x6c0] ss:$8 sps:$4 sm:$0xff]  }
  0xec   : > { %7235 = vmatprep.subr.bf16.mxu1 %v10158_v31  ;;  %v10232_v31 = vld [vmem:[%s11622_s25 + $0x7c0] ss:$8 sps:$4 sm:$0xff]  }
  0xee   : > { %7185 = vmatpush2.bf16.msra.mxu0 %v10153_v32  ;;  %v10237_v32 = vld [vmem:[%s11622_s25 + $0x6b4] ss:$8 sps:$4 sm:$0xff]  }
  0xef   : > { %7236 = vmatpush2.bf16.msra.mxu1 %v10156_v33  ;;  %7256 = vmatprep.subr.bf16.mxu0 %v10161_v34  ;;  %v10240_v33 = vld [vmem:[%s11622_s25 + $0x7b4] ss:$8 sps:$4 sm:$0xff]   ;;  %v10235_v34 = vld [vmem:[%s11622_s25 + $0x6b0] ss:$8 sps:$4 sm:$0xff]  }
  0xf0   : > { %7307 = vmatprep.subr.bf16.mxu1 %v10164_v35  ;;  %v10238_v35 = vld [vmem:[%s11622_s25 + $0x7b0] ss:$8 sps:$4 sm:$0xff]  }
  0xf1   : > { %7187 = vmatmul.mubr.bf16.vlgmr.msra.gmra.mxu0 %v8674_v40  ;;  %v10241_v40 = vld [vmem:[%s11622_s25 + $0x6a0] ss:$8 sps:$4 sm:$0xff]  }
  0xf2   : > { %7238 = vmatmul.mubr.bf16.vlgmr.msra.gmra.mxu1 %v8676_v41  ;;  %7257 = vmatpush1.bf16.msra.mxu0 %v10159_v36  ;;  %v10243_v36 = vld [vmem:[%s11622_s25 + $0x6a4] ss:$8 sps:$4 sm:$0xff]   ;;  %v10244_v41 = vld [vmem:[%s11622_s25 + $0x7a0] ss:$8 sps:$4 sm:$0xff]  }
  0xf3   : > { %7308 = vmatpush1.bf16.msra.mxu1 %v10162_v37  ;;  %7258 = vmatprep.subr.bf16.mxu0 %v10167_v46  ;;  %v10246_v37 = vld [vmem:[%s11622_s25 + $0x7a4] ss:$8 sps:$4 sm:$0xff]   ;;  %v10247_v46 = vld [vmem:[%s11622_s25 + $0x690] ss:$8 sps:$4 sm:$0xff]  }
  0xf4   : > { %7309 = vmatprep.subr.bf16.mxu1 %v10170_v38  ;;  %7196 = vmatprep.mubr.bf16.mxu0 %v8739_v39  ;;  %v10250_v38 = vld [vmem:[%s11622_s25 + $0x790] ss:$8 sps:$4 sm:$0xff]   ;;  %v10255_v39 = vld [vmem:[%s11622_s25 + $0x684] ss:$8 sps:$4 sm:$0xff]  }
  0xf5   : > { %7247 = vmatprep.mubr.bf16.mxu1 %v8741_v42  ;;  %v10258_v42 = vld [vmem:[%s11622_s25 + $0x784] ss:$8 sps:$4 sm:$0xff]  }
  0xf6   : > { %7259 = vmatpush1.bf16.msra.mxu0 %v10165_v43  ;;  %v10253_v43 = vld [vmem:[%s11622_s25 + $0x680] ss:$8 sps:$4 sm:$0xff]  }
  0xf7   : > { %7310 = vmatpush1.bf16.msra.mxu1 %v10168_v47  ;;  %7260 = vmatprep.subr.bf16.mxu0 %v10175_v48  ;;  %v10256_v47 = vld [vmem:[%s11622_s25 + $0x780] ss:$8 sps:$4 sm:$0xff]   ;;  %v10261_v48 = vld [vmem:[%s11622_s25 + $0x874] ss:$8 sps:$4 sm:$0xff]  }
  0xf8   : > { %7311 = vmatprep.subr.bf16.mxu1 %v10178_v49  ;;  %v10264_v49 = vld [vmem:[%s11622_s25 + $0x974] ss:$8 sps:$4 sm:$0xff]  }
  0xf9   : > { %7197 = vmatmul.mubr.bf16.gmra.mxu0 %v8738_v54  ;;  %v8680_v54 = vcombine.low %v11931_v56, %v11936_v57  ;;  %v10268_v57 = vld [vmem:[%s11622_s25 + $0x960] ss:$8 sps:$4 sm:$0xff]  }
  0xfa   : > { %7248 = vmatmul.mubr.bf16.gmra.mxu1 %v8740_v55  ;;  %7261 = vmatpush1.bf16.msra.mxu0 %v10173_v50  ;;  %v236_v50 = vld [vmem:[%s13420_s0 + $0x230] sm:$0xff]  ;;  %v237_v55 = vld [vmem:[%s13420_s0 + $0x238] sm:$0xff] }
  0xfb   : > { %7312 = vmatpush1.bf16.msra.mxu1 %v10176_v51  ;;  %7262 = vmatprep.subr.bf16.mxu0 %v10183_v58  ;;  %v8678_v51 = vcombine.low %v11921_v52, %v11926_v53  ;;  %v10259_v58 = vld [vmem:[%s11622_s25 + $0x870] ss:$8 sps:$4 sm:$0xff]   ;;  %v8743_v52 = vcombine.high %v236_v50, %v236_v50  ;;  %v8745_v53 = vcombine.high %v237_v55, %v237_v55 }
  0xfc   : > { %7313 = vmatprep.subr.bf16.mxu1 %v10186_v59  ;;  %7288 = vmatprep.mubr.bf16.mxu0 %v8679_v60  ;;  %v10262_v59 = vld [vmem:[%s11622_s25 + $0x970] ss:$8 sps:$4 sm:$0xff]   ;;  %v10267_v60 = vld [vmem:[%s11622_s25 + $0x864] ss:$8 sps:$4 sm:$0xff]  }
  0xfd   : > { %7339 = vmatprep.mubr.bf16.mxu1 %v8681_v61  ;;  %v10270_v61 = vld [vmem:[%s11622_s25 + $0x964] ss:$8 sps:$4 sm:$0xff]  }
  0xfe   : > { %7263 = vmatpush1.bf16.msra.mxu0 %v10181_v62  ;;  %v10265_v62 = vld [vmem:[%s11622_s25 + $0x860] ss:$8 sps:$4 sm:$0xff]  }
  0xff   : > { %7314 = vmatpush1.bf16.msra.mxu1 %v10184_v63  ;;  %7264 = vmatprep.subr.bf16.mxu0 %v10189_v0 }
 0x100   : > { %7315 = vmatprep.subr.bf16.mxu1 %v10192_v1  ;;  %v10275_v1 = vld [vmem:[%s11622_s25 + $0x854] ss:$8 sps:$4 sm:$0xff]  }
 0x102   : > { %7265 = vmatpush1.bf16.msra.mxu0 %v10187_v2  ;;  %v10278_v2 = vld [vmem:[%s11622_s25 + $0x954] ss:$8 sps:$4 sm:$0xff]  }
 0x103   : > { %7316 = vmatpush1.bf16.msra.mxu1 %v10190_v3  ;;  %7266 = vmatprep.subr.bf16.mxu0 %v10195_v4 }
 0x104   : > { %7317 = vmatprep.subr.bf16.mxu1 %v10198_v5  ;;  %v12019_v5 = vld [vmem:[%s13420_s0 + $0x40] sm:$0xff] }
 0x106   : > { %7267 = vmatpush1.bf16.msra.mxu0 %v10193_v6  ;;  %v12024_v6 = vld [vmem:[%s13420_s0 + $0x140] sm:$0xff] }
 0x107   : > { %7318 = vmatpush1.bf16.msra.mxu1 %v10196_v7  ;;  %7268 = vmatprep.subr.bf16.mxu0 %v10201_v8  ;;  %v12031_v8 = vld [vmem:[%s13420_s0 + $0x48] sm:$0xff] }
 0x108   : > { %7319 = vmatprep.subr.bf16.mxu1 %v10204_v9 }
 0x10a   : > { %7269 = vmatpush1.bf16.msra.mxu0 %v10199_v10 }
 0x10b   : > { %7320 = vmatpush1.bf16.msra.mxu1 %v10202_v11  ;;  %7270 = vmatprep.subr.bf16.mxu0 %v10207_v12  ;;  %v8742_v11 = vcombine.low %v236_v50, %v236_v50  ;;  %v8744_v12 = vcombine.low %v237_v55, %v237_v55  ;;  %v10308_v50 = vld [vmem:[%s11622_s25 + $0x900] ss:$8 sps:$4 sm:$0xff]   ;;  %v10311_v55 = vld [vmem:[%s11622_s25 + $0x8f0] ss:$8 sps:$4 sm:$0xff]  }
 0x10c   : > { %7321 = vmatprep.subr.bf16.mxu1 %v10210_v13  ;;  %v12036_v13 = vld [vmem:[%s13420_s0 + $0x148] sm:$0xff] }
 0x10e   : > { %7271 = vmatpush1.bf16.msra.mxu0 %v10205_v14 }
 0x10f   : > { %7322 = vmatpush1.bf16.msra.mxu1 %v10208_v15  ;;  %7272 = vmatprep.subr.bf16.mxu0 %v10213_v16  ;;  %v10273_v15 = vld [vmem:[%s11622_s25 + $0x850] ss:$8 sps:$4 sm:$0xff]  }
 0x110   : > { %7323 = vmatprep.subr.bf16.mxu1 %v10216_v17  ;;  %v10276_v16 = vld [vmem:[%s11622_s25 + $0x950] ss:$8 sps:$4 sm:$0xff]   ;;  %v10283_v17 = vld [vmem:[%s11622_s25 + $0x844] ss:$8 sps:$4 sm:$0xff]  }
 0x112   : > { %7273 = vmatpush2.bf16.msra.mxu0 %v10211_v18  ;;  %v10286_v18 = vld [vmem:[%s11622_s25 + $0x944] ss:$8 sps:$4 sm:$0xff]  }
 0x113   : > { %7324 = vmatpush2.bf16.msra.mxu1 %v10214_v19  ;;  %7274 = vmatprep.subr.bf16.mxu0 %v10219_v20  ;;  %v8683_v19 = vcombine.high %v12019_v5, %v12024_v6  ;;  %v8685_v20 = vcombine.high %v12031_v8, %v12036_v13 }
 0x114   : > { %7325 = vmatprep.subr.bf16.mxu1 %v10222_v21  ;;  %v10281_v21 = vld [vmem:[%s11622_s25 + $0x840] ss:$8 sps:$4 sm:$0xff]  }
 0x116   : > { %7275 = vmatpush2.bf16.msra.mxu0 %v10217_v22  ;;  %v10284_v22 = vld [vmem:[%s11622_s25 + $0x940] ss:$8 sps:$4 sm:$0xff]  }
 0x117   : > { %7326 = vmatpush2.bf16.msra.mxu1 %v10220_v23  ;;  %7276 = vmatprep.subr.bf16.mxu0 %v10225_v24  ;;  %v10289_v23 = vld [vmem:[%s11622_s25 + $0x834] ss:$8 sps:$4 sm:$0xff]  }
 0x118   : > { %7327 = vmatprep.subr.bf16.mxu1 %v10228_v25  ;;  %v10292_v24 = vld [vmem:[%s11622_s25 + $0x934] ss:$8 sps:$4 sm:$0xff]   ;;  %v10287_v25 = vld [vmem:[%s11622_s25 + $0x830] ss:$8 sps:$4 sm:$0xff]  }
 0x11a   : > { %7277 = vmatpush2.bf16.msra.mxu0 %v10223_v26  ;;  %v10290_v26 = vld [vmem:[%s11622_s25 + $0x930] ss:$8 sps:$4 sm:$0xff]  }
 0x11b   : > { %7328 = vmatpush2.bf16.msra.mxu1 %v10226_v27  ;;  %7278 = vmatprep.subr.bf16.mxu0 %v10231_v28  ;;  %v10295_v27 = vld [vmem:[%s11622_s25 + $0x824] ss:$8 sps:$4 sm:$0xff]  }
 0x11c   : > { %7329 = vmatprep.subr.bf16.mxu1 %v10234_v29 }
 0x11e   : > { %7279 = vmatpush2.bf16.msra.mxu0 %v10229_v30  ;;  %v10298_v30 = vld [vmem:[%s11622_s25 + $0x924] ss:$8 sps:$4 sm:$0xff]  }
 0x11f   : > { %7330 = vmatpush2.bf16.msra.mxu1 %v10232_v31  ;;  %7280 = vmatprep.subr.bf16.mxu0 %v10237_v32  ;;  %v10293_v31 = vld [vmem:[%s11622_s25 + $0x820] ss:$8 sps:$4 sm:$0xff]  }
 0x120   : > { %7331 = vmatprep.subr.bf16.mxu1 %v10240_v33  ;;  %v10296_v32 = vld [vmem:[%s11622_s25 + $0x920] ss:$8 sps:$4 sm:$0xff]  }
 0x122   : > { %7281 = vmatpush2.bf16.msra.mxu0 %v10235_v34 }
 0x123   : > { %7332 = vmatpush2.bf16.msra.mxu1 %v10238_v35  ;;  %7282 = vmatprep.subr.bf16.mxu0 %v10243_v36  ;;  %v10301_v35 = vld [vmem:[%s11622_s25 + $0x814] ss:$8 sps:$4 sm:$0xff]  }
 0x124   : > { %7333 = vmatprep.subr.bf16.mxu1 %v10246_v37  ;;  %v10304_v37 = vld [vmem:[%s11622_s25 + $0x914] ss:$8 sps:$4 sm:$0xff]  }
 0x126   : > { %7283 = vmatpush2.bf16.msra.mxu0 %v10241_v40 }
 0x127   : > { %7334 = vmatpush2.bf16.msra.mxu1 %v10244_v41  ;;  %7284 = vmatprep.subr.bf16.mxu0 %v10249_v44 }
 0x128   : > { %7335 = vmatprep.subr.bf16.mxu1 %v10252_v45  ;;  %v10299_v45 = vld [vmem:[%s11622_s25 + $0x810] ss:$8 sps:$4 sm:$0xff]  }
 0x12a   : > { %7285 = vmatpush2.bf16.msra.mxu0 %v10247_v46  ;;  %v10302_v46 = vld [vmem:[%s11622_s25 + $0x910] ss:$8 sps:$4 sm:$0xff]  }
 0x12b   : > { %7336 = vmatpush2.bf16.msra.mxu1 %v10250_v38  ;;  %7286 = vmatprep.subr.bf16.mxu0 %v10255_v39 }
 0x12c   : > { %7337 = vmatprep.subr.bf16.mxu1 %v10258_v42  ;;  %v10307_v42 = vld [vmem:[%s11622_s25 + $0x804] ss:$8 sps:$4 sm:$0xff]  }
 0x12e   : > { %7287 = vmatpush2.bf16.msra.mxu0 %v10253_v43  ;;  %v10310_v43 = vld [vmem:[%s11622_s25 + $0x904] ss:$8 sps:$4 sm:$0xff]  }
 0x12f   : > { %7338 = vmatpush2.bf16.msra.mxu1 %v10256_v47  ;;  %7358 = vmatprep.subr.bf16.mxu0 %v10261_v48 }
 0x130   : > { %7409 = vmatprep.subr.bf16.mxu1 %v10264_v49  ;;  %v10305_v49 = vld [vmem:[%s11622_s25 + $0x800] ss:$8 sps:$4 sm:$0xff]  }
 0x131   : > { %v6984_v63 = vpop.f32.mrf.mxu0  ;;  %7289 = vmatmul.mubr.bf16.vlgmr.msra.gmra.mxu0 %v8678_v51  ;;  %v10313_v51 = vld [vmem:[%s11622_s25 + $0x8f4] ss:$8 sps:$4 sm:$0xff]  }
 0x132   : > { %v7035_v56 = vpop.f32.mrf.mxu1  ;;  %7340 = vmatmul.mubr.bf16.vlgmr.msra.gmra.mxu1 %v8680_v54  ;;  %7359 = vmatpush1.bf16.msra.mxu0 %v10259_v58  ;;  %v10316_v54 = vld [vmem:[%s11622_s25 + $0x9f4] ss:$8 sps:$4 sm:$0xff]   ;;  %v10314_v58 = vld [vmem:[%s11622_s25 + $0x9f0] ss:$8 sps:$4 sm:$0xff]  }
 0x133   : > { %v12012_v0 = vadd.f32 %v7035_v56, %v6984_v63  ;;  %7410 = vmatpush1.bf16.msra.mxu1 %v10262_v59  ;;  %v6986_v3 = vpop.f32.mrf.mxu0  ;;  %7360 = vmatprep.subr.bf16.mxu0 %v10267_v60  ;;  %v10319_v59 = vld [vmem:[%s11622_s25 + $0x8e4] ss:$8 sps:$4 sm:$0xff]   ;;  %v10323_v63 = vld [vmem:[%s11622_s25 + $0x8d0] ss:$8 sps:$4 sm:$0xff]  }
 0x134   : > { %v7037_v4 = vpop.f32.mrf.mxu1  ;;  %7411 = vmatprep.subr.bf16.mxu1 %v10270_v61  ;;  %7298 = vmatprep.mubr.bf16.mxu0 %v8743_v52  ;;  %v10322_v60 = vld [vmem:[%s11622_s25 + $0x9e4] ss:$8 sps:$4 sm:$0xff]   ;;  %v10317_v61 = vld [vmem:[%s11622_s25 + $0x8e0] ss:$8 sps:$4 sm:$0xff]   ;;  %v10325_v52 = vld [vmem:[%s11622_s25 + $0x8d4] ss:$8 sps:$4 sm:$0xff]  }
 0x135   : > { %v12026_v7 = vadd.f32 %v7037_v4, %v6986_v3  ;;  %7349 = vmatprep.mubr.bf16.mxu1 %v8745_v53  ;;  %v6988_v9 = vpop.f32.mrf.mxu0  ;;  %v10328_v53 = vld [vmem:[%s11622_s25 + $0x9d4] ss:$8 sps:$4 sm:$0xff]   ;;  %v10326_v56 = vld [vmem:[%s11622_s25 + $0x9d0] ss:$8 sps:$4 sm:$0xff]   ;;  %v10332_v3 = vld [vmem:[%s11622_s25 + $0x9c0] ss:$8 sps:$4 sm:$0xff]  }
 0x136   : > { %v7039_v10 = vpop.f32.mrf.mxu1  ;;  %7361 = vmatpush1.bf16.msra.mxu0 %v10265_v62  ;;  %v10320_v62 = vld [vmem:[%s11622_s25 + $0x9e0] ss:$8 sps:$4 sm:$0xff]   ;;  %v10337_v4 = vld [vmem:[%s11622_s25 + $0x8b4] ss:$8 sps:$4 sm:$0xff]  }
 0x137   : > { %v12038_v14 = vadd.f32 %v7039_v10, %v6988_v9  ;;  %7412 = vmatpush1.bf16.msra.mxu1 %v10268_v57  ;;  %7362 = vmatprep.subr.bf16.mxu0 %v10275_v1  ;;  %v12055_v28 = vpop.f32.mrf.mxu0  ;;  %v10331_v57 = vld [vmem:[%s11622_s25 + $0x8c4] ss:$8 sps:$4 sm:$0xff]   ;;  %v10340_v9 = vld [vmem:[%s11622_s25 + $0x9b4] ss:$8 sps:$4 sm:$0xff]   ;;  %v10335_v10 = vld [vmem:[%s11622_s25 + $0x8b0] ss:$8 sps:$4 sm:$0xff]  }
 0x138   : > { %7413 = vmatprep.subr.bf16.mxu1 %v10278_v2  ;;  %v12057_v29 = vpop.f32.mrf.mxu1  ;;  %v10334_v1 = vld [vmem:[%s11622_s25 + $0x9c4] ss:$8 sps:$4 sm:$0xff]   ;;  %v10329_v2 = vld [vmem:[%s11622_s25 + $0x8c0] ss:$8 sps:$4 sm:$0xff]  }
 0x139   : > { %7299 = vmatmul.mubr.bf16.gmra.mxu0 %v8742_v11  ;;  %v6994_v33 = vpop.f32.mrf.mxu0  ;;  %v10338_v11 = vld [vmem:[%s11622_s25 + $0x9b0] ss:$8 sps:$4 sm:$0xff]  }
 0x13a   : > { %7350 = vmatmul.mubr.bf16.gmra.mxu1 %v8744_v12  ;;  %7363 = vmatpush1.bf16.msra.mxu0 %v10273_v15  ;;  %v7045_v34 = vpop.f32.mrf.mxu1  ;;  %v10343_v12 = vld [vmem:[%s11622_s25 + $0x8a4] ss:$8 sps:$4 sm:$0xff]  }
 0x13b   : > { %7414 = vmatpush1.bf16.msra.mxu1 %v10276_v16  ;;  %7364 = vmatprep.subr.bf16.mxu0 %v10283_v17  ;;  %v12063_v36 = vadd.f32 %v7045_v34, %v6994_v33  ;;  %v6996_v40 = vpop.f32.mrf.mxu0  ;;  %v10346_v15 = vld [vmem:[%s11622_s25 + $0x9a4] ss:$8 sps:$4 sm:$0xff]   ;;  %v10341_v16 = vld [vmem:[%s11622_s25 + $0x8a0] ss:$8 sps:$4 sm:$0xff]  }
 0x13c   : > { %7415 = vmatprep.subr.bf16.mxu1 %v10286_v18  ;;  %7390 = vmatprep.mubr.bf16.mxu0 %v8683_v19  ;;  %v7047_v41 = vpop.f32.mrf.mxu1  ;;  %v10344_v17 = vld [vmem:[%s11622_s25 + $0x9a0] ss:$8 sps:$4 sm:$0xff]   ;;  %v10349_v18 = vld [vmem:[%s11622_s25 + $0x894] ss:$8 sps:$4 sm:$0xff]  }
 0x13d   : > { %7441 = vmatprep.mubr.bf16.mxu1 %v8685_v20  ;;  %v12066_v44 = vadd.f32 %v7047_v41, %v6996_v40  ;;  %v6998_v38 = vpop.f32.mrf.mxu0  ;;  %v10352_v19 = vld [vmem:[%s11622_s25 + $0x994] ss:$8 sps:$4 sm:$0xff]   ;;  %v10347_v20 = vld [vmem:[%s11622_s25 + $0x890] ss:$8 sps:$4 sm:$0xff]   ;;  %v238_v33 = vld [vmem:[%s13420_s0 + $0x240] sm:$0xff] }
 0x13e   : > { %7365 = vmatpush1.bf16.msra.mxu0 %v10281_v21  ;;  %v7049_v39 = vpop.f32.mrf.mxu1  ;;  %v10350_v21 = vld [vmem:[%s11622_s25 + $0x990] ss:$8 sps:$4 sm:$0xff]   ;;  %v239_v34 = vld [vmem:[%s13420_s0 + $0x248] sm:$0xff] }
 0x13f   : > { %7416 = vmatpush1.bf16.msra.mxu1 %v10284_v22  ;;  %7366 = vmatprep.subr.bf16.mxu0 %v10289_v23  ;;  %v6999_v47 = vpop.f32.mrf.mxu0  ;;  %v10355_v22 = vld [vmem:[%s11622_s25 + $0x884] ss:$8 sps:$4 sm:$0xff]   ;;  %v8749_v40 = vcombine.high %v239_v34, %v239_v34 }
 0x140   : > { %7417 = vmatprep.subr.bf16.mxu1 %v10292_v24  ;;  %v7050_v48 = vpop.f32.mrf.mxu1  ;;  %v10358_v23 = vld [vmem:[%s11622_s25 + $0x984] ss:$8 sps:$4 sm:$0xff]   ;;  %v10353_v24 = vld [vmem:[%s11622_s25 + $0x880] ss:$8 sps:$4 sm:$0xff]   ;;  %v12130_v47 = vld [vmem:[%s13420_s0 + $0x50] sm:$0xff] }
 0x142   : > { %7367 = vmatpush1.bf16.msra.mxu0 %v10287_v25  ;;  %v10356_v25 = vld [vmem:[%s11622_s25 + $0x980] ss:$8 sps:$4 sm:$0xff]  }
 0x143   : > { %7418 = vmatpush1.bf16.msra.mxu1 %v10290_v26  ;;  %7368 = vmatprep.subr.bf16.mxu0 %v10295_v27  ;;  %v10361_v26 = vld [vmem:[%s11622_s25 + $0xa74] ss:$8 sps:$4 sm:$0xff]  }
 0x144   : > { %7419 = vmatprep.subr.bf16.mxu1 %v10298_v30  ;;  %v10364_v27 = vld [vmem:[%s11622_s25 + $0xb74] ss:$8 sps:$4 sm:$0xff]   ;;  %v8682_v30 = vcombine.low %v12019_v5, %v12024_v6  ;;  %v10370_v5 = vld [vmem:[%s11622_s25 + $0xb64] ss:$8 sps:$4 sm:$0xff]   ;;  %v10365_v6 = vld [vmem:[%s11622_s25 + $0xa60] ss:$8 sps:$4 sm:$0xff]  }
 0x146   : > { %7369 = vmatpush1.bf16.msra.mxu0 %v10293_v31  ;;  %v8684_v31 = vcombine.low %v12031_v8, %v12036_v13  ;;  %v10368_v8 = vld [vmem:[%s11622_s25 + $0xb60] ss:$8 sps:$4 sm:$0xff]   ;;  %v8747_v13 = vcombine.high %v238_v33, %v238_v33 }
 0x147   : > { %7420 = vmatpush1.bf16.msra.mxu1 %v10296_v32  ;;  %7370 = vmatprep.subr.bf16.mxu0 %v10301_v35  ;;  %v10359_v32 = vld [vmem:[%s11622_s25 + $0xa70] ss:$8 sps:$4 sm:$0xff]  }
 0x148   : > { %7421 = vmatprep.subr.bf16.mxu1 %v10304_v37  ;;  %v10362_v35 = vld [vmem:[%s11622_s25 + $0xb70] ss:$8 sps:$4 sm:$0xff]   ;;  %v10367_v37 = vld [vmem:[%s11622_s25 + $0xa64] ss:$8 sps:$4 sm:$0xff]  }
 0x14a   : > { %7371 = vmatpush1.bf16.msra.mxu0 %v10299_v45 }
 0x14b   : > { %7422 = vmatpush1.bf16.msra.mxu1 %v10302_v46  ;;  %7372 = vmatprep.subr.bf16.mxu0 %v10307_v42  ;;  %v10375_v46 = vld [vmem:[%s11622_s25 + $0xa54] ss:$8 sps:$4 sm:$0xff]  }
 0x14c   : > { %7423 = vmatprep.subr.bf16.mxu1 %v10310_v43  ;;  %v10378_v43 = vld [vmem:[%s11622_s25 + $0xb54] ss:$8 sps:$4 sm:$0xff]  }
 0x14e   : > { %7373 = vmatpush1.bf16.msra.mxu0 %v10305_v49 }
 0x14f   : > { %7424 = vmatpush1.bf16.msra.mxu1 %v10308_v50  ;;  %7374 = vmatprep.subr.bf16.mxu0 %v10313_v51  ;;  %v10373_v50 = vld [vmem:[%s11622_s25 + $0xa50] ss:$8 sps:$4 sm:$0xff]  }
 0x150   : > { %7425 = vmatprep.subr.bf16.mxu1 %v10316_v54  ;;  %v10376_v51 = vld [vmem:[%s11622_s25 + $0xb50] ss:$8 sps:$4 sm:$0xff]  }
 0x151   : > { %v12145_v54 = vld [vmem:[%s13420_s0 + $0x58] sm:$0xff] }
 0x152   : > { %7375 = vmatpush2.bf16.msra.mxu0 %v10311_v55 }
 0x153   : > { %7426 = vmatpush2.bf16.msra.mxu1 %v10314_v58  ;;  %7376 = vmatprep.subr.bf16.mxu0 %v10319_v59  ;;  %v8748_v59 = vcombine.low %v239_v34, %v239_v34  ;;  %v10407_v34 = vld [vmem:[%s11622_s25 + $0xa04] ss:$8 sps:$4 sm:$0xff]  }
 0x154   : > { %7427 = vmatprep.subr.bf16.mxu1 %v10322_v60  ;;  %v12150_v60 = vld [vmem:[%s13420_s0 + $0x158] sm:$0xff] }
 0x156   : > { %7377 = vmatpush2.bf16.msra.mxu0 %v10317_v61 }
 0x157   : > { %7428 = vmatpush2.bf16.msra.mxu1 %v10320_v62  ;;  %7378 = vmatprep.subr.bf16.mxu0 %v10325_v52 }
 0x158   : > { %7429 = vmatprep.subr.bf16.mxu1 %v10328_v53 }
 0x15a   : > { %7379 = vmatpush2.bf16.msra.mxu0 %v10323_v63  ;;  %v10383_v63 = vld [vmem:[%s11622_s25 + $0xa44] ss:$8 sps:$4 sm:$0xff]  }
 0x15b   : > { %7430 = vmatpush2.bf16.msra.mxu1 %v10326_v56  ;;  %7380 = vmatprep.subr.bf16.mxu0 %v10331_v57  ;;  %v10386_v56 = vld [vmem:[%s11622_s25 + $0xb44] ss:$8 sps:$4 sm:$0xff]  }
 0x15c   : > { %7431 = vmatprep.subr.bf16.mxu1 %v10334_v1  ;;  %v10381_v1 = vld [vmem:[%s11622_s25 + $0xa40] ss:$8 sps:$4 sm:$0xff]  }
 0x15e   : > { %7381 = vmatpush2.bf16.msra.mxu0 %v10329_v2  ;;  %v10384_v2 = vld [vmem:[%s11622_s25 + $0xb40] ss:$8 sps:$4 sm:$0xff]  }
 0x15f   : > { %7432 = vmatpush2.bf16.msra.mxu1 %v10332_v3  ;;  %7382 = vmatprep.subr.bf16.mxu0 %v10337_v4 }
 0x160   : > { %7433 = vmatprep.subr.bf16.mxu1 %v10340_v9 }
 0x162   : > { %7383 = vmatpush2.bf16.msra.mxu0 %v10335_v10 }
 0x163   : > { %7434 = vmatpush2.bf16.msra.mxu1 %v10338_v11  ;;  %7384 = vmatprep.subr.bf16.mxu0 %v10343_v12 }
 0x164   : > { %7435 = vmatprep.subr.bf16.mxu1 %v10346_v15  ;;  %v10389_v15 = vld [vmem:[%s11622_s25 + $0xa34] ss:$8 sps:$4 sm:$0xff]  }
 0x166   : > { %7385 = vmatpush2.bf16.msra.mxu0 %v10341_v16  ;;  %v10392_v16 = vld [vmem:[%s11622_s25 + $0xb34] ss:$8 sps:$4 sm:$0xff]  }
 0x167   : > { %7436 = vmatpush2.bf16.msra.mxu1 %v10344_v17  ;;  %7386 = vmatprep.subr.bf16.mxu0 %v10349_v18 }
 0x168   : > { %7437 = vmatprep.subr.bf16.mxu1 %v10352_v19 }
 0x16a   : > { %7387 = vmatpush2.bf16.msra.mxu0 %v10347_v20 }
 0x16b   : > { %7438 = vmatpush2.bf16.msra.mxu1 %v10350_v21  ;;  %7388 = vmatprep.subr.bf16.mxu0 %v10355_v22  ;;  %v10387_v21 = vld [vmem:[%s11622_s25 + $0xa30] ss:$8 sps:$4 sm:$0xff]  }
 0x16c   : > { %7439 = vmatprep.subr.bf16.mxu1 %v10358_v23  ;;  %v10390_v22 = vld [vmem:[%s11622_s25 + $0xb30] ss:$8 sps:$4 sm:$0xff]   ;;  %v10398_v23 = vld [vmem:[%s11622_s25 + $0xb24] ss:$8 sps:$4 sm:$0xff]  }
 0x16e   : > { %7389 = vmatpush2.bf16.msra.mxu0 %v10353_v24 }
 0x16f   : > { %7440 = vmatpush2.bf16.msra.mxu1 %v10356_v25  ;;  %7460 = vmatprep.subr.bf16.mxu0 %v10361_v26  ;;  %v10393_v26 = vld [vmem:[%s11622_s25 + $0xa20] ss:$8 sps:$4 sm:$0xff]  }
 0x170   : > { %7511 = vmatprep.subr.bf16.mxu1 %v10364_v27  ;;  %v10396_v27 = vld [vmem:[%s11622_s25 + $0xb20] ss:$8 sps:$4 sm:$0xff]  }
 0x171   : > { %v7086_v41 = vpop.f32.mrf.mxu0  ;;  %7391 = vmatmul.mubr.bf16.vlgmr.msra.gmra.mxu0 %v8682_v30  ;;  %v10401_v30 = vld [vmem:[%s11622_s25 + $0xa14] ss:$8 sps:$4 sm:$0xff]  }
 0x172   : > { %v7137_v45 = vpop.f32.mrf.mxu1  ;;  %7442 = vmatmul.mubr.bf16.vlgmr.msra.gmra.mxu1 %v8684_v31  ;;  %v7087_v38 = vadd.f32 %v7086_v41, %v12012_v0  ;;  %7461 = vmatpush1.bf16.msra.mxu0 %v10359_v32  ;;  %v12140_v0 = vld [vmem:[%s13420_s0 + $0x150] sm:$0xff]  ;;  %v10419_v41 = vld [vmem:[%s11622_s25 + $0xae4] ss:$8 sps:$4 sm:$0xff]  }
 0x173   : > { %7512 = vmatpush1.bf16.msra.mxu1 %v10362_v35  ;;  %v7088_v39 = vpop.f32.mrf.mxu0  ;;  %7462 = vmatprep.subr.bf16.mxu0 %v10367_v37  ;;  %v8687_v3 = vcombine.high %v12130_v47, %v12140_v0  ;;  %v10404_v31 = vld [vmem:[%s11622_s25 + $0xb14] ss:$8 sps:$4 sm:$0xff]   ;;  %v10399_v32 = vld [vmem:[%s11622_s25 + $0xa10] ss:$8 sps:$4 sm:$0xff]   ;;  %v10410_v35 = vld [vmem:[%s11622_s25 + $0xb04] ss:$8 sps:$4 sm:$0xff]  }
 0x174   : > { %v7139_v42 = vpop.f32.mrf.mxu1  ;;  %7513 = vmatprep.subr.bf16.mxu1 %v10370_v5  ;;  %v12132_v48 = vadd.f32 %v7137_v45, %v7087_v38  ;;  %v7089_v49 = vadd.f32 %v7088_v39, %v12026_v7  ;;  %7400 = vmatprep.mubr.bf16.mxu0 %v8747_v13  ;;  %v8746_v7 = vcombine.low %v238_v33, %v238_v33  ;;  %v10402_v33 = vld [vmem:[%s11622_s25 + $0xb10] ss:$8 sps:$4 sm:$0xff]   ;;  %v10405_v37 = vld [vmem:[%s11622_s25 + $0xa00] ss:$8 sps:$4 sm:$0xff]   ;;  %v10422_v45 = vld [vmem:[%s11622_s25 + $0xbe4] ss:$8 sps:$4 sm:$0xff]  }
 0x175   : > { %7451 = vmatprep.mubr.bf16.mxu1 %v8749_v40  ;;  %v7090_v55 = vpop.f32.mrf.mxu0  ;;  %v10408_v5 = vld [vmem:[%s11622_s25 + $0xb00] ss:$8 sps:$4 sm:$0xff]   ;;  %v10411_v13 = vld [vmem:[%s11622_s25 + $0xaf0] ss:$8 sps:$4 sm:$0xff]   ;;  %v10425_v39 = vld [vmem:[%s11622_s25 + $0xad4] ss:$8 sps:$4 sm:$0xff]  }
 0x176   : > { %v7141_v58 = vpop.f32.mrf.mxu1  ;;  %v12152_v61 = vadd.f32 %v7139_v42, %v7089_v49  ;;  %v7091_v62 = vadd.f32 %v7090_v55, %v12038_v14  ;;  %7463 = vmatpush1.bf16.msra.mxu0 %v10365_v6  ;;  %v8689_v14 = vcombine.high %v12145_v54, %v12150_v60  ;;  %v10413_v6 = vld [vmem:[%s11622_s25 + $0xaf4] ss:$8 sps:$4 sm:$0xff]   ;;  %v10414_v40 = vld [vmem:[%s11622_s25 + $0xbf0] ss:$8 sps:$4 sm:$0xff]   ;;  %v10420_v38 = vld [vmem:[%s11622_s25 + $0xbe0] ss:$8 sps:$4 sm:$0xff]  }
 0x177   : > { %7514 = vmatpush1.bf16.msra.mxu1 %v10368_v8  ;;  %v12155_v52 = vpop.f32.mrf.mxu0  ;;  %7464 = vmatprep.subr.bf16.mxu0 %v10375_v46  ;;  %v10416_v8 = vld [vmem:[%s11622_s25 + $0xbf4] ss:$8 sps:$4 sm:$0xff]   ;;  %v10417_v46 = vld [vmem:[%s11622_s25 + $0xae0] ss:$8 sps:$4 sm:$0xff]   ;;  %v10426_v49 = vld [vmem:[%s11622_s25 + $0xbd0] ss:$8 sps:$4 sm:$0xff]  }
 0x178   : > { %v12157_v53 = vpop.f32.mrf.mxu1  ;;  %7515 = vmatprep.subr.bf16.mxu1 %v10378_v43  ;;  %v12161_v57 = vadd.f32 %v7141_v58, %v7091_v62  ;;  %v10428_v42 = vld [vmem:[%s11622_s25 + $0xbd4] ss:$8 sps:$4 sm:$0xff]   ;;  %v10423_v43 = vld [vmem:[%s11622_s25 + $0xad0] ss:$8 sps:$4 sm:$0xff]   ;;  %v10429_v55 = vld [vmem:[%s11622_s25 + $0xac0] ss:$8 sps:$4 sm:$0xff]  }
 0x179   : > { %v7096_v4 = vpop.f32.mrf.mxu0  ;;  %7401 = vmatmul.mubr.bf16.gmra.mxu0 %v8746_v7  ;;  %v10432_v58 = vld [vmem:[%s11622_s25 + $0xbc0] ss:$8 sps:$4 sm:$0xff]   ;;  %v10437_v7 = vld [vmem:[%s11622_s25 + $0xab4] ss:$8 sps:$4 sm:$0xff]   ;;  %v10435_v62 = vld [vmem:[%s11622_s25 + $0xab0] ss:$8 sps:$4 sm:$0xff]  }
 0x17a   : > { %v7147_v9 = vpop.f32.mrf.mxu1  ;;  %7452 = vmatmul.mubr.bf16.gmra.mxu1 %v8748_v59  ;;  %v7097_v10 = vadd.f32 %v7096_v4, %v12063_v36  ;;  %7465 = vmatpush1.bf16.msra.mxu0 %v10373_v50  ;;  %v10431_v50 = vld [vmem:[%s11622_s25 + $0xac4] ss:$8 sps:$4 sm:$0xff]   ;;  %v10440_v59 = vld [vmem:[%s11622_s25 + $0xbb4] ss:$8 sps:$4 sm:$0xff]  }
 0x17b   : > { %7516 = vmatpush1.bf16.msra.mxu1 %v10376_v51  ;;  %v7098_v11 = vpop.f32.mrf.mxu0  ;;  %7466 = vmatprep.subr.bf16.mxu0 %v10383_v63  ;;  %v10434_v51 = vld [vmem:[%s11622_s25 + $0xbc4] ss:$8 sps:$4 sm:$0xff]   ;;  %v10438_v63 = vld [vmem:[%s11622_s25 + $0xbb0] ss:$8 sps:$4 sm:$0xff]   ;;  %v10452_v4 = vld [vmem:[%s11622_s25 + $0xb94] ss:$8 sps:$4 sm:$0xff]  }
 0x17c   : > { %v7149_v12 = vpop.f32.mrf.mxu1  ;;  %7517 = vmatprep.subr.bf16.mxu1 %v10386_v56  ;;  %v7099_v17 = vadd.f32 %v7098_v11, %v12066_v44  ;;  %v12173_v18 = vadd.f32 %v7147_v9, %v7097_v10  ;;  %7492 = vmatprep.mubr.bf16.mxu0 %v8687_v3  ;;  %v10395_v44 = vld [vmem:[%s11622_s25 + $0xa24] ss:$8 sps:$4 sm:$0xff]   ;;  %v10444_v3 = vld [vmem:[%s11622_s25 + $0xba0] ss:$8 sps:$4 sm:$0xff]   ;;  %v10447_v9 = vld [vmem:[%s11622_s25 + $0xa90] ss:$8 sps:$4 sm:$0xff]  }
 0x17d   : > { %7543 = vmatprep.mubr.bf16.mxu1 %v8689_v14  ;;  %v7100_v36 = vpop.f32.mrf.mxu0  ;;  %v10443_v56 = vld [vmem:[%s11622_s25 + $0xaa4] ss:$8 sps:$4 sm:$0xff]   ;;  %v10449_v14 = vld [vmem:[%s11622_s25 + $0xa94] ss:$8 sps:$4 sm:$0xff]   ;;  %v10450_v10 = vld [vmem:[%s11622_s25 + $0xb90] ss:$8 sps:$4 sm:$0xff]  }
 0x17e   : > { %v7151_v19 = vpop.f32.mrf.mxu1  ;;  %v12175_v20 = vadd.f32 %v7149_v12, %v7099_v17  ;;  %7467 = vmatpush1.bf16.msra.mxu0 %v10381_v1  ;;  %v10446_v1 = vld [vmem:[%s11622_s25 + $0xba4] ss:$8 sps:$4 sm:$0xff]   ;;  %v10461_v17 = vld [vmem:[%s11622_s25 + $0xc74] ss:$8 sps:$4 sm:$0xff]  }
 0x17f   : > { %7518 = vmatpush1.bf16.msra.mxu1 %v10384_v2  ;;  %7468 = vmatprep.subr.bf16.mxu0 %v10389_v15  ;;  %v7101_v24 = vpop.f32.mrf.mxu0  ;;  %v10441_v2 = vld [vmem:[%s11622_s25 + $0xaa0] ss:$8 sps:$4 sm:$0xff]   ;;  %v10455_v11 = vld [vmem:[%s11622_s25 + $0xa84] ss:$8 sps:$4 sm:$0xff]   ;;  %v10464_v36 = vld [vmem:[%s11622_s25 + $0xd74] ss:$8 sps:$4 sm:$0xff]   ;;  %v8686_v19 = vcombine.low %v12130_v47, %v12140_v0  ;;  %v7042_v0 = vadd.f32 %v12057_v29, %v12055_v28 }
 0x180   : > { %7519 = vmatprep.subr.bf16.mxu1 %v10392_v16  ;;  %v7152_v25 = vpop.f32.mrf.mxu1  ;;  %v10458_v12 = vld [vmem:[%s11622_s25 + $0xb84] ss:$8 sps:$4 sm:$0xff]   ;;  %v10453_v15 = vld [vmem:[%s11622_s25 + $0xa80] ss:$8 sps:$4 sm:$0xff]   ;;  %v10462_v24 = vld [vmem:[%s11622_s25 + $0xd70] ss:$8 sps:$4 sm:$0xff]  }
 0x181   : > { %v10456_v16 = vld [vmem:[%s11622_s25 + $0xb80] ss:$8 sps:$4 sm:$0xff]   ;;  %v10467_v25 = vld [vmem:[%s11622_s25 + $0xc64] ss:$8 sps:$4 sm:$0xff]   ;;  %v10478_v29 = vld [vmem:[%s11622_s25 + $0xd54] ss:$8 sps:$4 sm:$0xff]  }
 0x182   : > { %7469 = vmatpush1.bf16.msra.mxu0 %v10387_v21  ;;  %v8688_v21 = vcombine.low %v12145_v54, %v12150_v60  ;;  %v10470_v47 = vld [vmem:[%s11622_s25 + $0xd64] ss:$8 sps:$4 sm:$0xff]   ;;  %v10465_v54 = vld [vmem:[%s11622_s25 + $0xc60] ss:$8 sps:$4 sm:$0xff]  }
 0x183   : > { %7520 = vmatpush1.bf16.msra.mxu1 %v10390_v22  ;;  %7470 = vmatprep.subr.bf16.mxu0 %v10395_v44  ;;  %v10459_v22 = vld [vmem:[%s11622_s25 + $0xc70] ss:$8 sps:$4 sm:$0xff]   ;;  %v10468_v60 = vld [vmem:[%s11622_s25 + $0xd60] ss:$8 sps:$4 sm:$0xff]  }
 0x184   : > { %7521 = vmatprep.subr.bf16.mxu1 %v10398_v23  ;;  %v240_v44 = vld [vmem:[%s13420_s0 + $0x250] sm:$0xff]  ;;  %v241_v23 = vld [vmem:[%s13420_s0 + $0x258] sm:$0xff] }
 0x186   : > { %7471 = vmatpush1.bf16.msra.mxu0 %v10393_v26  ;;  %v8751_v26 = vcombine.high %v240_v44, %v240_v44 }
 0x187   : > { %7522 = vmatpush1.bf16.msra.mxu1 %v10396_v27  ;;  %7472 = vmatprep.subr.bf16.mxu0 %v10401_v30  ;;  %v8753_v27 = vcombine.high %v241_v23, %v241_v23 }
 0x188   : > { %7523 = vmatprep.subr.bf16.mxu1 %v10404_v31 }
 0x18a   : > { %7473 = vmatpush1.bf16.msra.mxu0 %v10399_v32  ;;  %v10475_v32 = vld [vmem:[%s11622_s25 + $0xc54] ss:$8 sps:$4 sm:$0xff]  }
 0x18b   : > { %7524 = vmatpush1.bf16.msra.mxu1 %v10402_v33  ;;  %7474 = vmatprep.subr.bf16.mxu0 %v10407_v34  ;;  %v7093_v33 = vadd.f32 %v12155_v52, %v7042_v0  ;;  %v10473_v52 = vld [vmem:[%s11622_s25 + $0xc50] ss:$8 sps:$4 sm:$0xff]   ;;  %v10510_v0 = vld [vmem:[%s11622_s25 + $0xd04] ss:$8 sps:$4 sm:$0xff]  }
 0x18c   : > { %7525 = vmatprep.subr.bf16.mxu1 %v10410_v35 }
 0x18e   : > { %7475 = vmatpush1.bf16.msra.mxu0 %v10405_v37  ;;  %v12250_v37 = vld [vmem:[%s13420_s0 + $0x60] sm:$0xff] }
 0x18f   : > { %7526 = vmatpush1.bf16.msra.mxu1 %v10408_v5  ;;  %7476 = vmatprep.subr.bf16.mxu0 %v10413_v6 }
 0x190   : > { %7527 = vmatprep.subr.bf16.mxu1 %v10416_v8  ;;  %v10476_v8 = vld [vmem:[%s11622_s25 + $0xd50] ss:$8 sps:$4 sm:$0xff]  }
 0x192   : > { %7477 = vmatpush2.bf16.msra.mxu0 %v10411_v13  ;;  %v12265_v13 = vld [vmem:[%s13420_s0 + $0x68] sm:$0xff] }
 0x193   : > { %7528 = vmatpush2.bf16.msra.mxu1 %v10414_v40  ;;  %7478 = vmatprep.subr.bf16.mxu0 %v10419_v41 }
 0x194   : > { %7529 = vmatprep.subr.bf16.mxu1 %v10422_v45  ;;  %v8750_v45 = vcombine.low %v240_v44, %v240_v44  ;;  %v10501_v44 = vld [vmem:[%s11622_s25 + $0xc14] ss:$8 sps:$4 sm:$0xff]  }
 0x196   : > { %7479 = vmatpush2.bf16.msra.mxu0 %v10417_v46  ;;  %v12270_v46 = vld [vmem:[%s13420_s0 + $0x168] sm:$0xff] }
 0x197   : > { %7530 = vmatpush2.bf16.msra.mxu1 %v10420_v38  ;;  %7480 = vmatprep.subr.bf16.mxu0 %v10425_v39  ;;  %v7144_v38 = vadd.f32 %v12157_v53, %v7093_v33  ;;  %v10522_v33 = vld [vmem:[%s11622_s25 + $0xde4] ss:$8 sps:$4 sm:$0xff]  }
 0x198   : > { %7531 = vmatprep.subr.bf16.mxu1 %v10428_v42 }
 0x19a   : > { %7481 = vmatpush2.bf16.msra.mxu0 %v10423_v43 }
 0x19b   : > { %7532 = vmatpush2.bf16.msra.mxu1 %v10426_v49  ;;  %7482 = vmatprep.subr.bf16.mxu0 %v10431_v50  ;;  %v10483_v50 = vld [vmem:[%s11622_s25 + $0xc44] ss:$8 sps:$4 sm:$0xff]  }
 0x19c   : > { %7533 = vmatprep.subr.bf16.mxu1 %v10434_v51  ;;  %v10486_v51 = vld [vmem:[%s11622_s25 + $0xd44] ss:$8 sps:$4 sm:$0xff]  }
 0x19e   : > { %7483 = vmatpush2.bf16.msra.mxu0 %v10429_v55 }
 0x19f   : > { %7534 = vmatpush2.bf16.msra.mxu1 %v10432_v58  ;;  %7484 = vmatprep.subr.bf16.mxu0 %v10437_v7  ;;  %v10481_v7 = vld [vmem:[%s11622_s25 + $0xc40] ss:$8 sps:$4 sm:$0xff]  }
 0x1a0   : > { %7535 = vmatprep.subr.bf16.mxu1 %v10440_v59  ;;  %v10484_v59 = vld [vmem:[%s11622_s25 + $0xd40] ss:$8 sps:$4 sm:$0xff]  }
 0x1a2   : > { %7485 = vmatpush2.bf16.msra.mxu0 %v10435_v62 }
 0x1a3   : > { %7536 = vmatpush2.bf16.msra.mxu1 %v10438_v63  ;;  %7486 = vmatprep.subr.bf16.mxu0 %v10443_v56 }
 0x1a4   : > { %7537 = vmatprep.subr.bf16.mxu1 %v10446_v1 }
 0x1a6   : > { %7487 = vmatpush2.bf16.msra.mxu0 %v10441_v2 }
 0x1a7   : > { %7538 = vmatpush2.bf16.msra.mxu1 %v10444_v3  ;;  %7488 = vmatprep.subr.bf16.mxu0 %v10449_v14  ;;  %v10489_v14 = vld [vmem:[%s11622_s25 + $0xc34] ss:$8 sps:$4 sm:$0xff]  }
 0x1a8   : > { %7539 = vmatprep.subr.bf16.mxu1 %v10452_v4  ;;  %v10492_v4 = vld [vmem:[%s11622_s25 + $0xd34] ss:$8 sps:$4 sm:$0xff]  }
 0x1aa   : > { %7489 = vmatpush2.bf16.msra.mxu0 %v10447_v9 }
 0x1ab   : > { %7540 = vmatpush2.bf16.msra.mxu1 %v10450_v10  ;;  %7490 = vmatprep.subr.bf16.mxu0 %v10455_v11 }
 0x1ac   : > { %7541 = vmatprep.subr.bf16.mxu1 %v10458_v12 }
 0x1ae   : > { %7491 = vmatpush2.bf16.msra.mxu0 %v10453_v15  ;;  %v10487_v15 = vld [vmem:[%s11622_s25 + $0xc30] ss:$8 sps:$4 sm:$0xff]  }
 0x1af   : > { %7542 = vmatpush2.bf16.msra.mxu1 %v10456_v16  ;;  %7562 = vmatprep.subr.bf16.mxu0 %v10461_v17  ;;  %v10490_v16 = vld [vmem:[%s11622_s25 + $0xd30] ss:$8 sps:$4 sm:$0xff]   ;;  %v10498_v17 = vld [vmem:[%s11622_s25 + $0xd24] ss:$8 sps:$4 sm:$0xff]  }
 0x1b0   : > { %7613 = vmatprep.subr.bf16.mxu1 %v10464_v36 }
 0x1b1   : > { %v7188_v30 = vpop.f32.mrf.mxu0  ;;  %7493 = vmatmul.mubr.bf16.vlgmr.msra.gmra.mxu0 %v8686_v19 }
 0x1b2   : > { %v7239_v31 = vpop.f32.mrf.mxu1  ;;  %7544 = vmatmul.mubr.bf16.vlgmr.msra.gmra.mxu1 %v8688_v21  ;;  %v7189_v34 = vadd.f32 %v7188_v30, %v12132_v48  ;;  %7563 = vmatpush1.bf16.msra.mxu0 %v10459_v22  ;;  %v12260_v48 = vld [vmem:[%s13420_s0 + $0x160] sm:$0xff]  ;;  %v10511_v30 = vld [vmem:[%s11622_s25 + $0xcf0] ss:$8 sps:$4 sm:$0xff]  }
 0x1b3   : > { %7614 = vmatpush1.bf16.msra.mxu1 %v10462_v24  ;;  %v7190_v35 = vpop.f32.mrf.mxu0  ;;  %7564 = vmatprep.subr.bf16.mxu0 %v10467_v25  ;;  %v8691_v53 = vcombine.high %v12250_v37, %v12260_v48  ;;  %v10493_v21 = vld [vmem:[%s11622_s25 + $0xc20] ss:$8 sps:$4 sm:$0xff]   ;;  %v10499_v24 = vld [vmem:[%s11622_s25 + $0xc10] ss:$8 sps:$4 sm:$0xff]  }
 0x1b4   : > { %v7241_v28 = vpop.f32.mrf.mxu1  ;;  %7615 = vmatprep.subr.bf16.mxu1 %v10470_v47  ;;  %v12252_v5 = vadd.f32 %v7239_v31, %v7189_v34  ;;  %v7191_v6 = vadd.f32 %v7190_v35, %v12152_v61  ;;  %7502 = vmatprep.mubr.bf16.mxu0 %v8751_v26  ;;  %v8752_v61 = vcombine.low %v241_v23, %v241_v23  ;;  %v10496_v22 = vld [vmem:[%s11622_s25 + $0xd20] ss:$8 sps:$4 sm:$0xff]   ;;  %v10504_v23 = vld [vmem:[%s11622_s25 + $0xd14] ss:$8 sps:$4 sm:$0xff]   ;;  %v10502_v25 = vld [vmem:[%s11622_s25 + $0xd10] ss:$8 sps:$4 sm:$0xff]  }
 0x1b5   : > { %7553 = vmatprep.mubr.bf16.mxu1 %v8753_v27  ;;  %v7192_v40 = vpop.f32.mrf.mxu0  ;;  %v10507_v47 = vld [vmem:[%s11622_s25 + $0xc04] ss:$8 sps:$4 sm:$0xff]   ;;  %v10513_v26 = vld [vmem:[%s11622_s25 + $0xcf4] ss:$8 sps:$4 sm:$0xff]   ;;  %v10514_v31 = vld [vmem:[%s11622_s25 + $0xdf0] ss:$8 sps:$4 sm:$0xff]  }
 0x1b6   : > { %v7243_v41 = vpop.f32.mrf.mxu1  ;;  %v12273_v39 = vadd.f32 %v7241_v28, %v7191_v6  ;;  %v7193_v42 = vadd.f32 %v7192_v40, %v12161_v57  ;;  %7565 = vmatpush1.bf16.msra.mxu0 %v10465_v54  ;;  %v8693_v57 = vcombine.high %v12265_v13, %v12270_v46  ;;  %v10505_v54 = vld [vmem:[%s11622_s25 + $0xc00] ss:$8 sps:$4 sm:$0xff]   ;;  %v10516_v27 = vld [vmem:[%s11622_s25 + $0xdf4] ss:$8 sps:$4 sm:$0xff]   ;;  %v10523_v6 = vld [vmem:[%s11622_s25 + $0xcd0] ss:$8 sps:$4 sm:$0xff]  }
 0x1b7   : > { %7616 = vmatpush1.bf16.msra.mxu1 %v10468_v60  ;;  %v7194_v43 = vpop.f32.mrf.mxu0  ;;  %7566 = vmatprep.subr.bf16.mxu0 %v10475_v32  ;;  %v10508_v60 = vld [vmem:[%s11622_s25 + $0xd00] ss:$8 sps:$4 sm:$0xff]   ;;  %v10519_v32 = vld [vmem:[%s11622_s25 + $0xce4] ss:$8 sps:$4 sm:$0xff]   ;;  %v10525_v28 = vld [vmem:[%s11622_s25 + $0xcd4] ss:$8 sps:$4 sm:$0xff]  }
 0x1b8   : > { %v7245_v49 = vpop.f32.mrf.mxu1  ;;  %7617 = vmatprep.subr.bf16.mxu1 %v10478_v29  ;;  %v12278_v55 = vadd.f32 %v7243_v41, %v7193_v42  ;;  %v7195_v58 = vadd.f32 %v7194_v43, %v7144_v38  ;;  %v10517_v34 = vld [vmem:[%s11622_s25 + $0xce0] ss:$8 sps:$4 sm:$0xff]   ;;  %v10528_v29 = vld [vmem:[%s11622_s25 + $0xdd4] ss:$8 sps:$4 sm:$0xff]   ;;  %v10534_v40 = vld [vmem:[%s11622_s25 + $0xdc4] ss:$8 sps:$4 sm:$0xff]  }
 0x1b9   : > { %v7198_v62 = vpop.f32.mrf.mxu0  ;;  %7503 = vmatmul.mubr.bf16.gmra.mxu0 %v8750_v45  ;;  %v10520_v35 = vld [vmem:[%s11622_s25 + $0xde0] ss:$8 sps:$4 sm:$0xff]   ;;  %v10540_v38 = vld [vmem:[%s11622_s25 + $0xdb4] ss:$8 sps:$4 sm:$0xff]   ;;  %v10535_v42 = vld [vmem:[%s11622_s25 + $0xcb0] ss:$8 sps:$4 sm:$0xff]  }
 0x1ba   : > { %v7249_v63 = vpop.f32.mrf.mxu1  ;;  %7554 = vmatmul.mubr.bf16.gmra.mxu1 %v8752_v61  ;;  %v12286_v56 = vadd.f32 %v7245_v49, %v7195_v58  ;;  %v7199_v1 = vadd.f32 %v7198_v62, %v12173_v18  ;;  %7567 = vmatpush1.bf16.msra.mxu0 %v10473_v52  ;;  %v10526_v52 = vld [vmem:[%s11622_s25 + $0xdd0] ss:$8 sps:$4 sm:$0xff]   ;;  %v10529_v41 = vld [vmem:[%s11622_s25 + $0xcc0] ss:$8 sps:$4 sm:$0xff]   ;;  %v10537_v61 = vld [vmem:[%s11622_s25 + $0xcb4] ss:$8 sps:$4 sm:$0xff]  }
 0x1bb   : > { %7618 = vmatpush1.bf16.msra.mxu1 %v10476_v8  ;;  %v7200_v2 = vpop.f32.mrf.mxu0  ;;  %7568 = vmatprep.subr.bf16.mxu0 %v10483_v50  ;;  %v10531_v8 = vld [vmem:[%s11622_s25 + $0xcc4] ss:$8 sps:$4 sm:$0xff]   ;;  %v10532_v45 = vld [vmem:[%s11622_s25 + $0xdc0] ss:$8 sps:$4 sm:$0xff]   ;;  %v10538_v43 = vld [vmem:[%s11622_s25 + $0xdb0] ss:$8 sps:$4 sm:$0xff]  }
 0x1bc   : > { %v7251_v3 = vpop.f32.mrf.mxu1  ;;  %7619 = vmatprep.subr.bf16.mxu1 %v10486_v51  ;;  %v7201_v9 = vadd.f32 %v7200_v2, %v12175_v20  ;;  %v12292_v10 = vadd.f32 %v7249_v63, %v7199_v1  ;;  %7594 = vmatprep.mubr.bf16.mxu0 %v8691_v53  ;;  %v10495_v20 = vld [vmem:[%s11622_s25 + $0xc24] ss:$8 sps:$4 sm:$0xff]   ;;  %v10541_v51 = vld [vmem:[%s11622_s25 + $0xca0] ss:$8 sps:$4 sm:$0xff]   ;;  %v10547_v53 = vld [vmem:[%s11622_s25 + $0xc90] ss:$8 sps:$4 sm:$0xff]  }
 0x1bd   : > { %7645 = vmatprep.mubr.bf16.mxu1 %v8693_v57  ;;  %v7202_v18 = vpop.f32.mrf.mxu0  ;;  %v10543_v49 = vld [vmem:[%s11622_s25 + $0xca4] ss:$8 sps:$4 sm:$0xff]   ;;  %v10544_v58 = vld [vmem:[%s11622_s25 + $0xda0] ss:$8 sps:$4 sm:$0xff]   ;;  %v10550_v57 = vld [vmem:[%s11622_s25 + $0xd90] ss:$8 sps:$4 sm:$0xff]  }
 0x1be   : > { %v7253_v11 = vpop.f32.mrf.mxu1  ;;  %v12294_v12 = vadd.f32 %v7251_v3, %v7201_v9  ;;  %7569 = vmatpush1.bf16.msra.mxu0 %v10481_v7  ;;  %v10546_v50 = vld [vmem:[%s11622_s25 + $0xda4] ss:$8 sps:$4 sm:$0xff]   ;;  %v10549_v7 = vld [vmem:[%s11622_s25 + $0xc94] ss:$8 sps:$4 sm:$0xff]   ;;  %v10553_v1 = vld [vmem:[%s11622_s25 + $0xc80] ss:$8 sps:$4 sm:$0xff]   ;;  %v8692_v9 = vcombine.low %v12265_v13, %v12270_v46 }
 0x1bf   : > { %7620 = vmatpush1.bf16.msra.mxu1 %v10484_v59  ;;  %7570 = vmatprep.subr.bf16.mxu0 %v10489_v14  ;;  %v7203_v36 = vpop.f32.mrf.mxu0  ;;  %v10552_v59 = vld [vmem:[%s11622_s25 + $0xd94] ss:$8 sps:$4 sm:$0xff]   ;;  %v10555_v62 = vld [vmem:[%s11622_s25 + $0xc84] ss:$8 sps:$4 sm:$0xff]   ;;  %v10556_v2 = vld [vmem:[%s11622_s25 + $0xd80] ss:$8 sps:$4 sm:$0xff]  }
 0x1c0   : > { %7621 = vmatprep.subr.bf16.mxu1 %v10492_v4  ;;  %v7254_v19 = vpop.f32.mrf.mxu1  ;;  %v10558_v63 = vld [vmem:[%s11622_s25 + $0xd84] ss:$8 sps:$4 sm:$0xff]   ;;  %v10561_v3 = vld [vmem:[%s11622_s25 + $0xe74] ss:$8 sps:$4 sm:$0xff]   ;;  %v8690_v4 = vcombine.low %v12250_v37, %v12260_v48  ;;  %v10559_v18 = vld [vmem:[%s11622_s25 + $0xe70] ss:$8 sps:$4 sm:$0xff]  }
 0x1c1   : > { %v10564_v14 = vld [vmem:[%s11622_s25 + $0xf74] ss:$8 sps:$4 sm:$0xff]   ;;  %v242_v11 = vld [vmem:[%s13420_s0 + $0x260] sm:$0xff] }
 0x1c2   : > { %7571 = vmatpush1.bf16.msra.mxu0 %v10487_v15  ;;  %v243_v15 = vld [vmem:[%s13420_s0 + $0x268] sm:$0xff]  ;;  %v8755_v46 = vcombine.high %v242_v11, %v242_v11 }
 0x1c3   : > { %7622 = vmatpush1.bf16.msra.mxu1 %v10490_v16  ;;  %7572 = vmatprep.subr.bf16.mxu0 %v10495_v20  ;;  %v10562_v16 = vld [vmem:[%s11622_s25 + $0xf70] ss:$8 sps:$4 sm:$0xff]   ;;  %v10567_v20 = vld [vmem:[%s11622_s25 + $0xe64] ss:$8 sps:$4 sm:$0xff]   ;;  %v10565_v48 = vld [vmem:[%s11622_s25 + $0xe60] ss:$8 sps:$4 sm:$0xff]  }
 0x1c4   : > { %7623 = vmatprep.subr.bf16.mxu1 %v10498_v17  ;;  %v10570_v37 = vld [vmem:[%s11622_s25 + $0xf64] ss:$8 sps:$4 sm:$0xff]   ;;  %v10568_v13 = vld [vmem:[%s11622_s25 + $0xf60] ss:$8 sps:$4 sm:$0xff]   ;;  %v8757_v17 = vcombine.high %v243_v15, %v243_v15 }
 0x1c6   : > { %7573 = vmatpush1.bf16.msra.mxu0 %v10493_v21  ;;  %v10575_v21 = vld [vmem:[%s11622_s25 + $0xe54] ss:$8 sps:$4 sm:$0xff]  }
 0x1c7   : > { %7624 = vmatpush1.bf16.msra.mxu1 %v10496_v22  ;;  %7574 = vmatprep.subr.bf16.mxu0 %v10501_v44 }
 0x1c8   : > { %7625 = vmatprep.subr.bf16.mxu1 %v10504_v23 }
 0x1ca   : > { %7575 = vmatpush1.bf16.msra.mxu0 %v10499_v24  ;;  %v10578_v24 = vld [vmem:[%s11622_s25 + $0xf54] ss:$8 sps:$4 sm:$0xff]  }
 0x1cb   : > { %7626 = vmatpush1.bf16.msra.mxu1 %v10502_v25  ;;  %7576 = vmatprep.subr.bf16.mxu0 %v10507_v47  ;;  %v12366_v25 = vld [vmem:[%s13420_s0 + $0x70] sm:$0xff] }
 0x1cc   : > { %7627 = vmatprep.subr.bf16.mxu1 %v10510_v0 }
 0x1ce   : > { %7577 = vmatpush1.bf16.msra.mxu0 %v10505_v54  ;;  %v10573_v54 = vld [vmem:[%s11622_s25 + $0xe50] ss:$8 sps:$4 sm:$0xff]  }
 0x1cf   : > { %7628 = vmatpush1.bf16.msra.mxu1 %v10508_v60  ;;  %7578 = vmatprep.subr.bf16.mxu0 %v10513_v26  ;;  %v10576_v60 = vld [vmem:[%s11622_s25 + $0xf50] ss:$8 sps:$4 sm:$0xff]  }
 0x1d0   : > { %7629 = vmatprep.subr.bf16.mxu1 %v10516_v27  ;;  %v12381_v26 = vld [vmem:[%s13420_s0 + $0x78] sm:$0xff] }
 0x1d2   : > { %7579 = vmatpush2.bf16.msra.mxu0 %v10511_v30 }
 0x1d3   : > { %7630 = vmatpush2.bf16.msra.mxu1 %v10514_v31  ;;  %7580 = vmatprep.subr.bf16.mxu0 %v10519_v32  ;;  %v8756_v31 = vcombine.low %v243_v15, %v243_v15  ;;  %v12386_v32 = vld [vmem:[%s13420_s0 + $0x178] sm:$0xff]  ;;  %v10607_v15 = vld [vmem:[%s11622_s25 + $0xe04] ss:$8 sps:$4 sm:$0xff]  }
 0x1d4   : > { %7631 = vmatprep.subr.bf16.mxu1 %v10522_v33 }
 0x1d6   : > { %7581 = vmatpush2.bf16.msra.mxu0 %v10517_v34 }
 0x1d7   : > { %7632 = vmatpush2.bf16.msra.mxu1 %v10520_v35  ;;  %7582 = vmatprep.subr.bf16.mxu0 %v10525_v28 }
 0x1d8   : > { %7633 = vmatprep.subr.bf16.mxu1 %v10528_v29  ;;  %v10583_v29 = vld [vmem:[%s11622_s25 + $0xe44] ss:$8 sps:$4 sm:$0xff]  }
 0x1da   : > { %7583 = vmatpush2.bf16.msra.mxu0 %v10523_v6  ;;  %v10586_v6 = vld [vmem:[%s11622_s25 + $0xf44] ss:$8 sps:$4 sm:$0xff]  }
 0x1db   : > { %7634 = vmatpush2.bf16.msra.mxu1 %v10526_v52  ;;  %7584 = vmatprep.subr.bf16.mxu0 %v10531_v8 }
 0x1dc   : > { %7635 = vmatprep.subr.bf16.mxu1 %v10534_v40  ;;  %v10581_v40 = vld [vmem:[%s11622_s25 + $0xe40] ss:$8 sps:$4 sm:$0xff]  }
 0x1de   : > { %7585 = vmatpush2.bf16.msra.mxu0 %v10529_v41  ;;  %v10584_v41 = vld [vmem:[%s11622_s25 + $0xf40] ss:$8 sps:$4 sm:$0xff]  }
 0x1df   : > { %7636 = vmatpush2.bf16.msra.mxu1 %v10532_v45  ;;  %7586 = vmatprep.subr.bf16.mxu0 %v10537_v61 }
 0x1e0   : > { %7637 = vmatprep.subr.bf16.mxu1 %v10540_v38 }
 0x1e2   : > { %7587 = vmatpush2.bf16.msra.mxu0 %v10535_v42 }
 0x1e3   : > { %7638 = vmatpush2.bf16.msra.mxu1 %v10538_v43  ;;  %7588 = vmatprep.subr.bf16.mxu0 %v10543_v49 }
 0x1e4   : > { %7639 = vmatprep.subr.bf16.mxu1 %v10546_v50  ;;  %v10589_v50 = vld [vmem:[%s11622_s25 + $0xe34] ss:$8 sps:$4 sm:$0xff]  }
 0x1e6   : > { %7589 = vmatpush2.bf16.msra.mxu0 %v10541_v51  ;;  %v10592_v51 = vld [vmem:[%s11622_s25 + $0xf34] ss:$8 sps:$4 sm:$0xff]  }
 0x1e7   : > { %7640 = vmatpush2.bf16.msra.mxu1 %v10544_v58  ;;  %7590 = vmatprep.subr.bf16.mxu0 %v10549_v7 }
 0x1e8   : > { %7641 = vmatprep.subr.bf16.mxu1 %v10552_v59 }
 0x1ea   : > { %7591 = vmatpush2.bf16.msra.mxu0 %v10547_v53 }
 0x1eb   : > { %7642 = vmatpush2.bf16.msra.mxu1 %v10550_v57  ;;  %7592 = vmatprep.subr.bf16.mxu0 %v10555_v62  ;;  %v10587_v57 = vld [vmem:[%s11622_s25 + $0xe30] ss:$8 sps:$4 sm:$0xff]  }
 0x1ec   : > { %7643 = vmatprep.subr.bf16.mxu1 %v10558_v63  ;;  %v10590_v62 = vld [vmem:[%s11622_s25 + $0xf30] ss:$8 sps:$4 sm:$0xff]   ;;  %v10598_v63 = vld [vmem:[%s11622_s25 + $0xf24] ss:$8 sps:$4 sm:$0xff]  }
 0x1ee   : > { %7593 = vmatpush2.bf16.msra.mxu0 %v10553_v1 }
 0x1ef   : > { %7644 = vmatpush2.bf16.msra.mxu1 %v10556_v2  ;;  %7664 = vmatprep.subr.bf16.mxu0 %v10561_v3  ;;  %v10593_v3 = vld [vmem:[%s11622_s25 + $0xe20] ss:$8 sps:$4 sm:$0xff]  }
 0x1f0   : > { %7715 = vmatprep.subr.bf16.mxu1 %v10564_v14  ;;  %v10596_v14 = vld [vmem:[%s11622_s25 + $0xf20] ss:$8 sps:$4 sm:$0xff]  }
 0x1f1   : > { %v7290_v36 = vpop.f32.mrf.mxu0  ;;  %7595 = vmatmul.mubr.bf16.vlgmr.msra.gmra.mxu0 %v8690_v4  ;;  %v10601_v4 = vld [vmem:[%s11622_s25 + $0xe14] ss:$8 sps:$4 sm:$0xff]  }
 0x1f2   : > { %v7341_v19 = vpop.f32.mrf.mxu1  ;;  %7646 = vmatmul.mubr.bf16.vlgmr.msra.gmra.mxu1 %v8692_v9  ;;  %v7291_v22 = vadd.f32 %v7290_v36, %v12252_v5  ;;  %7665 = vmatpush1.bf16.msra.mxu0 %v10559_v18  ;;  %v12376_v5 = vld [vmem:[%s13420_s0 + $0x170] sm:$0xff]  ;;  %v10619_v36 = vld [vmem:[%s11622_s25 + $0xee4] ss:$8 sps:$4 sm:$0xff]  }
 0x1f3   : > { %7716 = vmatpush1.bf16.msra.mxu1 %v10562_v16  ;;  %v7292_v44 = vpop.f32.mrf.mxu0  ;;  %7666 = vmatprep.subr.bf16.mxu0 %v10567_v20  ;;  %v8695_v45 = vcombine.high %v12366_v25, %v12376_v5  ;;  %v10604_v9 = vld [vmem:[%s11622_s25 + $0xf14] ss:$8 sps:$4 sm:$0xff]   ;;  %v10599_v18 = vld [vmem:[%s11622_s25 + $0xe10] ss:$8 sps:$4 sm:$0xff]   ;;  %v10610_v16 = vld [vmem:[%s11622_s25 + $0xf04] ss:$8 sps:$4 sm:$0xff]  }
 0x1f4   : > { %v7343_v23 = vpop.f32.mrf.mxu1  ;;  %7717 = vmatprep.subr.bf16.mxu1 %v10570_v37  ;;  %v12368_v47 = vadd.f32 %v7341_v19, %v7291_v22  ;;  %v7293_v0 = vadd.f32 %v7292_v44, %v12273_v39  ;;  %7604 = vmatprep.mubr.bf16.mxu0 %v8755_v46  ;;  %v8754_v39 = vcombine.low %v242_v11, %v242_v11  ;;  %v10602_v11 = vld [vmem:[%s11622_s25 + $0xf10] ss:$8 sps:$4 sm:$0xff]   ;;  %v10605_v20 = vld [vmem:[%s11622_s25 + $0xe00] ss:$8 sps:$4 sm:$0xff]   ;;  %v10622_v19 = vld [vmem:[%s11622_s25 + $0xfe4] ss:$8 sps:$4 sm:$0xff]  }
 0x1f5   : > { %7655 = vmatprep.mubr.bf16.mxu1 %v8757_v17  ;;  %v7294_v27 = vpop.f32.mrf.mxu0  ;;  %v10608_v37 = vld [vmem:[%s11622_s25 + $0xf00] ss:$8 sps:$4 sm:$0xff]   ;;  %v10611_v46 = vld [vmem:[%s11622_s25 + $0xef0] ss:$8 sps:$4 sm:$0xff]   ;;  %v10625_v44 = vld [vmem:[%s11622_s25 + $0xed4] ss:$8 sps:$4 sm:$0xff]  }
 0x1f6   : > { %v7345_v30 = vpop.f32.mrf.mxu1  ;;  %v12388_v33 = vadd.f32 %v7343_v23, %v7293_v0  ;;  %v7295_v34 = vadd.f32 %v7294_v27, %v12278_v55  ;;  %7667 = vmatpush1.bf16.msra.mxu0 %v10565_v48  ;;  %v8697_v55 = vcombine.high %v12381_v26, %v12386_v32  ;;  %v10613_v48 = vld [vmem:[%s11622_s25 + $0xef4] ss:$8 sps:$4 sm:$0xff]   ;;  %v10614_v17 = vld [vmem:[%s11622_s25 + $0xff0] ss:$8 sps:$4 sm:$0xff]   ;;  %v10620_v22 = vld [vmem:[%s11622_s25 + $0xfe0] ss:$8 sps:$4 sm:$0xff]  }
 0x1f7   : > { %7718 = vmatpush1.bf16.msra.mxu1 %v10568_v13  ;;  %v7296_v35 = vpop.f32.mrf.mxu0  ;;  %7668 = vmatprep.subr.bf16.mxu0 %v10575_v21  ;;  %v10616_v13 = vld [vmem:[%s11622_s25 + $0xff4] ss:$8 sps:$4 sm:$0xff]   ;;  %v10617_v21 = vld [vmem:[%s11622_s25 + $0xee0] ss:$8 sps:$4 sm:$0xff]   ;;  %v10626_v0 = vld [vmem:[%s11622_s25 + $0xfd0] ss:$8 sps:$4 sm:$0xff]  }
 0x1f8   : > { %v7347_v28 = vpop.f32.mrf.mxu1  ;;  %7719 = vmatprep.subr.bf16.mxu1 %v10578_v24  ;;  %v12393_v52 = vadd.f32 %v7345_v30, %v7295_v34  ;;  %v7297_v8 = vadd.f32 %v7296_v35, %v12286_v56  ;;  %v10628_v23 = vld [vmem:[%s11622_s25 + $0xfd4] ss:$8 sps:$4 sm:$0xff]   ;;  %v10623_v24 = vld [vmem:[%s11622_s25 + $0xed0] ss:$8 sps:$4 sm:$0xff]   ;;  %v10629_v27 = vld [vmem:[%s11622_s25 + $0xec0] ss:$8 sps:$4 sm:$0xff]  }
 0x1f9   : > { %v7300_v61 = vpop.f32.mrf.mxu0  ;;  %7605 = vmatmul.mubr.bf16.gmra.mxu0 %v8754_v39  ;;  %v10632_v30 = vld [vmem:[%s11622_s25 + $0xfc0] ss:$8 sps:$4 sm:$0xff]   ;;  %v10637_v39 = vld [vmem:[%s11622_s25 + $0xeb4] ss:$8 sps:$4 sm:$0xff]   ;;  %v10635_v34 = vld [vmem:[%s11622_s25 + $0xeb0] ss:$8 sps:$4 sm:$0xff]  }
 0x1fa   : > { %v7351_v38 = vpop.f32.mrf.mxu1  ;;  %7656 = vmatmul.mubr.bf16.gmra.mxu1 %v8756_v31  ;;  %v12402_v42 = vadd.f32 %v7347_v28, %v7297_v8  ;;  %v7301_v43 = vadd.f32 %v7300_v61, %v12292_v10  ;;  %7669 = vmatpush1.bf16.msra.mxu0 %v10573_v54  ;;  %v10631_v54 = vld [vmem:[%s11622_s25 + $0xec4] ss:$8 sps:$4 sm:$0xff]   ;;  %v10640_v31 = vld [vmem:[%s11622_s25 + $0xfb4] ss:$8 sps:$4 sm:$0xff]   ;;  %v10638_v35 = vld [vmem:[%s11622_s25 + $0xfb0] ss:$8 sps:$4 sm:$0xff]  }
 0x1fb   : > { %7720 = vmatpush1.bf16.msra.mxu1 %v10576_v60  ;;  %v7302_v56 = vpop.f32.mrf.mxu0  ;;  %7670 = vmatprep.subr.bf16.mxu0 %v10583_v29  ;;  %v10634_v60 = vld [vmem:[%s11622_s25 + $0xfc4] ss:$8 sps:$4 sm:$0xff]   ;;  %v10644_v8 = vld [vmem:[%s11622_s25 + $0xfa0] ss:$8 sps:$4 sm:$0xff]  }
 0x1fc   : > { %v7353_v49 = vpop.f32.mrf.mxu1  ;;  %7721 = vmatprep.subr.bf16.mxu1 %v10586_v6  ;;  %v7303_v58 = vadd.f32 %v7302_v56, %v12294_v12  ;;  %v12408_v7 = vadd.f32 %v7351_v38, %v7301_v43  ;;  %7696 = vmatprep.mubr.bf16.mxu0 %v8695_v45  ;;  %v10595_v12 = vld [vmem:[%s11622_s25 + $0xe24] ss:$8 sps:$4 sm:$0xff]   ;;  %v10641_v6 = vld [vmem:[%s11622_s25 + $0xea0] ss:$8 sps:$4 sm:$0xff]   ;;  %v10647_v45 = vld [vmem:[%s11622_s25 + $0xe90] ss:$8 sps:$4 sm:$0xff]  }
 0x1fd   : > { %7747 = vmatprep.mubr.bf16.mxu1 %v8697_v55  ;;  %v7304_v10 = vpop.f32.mrf.mxu0  ;;  %v10643_v28 = vld [vmem:[%s11622_s25 + $0xea4] ss:$8 sps:$4 sm:$0xff]   ;;  %v10650_v55 = vld [vmem:[%s11622_s25 + $0xf90] ss:$8 sps:$4 sm:$0xff]   ;;  %v10653_v43 = vld [vmem:[%s11622_s25 + $0xe80] ss:$8 sps:$4 sm:$0xff]  }
 0x1fe   : > { %v7355_v59 = vpop.f32.mrf.mxu1  ;;  %v12410_v53 = vadd.f32 %v7353_v49, %v7303_v58  ;;  %7671 = vmatpush1.bf16.msra.mxu0 %v10581_v40  ;;  %v10646_v29 = vld [vmem:[%s11622_s25 + $0xfa4] ss:$8 sps:$4 sm:$0xff]   ;;  %v10649_v40 = vld [vmem:[%s11622_s25 + $0xe94] ss:$8 sps:$4 sm:$0xff]   ;;  %v10656_v56 = vld [vmem:[%s11622_s25 + $0xf80] ss:$8 sps:$4 sm:$0xff]   ;;  %v8696_v58 = vcombine.low %v12381_v26, %v12386_v32 }
 0x1ff   : > { %7722 = vmatpush1.bf16.msra.mxu1 %v10584_v41  ;;  %7672 = vmatprep.subr.bf16.mxu0 %v10589_v50  ;;  %v7305_v1 = vpop.f32.mrf.mxu0  ;;  %v10652_v41 = vld [vmem:[%s11622_s25 + $0xf94] ss:$8 sps:$4 sm:$0xff]   ;;  %v10655_v61 = vld [vmem:[%s11622_s25 + $0xe84] ss:$8 sps:$4 sm:$0xff]   ;;  %v10659_v10 = vld [vmem:[%s11622_s25 + $0x1070] ss:$8 sps:$4 sm:$0xff]  }
 0x200   : > { %7723 = vmatprep.subr.bf16.mxu1 %v10592_v51  ;;  %v7356_v2 = vpop.f32.mrf.mxu1  ;;  %v10658_v38 = vld [vmem:[%s11622_s25 + $0xf84] ss:$8 sps:$4 sm:$0xff]   ;;  %v10661_v49 = vld [vmem:[%s11622_s25 + $0x1074] ss:$8 sps:$4 sm:$0xff]   ;;  %v8694_v51 = vcombine.low %v12366_v25, %v12376_v5  ;;  %v10665_v5 = vld [vmem:[%s11622_s25 + $0x1060] ss:$8 sps:$4 sm:$0xff]  }
 0x201   : > { %v10664_v50 = vld [vmem:[%s11622_s25 + $0x1174] ss:$8 sps:$4 sm:$0xff]   ;;  %v10670_v25 = vld [vmem:[%s11622_s25 + $0x1164] ss:$8 sps:$4 sm:$0xff]   ;;  %v10668_v26 = vld [vmem:[%s11622_s25 + $0x1160] ss:$8 sps:$4 sm:$0xff]  }
 0x202   : > { %7673 = vmatpush1.bf16.msra.mxu0 %v10587_v57  ;;  %v244_v59 = vld [vmem:[%s13420_s0 + $0x270] sm:$0xff]  ;;  %v245_v57 = vld [vmem:[%s13420_s0 + $0x278] sm:$0xff] }
 0x203   : > { %7724 = vmatpush1.bf16.msra.mxu1 %v10590_v62  ;;  %7674 = vmatprep.subr.bf16.mxu0 %v10595_v12  ;;  %v10662_v62 = vld [vmem:[%s11622_s25 + $0x1170] ss:$8 sps:$4 sm:$0xff]   ;;  %v10667_v12 = vld [vmem:[%s11622_s25 + $0x1064] ss:$8 sps:$4 sm:$0xff]   ;;  %v8759_v32 = vcombine.high %v244_v59, %v244_v59 }
 0x204   : > { %7725 = vmatprep.subr.bf16.mxu1 %v10598_v63  ;;  %v8761_v63 = vcombine.high %v245_v57, %v245_v57 }
 0x206   : > { %7675 = vmatpush1.bf16.msra.mxu0 %v10593_v3  ;;  %v10675_v3 = vld [vmem:[%s11622_s25 + $0x1054] ss:$8 sps:$4 sm:$0xff]  }
 0x207   : > { %7726 = vmatpush1.bf16.msra.mxu1 %v10596_v14  ;;  %7676 = vmatprep.subr.bf16.mxu0 %v10601_v4 }
 0x208   : > { %7727 = vmatprep.subr.bf16.mxu1 %v10604_v9 }
 0x20a   : > { %7677 = vmatpush1.bf16.msra.mxu0 %v10599_v18  ;;  %v10678_v18 = vld [vmem:[%s11622_s25 + $0x1154] ss:$8 sps:$4 sm:$0xff]  }
 0x20b   : > { %7728 = vmatpush1.bf16.msra.mxu1 %v10602_v11  ;;  %7678 = vmatprep.subr.bf16.mxu0 %v10607_v15  ;;  %v12482_v11 = vld [vmem:[%s13420_s0 + $0x80] sm:$0xff] }
 0x20c   : > { %7729 = vmatprep.subr.bf16.mxu1 %v10610_v16 }
 0x20e   : > { %7679 = vmatpush1.bf16.msra.mxu0 %v10605_v20  ;;  %v10673_v20 = vld [vmem:[%s11622_s25 + $0x1050] ss:$8 sps:$4 sm:$0xff]  }
 0x20f   : > { %7730 = vmatpush1.bf16.msra.mxu1 %v10608_v37  ;;  %7680 = vmatprep.subr.bf16.mxu0 %v10613_v48  ;;  %v10676_v37 = vld [vmem:[%s11622_s25 + $0x1150] ss:$8 sps:$4 sm:$0xff]   ;;  %v12497_v48 = vld [vmem:[%s13420_s0 + $0x88] sm:$0xff] }
 0x210   : > { %7731 = vmatprep.subr.bf16.mxu1 %v10616_v13 }
 0x212   : > { %7681 = vmatpush2.bf16.msra.mxu0 %v10611_v46 }
 0x213   : > { %7732 = vmatpush2.bf16.msra.mxu1 %v10614_v17  ;;  %7682 = vmatprep.subr.bf16.mxu0 %v10619_v36  ;;  %v8760_v17 = vcombine.low %v245_v57, %v245_v57  ;;  %v12502_v36 = vld [vmem:[%s13420_s0 + $0x188] sm:$0xff] }
 0x214   : > { %7733 = vmatprep.subr.bf16.mxu1 %v10622_v19  ;;  %v10707_v57 = vld [vmem:[%s11622_s25 + $0x1004] ss:$8 sps:$4 sm:$0xff]  }
 0x216   : > { %7683 = vmatpush2.bf16.msra.mxu0 %v10617_v21 }
 0x217   : > { %7734 = vmatpush2.bf16.msra.mxu1 %v10620_v22  ;;  %7684 = vmatprep.subr.bf16.mxu0 %v10625_v44 }
 0x218   : > { %7735 = vmatprep.subr.bf16.mxu1 %v10628_v23  ;;  %v10683_v23 = vld [vmem:[%s11622_s25 + $0x1044] ss:$8 sps:$4 sm:$0xff]  }
 0x21a   : > { %7685 = vmatpush2.bf16.msra.mxu0 %v10623_v24  ;;  %v10686_v24 = vld [vmem:[%s11622_s25 + $0x1144] ss:$8 sps:$4 sm:$0xff]  }
 0x21b   : > { %7736 = vmatpush2.bf16.msra.mxu1 %v10626_v0  ;;  %7686 = vmatprep.subr.bf16.mxu0 %v10631_v54 }
 0x21c   : > { %7737 = vmatprep.subr.bf16.mxu1 %v10634_v60  ;;  %v10681_v60 = vld [vmem:[%s11622_s25 + $0x1040] ss:$8 sps:$4 sm:$0xff]  }
 0x21e   : > { %7687 = vmatpush2.bf16.msra.mxu0 %v10629_v27  ;;  %v10684_v27 = vld [vmem:[%s11622_s25 + $0x1140] ss:$8 sps:$4 sm:$0xff]  }
 0x21f   : > { %7738 = vmatpush2.bf16.msra.mxu1 %v10632_v30  ;;  %7688 = vmatprep.subr.bf16.mxu0 %v10637_v39 }
 0x220   : > { %7739 = vmatprep.subr.bf16.mxu1 %v10640_v31 }
 0x222   : > { %7689 = vmatpush2.bf16.msra.mxu0 %v10635_v34 }
 0x223   : > { %7740 = vmatpush2.bf16.msra.mxu1 %v10638_v35  ;;  %7690 = vmatprep.subr.bf16.mxu0 %v10643_v28 }
 0x224   : > { %7741 = vmatprep.subr.bf16.mxu1 %v10646_v29  ;;  %v10689_v29 = vld [vmem:[%s11622_s25 + $0x1034] ss:$8 sps:$4 sm:$0xff]  }
 0x226   : > { %7691 = vmatpush2.bf16.msra.mxu0 %v10641_v6  ;;  %v10692_v6 = vld [vmem:[%s11622_s25 + $0x1134] ss:$8 sps:$4 sm:$0xff]  }
 0x227   : > { %7742 = vmatpush2.bf16.msra.mxu1 %v10644_v8  ;;  %7692 = vmatprep.subr.bf16.mxu0 %v10649_v40 }
 0x228   : > { %7743 = vmatprep.subr.bf16.mxu1 %v10652_v41 }
 0x22a   : > { %7693 = vmatpush2.bf16.msra.mxu0 %v10647_v45 }
 0x22b   : > { %7744 = vmatpush2.bf16.msra.mxu1 %v10650_v55  ;;  %7694 = vmatprep.subr.bf16.mxu0 %v10655_v61  ;;  %v10687_v55 = vld [vmem:[%s11622_s25 + $0x1030] ss:$8 sps:$4 sm:$0xff]  }
 0x22c   : > { %7745 = vmatprep.subr.bf16.mxu1 %v10658_v38  ;;  %v10690_v61 = vld [vmem:[%s11622_s25 + $0x1130] ss:$8 sps:$4 sm:$0xff]   ;;  %v10698_v38 = vld [vmem:[%s11622_s25 + $0x1124] ss:$8 sps:$4 sm:$0xff]  }
 0x22e   : > { %7695 = vmatpush2.bf16.msra.mxu0 %v10653_v43 }
 0x22f   : > { %7746 = vmatpush2.bf16.msra.mxu1 %v10656_v56  ;;  %7766 = vmatprep.subr.bf16.mxu0 %v10661_v49  ;;  %v10693_v49 = vld [vmem:[%s11622_s25 + $0x1020] ss:$8 sps:$4 sm:$0xff]  }
 0x230   : > { %7817 = vmatprep.subr.bf16.mxu1 %v10664_v50  ;;  %v10696_v50 = vld [vmem:[%s11622_s25 + $0x1120] ss:$8 sps:$4 sm:$0xff]  }
 0x231   : > { %v7392_v1 = vpop.f32.mrf.mxu0  ;;  %7697 = vmatmul.mubr.bf16.vlgmr.msra.gmra.mxu0 %v8694_v51  ;;  %v10701_v51 = vld [vmem:[%s11622_s25 + $0x1014] ss:$8 sps:$4 sm:$0xff]  }
 0x232   : > { %v7443_v2 = vpop.f32.mrf.mxu1  ;;  %7748 = vmatmul.mubr.bf16.vlgmr.msra.gmra.mxu1 %v8696_v58  ;;  %v7393_v14 = vadd.f32 %v7392_v1, %v12368_v47  ;;  %7767 = vmatpush1.bf16.msra.mxu0 %v10659_v10  ;;  %v12492_v47 = vld [vmem:[%s13420_s0 + $0x180] sm:$0xff]  ;;  %v10704_v58 = vld [vmem:[%s11622_s25 + $0x1114] ss:$8 sps:$4 sm:$0xff]   ;;  %v10699_v10 = vld [vmem:[%s11622_s25 + $0x1010] ss:$8 sps:$4 sm:$0xff]  }
 0x233   : > { %7818 = vmatpush1.bf16.msra.mxu1 %v10662_v62  ;;  %v7394_v4 = vpop.f32.mrf.mxu0  ;;  %7768 = vmatprep.subr.bf16.mxu0 %v10667_v12  ;;  %v8699_v30 = vcombine.high %v12482_v11, %v12492_v47  ;;  %v10710_v62 = vld [vmem:[%s11622_s25 + $0x1104] ss:$8 sps:$4 sm:$0xff]   ;;  %v10705_v12 = vld [vmem:[%s11622_s25 + $0x1000] ss:$8 sps:$4 sm:$0xff]  }
 0x234   : > { %v7445_v9 = vpop.f32.mrf.mxu1  ;;  %7819 = vmatprep.subr.bf16.mxu1 %v10670_v25  ;;  %v12484_v15 = vadd.f32 %v7443_v2, %v7393_v14  ;;  %v7395_v16 = vadd.f32 %v7394_v4, %v12388_v33  ;;  %7706 = vmatprep.mubr.bf16.mxu0 %v8759_v32  ;;  %v8758_v33 = vcombine.low %v244_v59, %v244_v59  ;;  %v10702_v59 = vld [vmem:[%s11622_s25 + $0x1110] ss:$8 sps:$4 sm:$0xff]   ;;  %v10708_v25 = vld [vmem:[%s11622_s25 + $0x1100] ss:$8 sps:$4 sm:$0xff]   ;;  %v10719_v1 = vld [vmem:[%s11622_s25 + $0x10e4] ss:$8 sps:$4 sm:$0xff]  }
 0x235   : > { %7757 = vmatprep.mubr.bf16.mxu1 %v8761_v63  ;;  %v7396_v13 = vpop.f32.mrf.mxu0  ;;  %v10711_v32 = vld [vmem:[%s11622_s25 + $0x10f0] ss:$8 sps:$4 sm:$0xff]   ;;  %v10722_v2 = vld [vmem:[%s11622_s25 + $0x11e4] ss:$8 sps:$4 sm:$0xff]   ;;  %v10720_v14 = vld [vmem:[%s11622_s25 + $0x11e0] ss:$8 sps:$4 sm:$0xff]  }
 0x236   : > { %v7447_v46 = vpop.f32.mrf.mxu1  ;;  %v12504_v19 = vadd.f32 %v7445_v9, %v7395_v16  ;;  %v7397_v21 = vadd.f32 %v7396_v13, %v12393_v52  ;;  %7769 = vmatpush1.bf16.msra.mxu0 %v10665_v5  ;;  %v8701_v52 = vcombine.high %v12497_v48, %v12502_v36  ;;  %v10713_v5 = vld [vmem:[%s11622_s25 + $0x10f4] ss:$8 sps:$4 sm:$0xff]   ;;  %v10714_v63 = vld [vmem:[%s11622_s25 + $0x11f0] ss:$8 sps:$4 sm:$0xff]   ;;  %v10729_v13 = vld [vmem:[%s11622_s25 + $0x10c0] ss:$8 sps:$4 sm:$0xff]  }
 0x237   : > { %7820 = vmatpush1.bf16.msra.mxu1 %v10668_v26  ;;  %v7398_v22 = vpop.f32.mrf.mxu0  ;;  %7770 = vmatprep.subr.bf16.mxu0 %v10675_v3  ;;  %v10716_v26 = vld [vmem:[%s11622_s25 + $0x11f4] ss:$8 sps:$4 sm:$0xff]   ;;  %v10717_v3 = vld [vmem:[%s11622_s25 + $0x10e0] ss:$8 sps:$4 sm:$0xff]   ;;  %v10726_v16 = vld [vmem:[%s11622_s25 + $0x11d0] ss:$8 sps:$4 sm:$0xff]  }
 0x238   : > { %v7449_v44 = vpop.f32.mrf.mxu1  ;;  %7821 = vmatprep.subr.bf16.mxu1 %v10678_v18  ;;  %v12509_v0 = vadd.f32 %v7447_v46, %v7397_v21  ;;  %v7399_v54 = vadd.f32 %v7398_v22, %v12402_v42  ;;  %v10725_v4 = vld [vmem:[%s11622_s25 + $0x10d4] ss:$8 sps:$4 sm:$0xff]   ;;  %v10723_v18 = vld [vmem:[%s11622_s25 + $0x10d0] ss:$8 sps:$4 sm:$0xff]   ;;  %v10732_v46 = vld [vmem:[%s11622_s25 + $0x11c0] ss:$8 sps:$4 sm:$0xff]  }
 0x239   : > { %v7402_v39 = vpop.f32.mrf.mxu0  ;;  %7707 = vmatmul.mubr.bf16.gmra.mxu0 %v8758_v33  ;;  %v10728_v9 = vld [vmem:[%s11622_s25 + $0x11d4] ss:$8 sps:$4 sm:$0xff]   ;;  %v10735_v21 = vld [vmem:[%s11622_s25 + $0x10b0] ss:$8 sps:$4 sm:$0xff]  }
 0x23a   : > { %v7453_v31 = vpop.f32.mrf.mxu1  ;;  %7758 = vmatmul.mubr.bf16.gmra.mxu1 %v8760_v17  ;;  %v12518_v34 = vadd.f32 %v7449_v44, %v7399_v54  ;;  %v7403_v35 = vadd.f32 %v7402_v39, %v12408_v7  ;;  %7771 = vmatpush1.bf16.msra.mxu0 %v10673_v20  ;;  %v10731_v20 = vld [vmem:[%s11622_s25 + $0x10c4] ss:$8 sps:$4 sm:$0xff]   ;;  %v10737_v33 = vld [vmem:[%s11622_s25 + $0x10b4] ss:$8 sps:$4 sm:$0xff]   ;;  %v10738_v22 = vld [vmem:[%s11622_s25 + $0x11b0] ss:$8 sps:$4 sm:$0xff]  }
 0x23b   : > { %7822 = vmatpush1.bf16.msra.mxu1 %v10676_v37  ;;  %v7404_v42 = vpop.f32.mrf.mxu0  ;;  %7772 = vmatprep.subr.bf16.mxu0 %v10683_v23  ;;  %v10734_v37 = vld [vmem:[%s11622_s25 + $0x11c4] ss:$8 sps:$4 sm:$0xff]   ;;  %v10740_v17 = vld [vmem:[%s11622_s25 + $0x11b4] ss:$8 sps:$4 sm:$0xff]   ;;  %v10744_v54 = vld [vmem:[%s11622_s25 + $0x11a0] ss:$8 sps:$4 sm:$0xff]  }
 0x23c   : > { %v7455_v28 = vpop.f32.mrf.mxu1  ;;  %7823 = vmatprep.subr.bf16.mxu1 %v10686_v24  ;;  %v7405_v8 = vadd.f32 %v7404_v42, %v12410_v53  ;;  %v12524_v40 = vadd.f32 %v7453_v31, %v7403_v35  ;;  %7798 = vmatprep.mubr.bf16.mxu0 %v8699_v30  ;;  %v10695_v53 = vld [vmem:[%s11622_s25 + $0x1024] ss:$8 sps:$4 sm:$0xff]   ;;  %v10741_v24 = vld [vmem:[%s11622_s25 + $0x10a0] ss:$8 sps:$4 sm:$0xff]   ;;  %v10747_v30 = vld [vmem:[%s11622_s25 + $0x1090] ss:$8 sps:$4 sm:$0xff]  }
 0x23d   : > { %7849 = vmatprep.mubr.bf16.mxu1 %v8701_v52  ;;  %v7406_v7 = vpop.f32.mrf.mxu0  ;;  %v10743_v44 = vld [vmem:[%s11622_s25 + $0x10a4] ss:$8 sps:$4 sm:$0xff]   ;;  %v10750_v52 = vld [vmem:[%s11622_s25 + $0x1190] ss:$8 sps:$4 sm:$0xff]   ;;  %v10753_v35 = vld [vmem:[%s11622_s25 + $0x1080] ss:$8 sps:$4 sm:$0xff]  }
 0x23e   : > { %v7457_v41 = vpop.f32.mrf.mxu1  ;;  %v12526_v45 = vadd.f32 %v7455_v28, %v7405_v8  ;;  %7773 = vmatpush1.bf16.msra.mxu0 %v10681_v60  ;;  %v10746_v23 = vld [vmem:[%s11622_s25 + $0x11a4] ss:$8 sps:$4 sm:$0xff]   ;;  %v10749_v60 = vld [vmem:[%s11622_s25 + $0x1094] ss:$8 sps:$4 sm:$0xff]   ;;  %v10756_v42 = vld [vmem:[%s11622_s25 + $0x1180] ss:$8 sps:$4 sm:$0xff]   ;;  %v8700_v8 = vcombine.low %v12497_v48, %v12502_v36 }
 0x23f   : > { %7824 = vmatpush1.bf16.msra.mxu1 %v10684_v27  ;;  %7774 = vmatprep.subr.bf16.mxu0 %v10689_v29  ;;  %v7407_v43 = vpop.f32.mrf.mxu0  ;;  %v10752_v27 = vld [vmem:[%s11622_s25 + $0x1194] ss:$8 sps:$4 sm:$0xff]   ;;  %v10755_v39 = vld [vmem:[%s11622_s25 + $0x1084] ss:$8 sps:$4 sm:$0xff]   ;;  %v10759_v7 = vld [vmem:[%s11622_s25 + $0x1270] ss:$8 sps:$4 sm:$0xff]  }
 0x240   : > { %7825 = vmatprep.subr.bf16.mxu1 %v10692_v6  ;;  %v7458_v56 = vpop.f32.mrf.mxu1  ;;  %v10758_v31 = vld [vmem:[%s11622_s25 + $0x1184] ss:$8 sps:$4 sm:$0xff]   ;;  %v10761_v28 = vld [vmem:[%s11622_s25 + $0x1274] ss:$8 sps:$4 sm:$0xff]   ;;  %v8698_v6 = vcombine.low %v12482_v11, %v12492_v47  ;;  %v10765_v47 = vld [vmem:[%s11622_s25 + $0x1260] ss:$8 sps:$4 sm:$0xff]  }
 0x241   : > { %v10764_v29 = vld [vmem:[%s11622_s25 + $0x1374] ss:$8 sps:$4 sm:$0xff]   ;;  %v246_v41 = vld [vmem:[%s13420_s0 + $0x280] sm:$0xff] }
 0x242   : > { %7775 = vmatpush1.bf16.msra.mxu0 %v10687_v55  ;;  %v247_v55 = vld [vmem:[%s13420_s0 + $0x288] sm:$0xff]  ;;  %v8763_v36 = vcombine.high %v246_v41, %v246_v41 }
 0x243   : > { %7826 = vmatpush1.bf16.msra.mxu1 %v10690_v61  ;;  %7776 = vmatprep.subr.bf16.mxu0 %v10695_v53  ;;  %v10762_v61 = vld [vmem:[%s11622_s25 + $0x1370] ss:$8 sps:$4 sm:$0xff]   ;;  %v10767_v53 = vld [vmem:[%s11622_s25 + $0x1264] ss:$8 sps:$4 sm:$0xff]   ;;  %v10768_v48 = vld [vmem:[%s11622_s25 + $0x1360] ss:$8 sps:$4 sm:$0xff]  }
 0x244   : > { %7827 = vmatprep.subr.bf16.mxu1 %v10698_v38  ;;  %v10770_v11 = vld [vmem:[%s11622_s25 + $0x1364] ss:$8 sps:$4 sm:$0xff]   ;;  %v8765_v38 = vcombine.high %v247_v55, %v247_v55 }
 0x246   : > { %7777 = vmatpush1.bf16.msra.mxu0 %v10693_v49  ;;  %v10775_v49 = vld [vmem:[%s11622_s25 + $0x1254] ss:$8 sps:$4 sm:$0xff]  }
 0x247   : > { %7828 = vmatpush1.bf16.msra.mxu1 %v10696_v50  ;;  %7778 = vmatprep.subr.bf16.mxu0 %v10701_v51 }
 0x248   : > { %7829 = vmatprep.subr.bf16.mxu1 %v10704_v58 }
 0x24a   : > { %7779 = vmatpush1.bf16.msra.mxu0 %v10699_v10  ;;  %v10778_v10 = vld [vmem:[%s11622_s25 + $0x1354] ss:$8 sps:$4 sm:$0xff]  }
 0x24b   : > { %7830 = vmatpush1.bf16.msra.mxu1 %v10702_v59  ;;  %7780 = vmatprep.subr.bf16.mxu0 %v10707_v57  ;;  %v12598_v59 = vld [vmem:[%s13420_s0 + $0x90] sm:$0xff] }
 0x24c   : > { %7831 = vmatprep.subr.bf16.mxu1 %v10710_v62 }
 0x24e   : > { %7781 = vmatpush1.bf16.msra.mxu0 %v10705_v12  ;;  %v10773_v12 = vld [vmem:[%s11622_s25 + $0x1250] ss:$8 sps:$4 sm:$0xff]  }
 0x24f   : > { %7832 = vmatpush1.bf16.msra.mxu1 %v10708_v25  ;;  %7782 = vmatprep.subr.bf16.mxu0 %v10713_v5  ;;  %v10776_v25 = vld [vmem:[%s11622_s25 + $0x1350] ss:$8 sps:$4 sm:$0xff]  }
 0x250   : > { %7833 = vmatprep.subr.bf16.mxu1 %v10716_v26  ;;  %v12613_v5 = vld [vmem:[%s13420_s0 + $0x98] sm:$0xff] }
 0x252   : > { %7783 = vmatpush2.bf16.msra.mxu0 %v10711_v32 }
 0x253   : > { %7834 = vmatpush2.bf16.msra.mxu1 %v10714_v63  ;;  %7784 = vmatprep.subr.bf16.mxu0 %v10719_v1  ;;  %v8764_v63 = vcombine.low %v247_v55, %v247_v55  ;;  %v12618_v1 = vld [vmem:[%s13420_s0 + $0x198] sm:$0xff]  ;;  %v10807_v55 = vld [vmem:[%s11622_s25 + $0x1204] ss:$8 sps:$4 sm:$0xff]  }
 0x254   : > { %7835 = vmatprep.subr.bf16.mxu1 %v10722_v2 }
 0x256   : > { %7785 = vmatpush2.bf16.msra.mxu0 %v10717_v3 }
 0x257   : > { %7836 = vmatpush2.bf16.msra.mxu1 %v10720_v14  ;;  %7786 = vmatprep.subr.bf16.mxu0 %v10725_v4 }
 0x258   : > { %7837 = vmatprep.subr.bf16.mxu1 %v10728_v9  ;;  %v10783_v9 = vld [vmem:[%s11622_s25 + $0x1244] ss:$8 sps:$4 sm:$0xff]  }
 0x25a   : > { %7787 = vmatpush2.bf16.msra.mxu0 %v10723_v18  ;;  %v10786_v18 = vld [vmem:[%s11622_s25 + $0x1344] ss:$8 sps:$4 sm:$0xff]  }
 0x25b   : > { %7838 = vmatpush2.bf16.msra.mxu1 %v10726_v16  ;;  %7788 = vmatprep.subr.bf16.mxu0 %v10731_v20 }
 0x25c   : > { %7839 = vmatprep.subr.bf16.mxu1 %v10734_v37  ;;  %v10781_v37 = vld [vmem:[%s11622_s25 + $0x1240] ss:$8 sps:$4 sm:$0xff]  }
 0x25e   : > { %7789 = vmatpush2.bf16.msra.mxu0 %v10729_v13  ;;  %v10784_v13 = vld [vmem:[%s11622_s25 + $0x1340] ss:$8 sps:$4 sm:$0xff]  }
 0x25f   : > { %7840 = vmatpush2.bf16.msra.mxu1 %v10732_v46  ;;  %7790 = vmatprep.subr.bf16.mxu0 %v10737_v33 }
 0x260   : > { %7841 = vmatprep.subr.bf16.mxu1 %v10740_v17 }
 0x262   : > { %7791 = vmatpush2.bf16.msra.mxu0 %v10735_v21 }
 0x263   : > { %7842 = vmatpush2.bf16.msra.mxu1 %v10738_v22  ;;  %7792 = vmatprep.subr.bf16.mxu0 %v10743_v44 }
 0x264   : > { %7843 = vmatprep.subr.bf16.mxu1 %v10746_v23  ;;  %v10789_v23 = vld [vmem:[%s11622_s25 + $0x1234] ss:$8 sps:$4 sm:$0xff]  }
 0x266   : > { %7793 = vmatpush2.bf16.msra.mxu0 %v10741_v24  ;;  %v10792_v24 = vld [vmem:[%s11622_s25 + $0x1334] ss:$8 sps:$4 sm:$0xff]  }
 0x267   : > { %7844 = vmatpush2.bf16.msra.mxu1 %v10744_v54  ;;  %7794 = vmatprep.subr.bf16.mxu0 %v10749_v60 }
 0x268   : > { %7845 = vmatprep.subr.bf16.mxu1 %v10752_v27 }
 0x26a   : > { %7795 = vmatpush2.bf16.msra.mxu0 %v10747_v30 }
 0x26b   : > { %7846 = vmatpush2.bf16.msra.mxu1 %v10750_v52  ;;  %7796 = vmatprep.subr.bf16.mxu0 %v10755_v39  ;;  %v10787_v52 = vld [vmem:[%s11622_s25 + $0x1230] ss:$8 sps:$4 sm:$0xff]  }
 0x26c   : > { %7847 = vmatprep.subr.bf16.mxu1 %v10758_v31  ;;  %v10790_v39 = vld [vmem:[%s11622_s25 + $0x1330] ss:$8 sps:$4 sm:$0xff]   ;;  %v10798_v31 = vld [vmem:[%s11622_s25 + $0x1324] ss:$8 sps:$4 sm:$0xff]  }
 0x26e   : > { %7797 = vmatpush2.bf16.msra.mxu0 %v10753_v35 }
 0x26f   : > { %7848 = vmatpush2.bf16.msra.mxu1 %v10756_v42  ;;  %7868 = vmatprep.subr.bf16.mxu0 %v10761_v28  ;;  %v10793_v28 = vld [vmem:[%s11622_s25 + $0x1220] ss:$8 sps:$4 sm:$0xff]  }
 0x270   : > { %7919 = vmatprep.subr.bf16.mxu1 %v10764_v29  ;;  %v10796_v29 = vld [vmem:[%s11622_s25 + $0x1320] ss:$8 sps:$4 sm:$0xff]  }
 0x271   : > { %v7494_v43 = vpop.f32.mrf.mxu0  ;;  %7799 = vmatmul.mubr.bf16.vlgmr.msra.gmra.mxu0 %v8698_v6  ;;  %v10801_v6 = vld [vmem:[%s11622_s25 + $0x1214] ss:$8 sps:$4 sm:$0xff]  }
 0x272   : > { %v7545_v56 = vpop.f32.mrf.mxu1  ;;  %7850 = vmatmul.mubr.bf16.vlgmr.msra.gmra.mxu1 %v8700_v8  ;;  %v7495_v50 = vadd.f32 %v7494_v43, %v12484_v15  ;;  %7869 = vmatpush1.bf16.msra.mxu0 %v10759_v7  ;;  %v12608_v15 = vld [vmem:[%s13420_s0 + $0x190] sm:$0xff]  ;;  %v10819_v43 = vld [vmem:[%s11622_s25 + $0x12e4] ss:$8 sps:$4 sm:$0xff]  }
 0x273   : > { %7920 = vmatpush1.bf16.msra.mxu1 %v10762_v61  ;;  %v7496_v51 = vpop.f32.mrf.mxu0  ;;  %7870 = vmatprep.subr.bf16.mxu0 %v10767_v53  ;;  %v8703_v46 = vcombine.high %v12598_v59, %v12608_v15  ;;  %v10804_v8 = vld [vmem:[%s11622_s25 + $0x1314] ss:$8 sps:$4 sm:$0xff]   ;;  %v10799_v7 = vld [vmem:[%s11622_s25 + $0x1210] ss:$8 sps:$4 sm:$0xff]   ;;  %v10810_v61 = vld [vmem:[%s11622_s25 + $0x1304] ss:$8 sps:$4 sm:$0xff]  }
 0x274   : > { %v7547_v58 = vpop.f32.mrf.mxu1  ;;  %7921 = vmatprep.subr.bf16.mxu1 %v10770_v11  ;;  %v12600_v57 = vadd.f32 %v7545_v56, %v7495_v50  ;;  %v7497_v62 = vadd.f32 %v7496_v51, %v12504_v19  ;;  %7808 = vmatprep.mubr.bf16.mxu0 %v8763_v36  ;;  %v8762_v19 = vcombine.low %v246_v41, %v246_v41  ;;  %v10802_v41 = vld [vmem:[%s11622_s25 + $0x1310] ss:$8 sps:$4 sm:$0xff]   ;;  %v10805_v53 = vld [vmem:[%s11622_s25 + $0x1200] ss:$8 sps:$4 sm:$0xff]   ;;  %v10822_v56 = vld [vmem:[%s11622_s25 + $0x13e4] ss:$8 sps:$4 sm:$0xff]  }
 0x275   : > { %7859 = vmatprep.mubr.bf16.mxu1 %v8765_v38  ;;  %v7498_v26 = vpop.f32.mrf.mxu0  ;;  %v10808_v11 = vld [vmem:[%s11622_s25 + $0x1300] ss:$8 sps:$4 sm:$0xff]   ;;  %v10811_v36 = vld [vmem:[%s11622_s25 + $0x12f0] ss:$8 sps:$4 sm:$0xff]   ;;  %v10825_v51 = vld [vmem:[%s11622_s25 + $0x12d4] ss:$8 sps:$4 sm:$0xff]  }
 0x276   : > { %v7549_v32 = vpop.f32.mrf.mxu1  ;;  %v12620_v2 = vadd.f32 %v7547_v58, %v7497_v62  ;;  %v7499_v3 = vadd.f32 %v7498_v26, %v12509_v0  ;;  %7871 = vmatpush1.bf16.msra.mxu0 %v10765_v47  ;;  %v8705_v0 = vcombine.high %v12613_v5, %v12618_v1  ;;  %v10813_v47 = vld [vmem:[%s11622_s25 + $0x12f4] ss:$8 sps:$4 sm:$0xff]   ;;  %v10814_v38 = vld [vmem:[%s11622_s25 + $0x13f0] ss:$8 sps:$4 sm:$0xff]   ;;  %v10820_v50 = vld [vmem:[%s11622_s25 + $0x13e0] ss:$8 sps:$4 sm:$0xff]  }
 0x277   : > { %7922 = vmatpush1.bf16.msra.mxu1 %v10768_v48  ;;  %v7500_v14 = vpop.f32.mrf.mxu0  ;;  %7872 = vmatprep.subr.bf16.mxu0 %v10775_v49  ;;  %v10816_v48 = vld [vmem:[%s11622_s25 + $0x13f4] ss:$8 sps:$4 sm:$0xff]   ;;  %v10817_v49 = vld [vmem:[%s11622_s25 + $0x12e0] ss:$8 sps:$4 sm:$0xff]   ;;  %v10826_v62 = vld [vmem:[%s11622_s25 + $0x13d0] ss:$8 sps:$4 sm:$0xff]  }
 0x278   : > { %v7551_v4 = vpop.f32.mrf.mxu1  ;;  %7923 = vmatprep.subr.bf16.mxu1 %v10778_v10  ;;  %v12625_v16 = vadd.f32 %v7549_v32, %v7499_v3  ;;  %v7501_v20 = vadd.f32 %v7500_v14, %v12518_v34  ;;  %v10828_v58 = vld [vmem:[%s11622_s25 + $0x13d4] ss:$8 sps:$4 sm:$0xff]   ;;  %v10823_v10 = vld [vmem:[%s11622_s25 + $0x12d0] ss:$8 sps:$4 sm:$0xff]   ;;  %v10829_v26 = vld [vmem:[%s11622_s25 + $0x12c0] ss:$8 sps:$4 sm:$0xff]  }
 0x279   : > { %v7504_v33 = vpop.f32.mrf.mxu0  ;;  %7809 = vmatmul.mubr.bf16.gmra.mxu0 %v8762_v19  ;;  %v10832_v32 = vld [vmem:[%s11622_s25 + $0x13c0] ss:$8 sps:$4 sm:$0xff]   ;;  %v10837_v19 = vld [vmem:[%s11622_s25 + $0x12b4] ss:$8 sps:$4 sm:$0xff]   ;;  %v10835_v3 = vld [vmem:[%s11622_s25 + $0x12b0] ss:$8 sps:$4 sm:$0xff]  }
 0x27a   : > { %v7555_v17 = vpop.f32.mrf.mxu1  ;;  %7860 = vmatmul.mubr.bf16.gmra.mxu1 %v8764_v63  ;;  %v12634_v21 = vadd.f32 %v7551_v4, %v7501_v20  ;;  %v7505_v22 = vadd.f32 %v7504_v33, %v12524_v40  ;;  %7873 = vmatpush1.bf16.msra.mxu0 %v10773_v12  ;;  %v10831_v12 = vld [vmem:[%s11622_s25 + $0x12c4] ss:$8 sps:$4 sm:$0xff]   ;;  %v10840_v63 = vld [vmem:[%s11622_s25 + $0x13b4] ss:$8 sps:$4 sm:$0xff]   ;;  %v10838_v14 = vld [vmem:[%s11622_s25 + $0x13b0] ss:$8 sps:$4 sm:$0xff]  }
 0x27b   : > { %7924 = vmatpush1.bf16.msra.mxu1 %v10776_v25  ;;  %v7506_v34 = vpop.f32.mrf.mxu0  ;;  %7874 = vmatprep.subr.bf16.mxu0 %v10783_v9  ;;  %v10834_v25 = vld [vmem:[%s11622_s25 + $0x13c4] ss:$8 sps:$4 sm:$0xff]   ;;  %v10844_v20 = vld [vmem:[%s11622_s25 + $0x13a0] ss:$8 sps:$4 sm:$0xff]  }
 0x27c   : > { %v7557_v44 = vpop.f32.mrf.mxu1  ;;  %7925 = vmatprep.subr.bf16.mxu1 %v10786_v18  ;;  %v7507_v54 = vadd.f32 %v7506_v34, %v12526_v45  ;;  %v12640_v60 = vadd.f32 %v7555_v17, %v7505_v22  ;;  %7900 = vmatprep.mubr.bf16.mxu0 %v8703_v46  ;;  %v10795_v45 = vld [vmem:[%s11622_s25 + $0x1224] ss:$8 sps:$4 sm:$0xff]   ;;  %v10841_v18 = vld [vmem:[%s11622_s25 + $0x12a0] ss:$8 sps:$4 sm:$0xff]   ;;  %v10847_v46 = vld [vmem:[%s11622_s25 + $0x1290] ss:$8 sps:$4 sm:$0xff]  }
 0x27d   : > { %7951 = vmatprep.mubr.bf16.mxu1 %v8705_v0  ;;  %v7508_v40 = vpop.f32.mrf.mxu0  ;;  %v10843_v4 = vld [vmem:[%s11622_s25 + $0x12a4] ss:$8 sps:$4 sm:$0xff]   ;;  %v10850_v0 = vld [vmem:[%s11622_s25 + $0x1390] ss:$8 sps:$4 sm:$0xff]   ;;  %v10853_v22 = vld [vmem:[%s11622_s25 + $0x1280] ss:$8 sps:$4 sm:$0xff]  }
 0x27e   : > { %v7559_v27 = vpop.f32.mrf.mxu1  ;;  %v12642_v30 = vadd.f32 %v7557_v44, %v7507_v54  ;;  %7875 = vmatpush1.bf16.msra.mxu0 %v10781_v37  ;;  %v10846_v9 = vld [vmem:[%s11622_s25 + $0x13a4] ss:$8 sps:$4 sm:$0xff]   ;;  %v10849_v37 = vld [vmem:[%s11622_s25 + $0x1294] ss:$8 sps:$4 sm:$0xff]   ;;  %v10856_v34 = vld [vmem:[%s11622_s25 + $0x1380] ss:$8 sps:$4 sm:$0xff]   ;;  %v8704_v54 = vcombine.low %v12613_v5, %v12618_v1 }
 0x27f   : > { %7926 = vmatpush1.bf16.msra.mxu1 %v10784_v13  ;;  %7876 = vmatprep.subr.bf16.mxu0 %v10789_v23  ;;  %v7509_v35 = vpop.f32.mrf.mxu0  ;;  %v10852_v13 = vld [vmem:[%s11622_s25 + $0x1394] ss:$8 sps:$4 sm:$0xff]   ;;  %v10855_v33 = vld [vmem:[%s11622_s25 + $0x1284] ss:$8 sps:$4 sm:$0xff]  }
 0x280   : > { %7927 = vmatprep.subr.bf16.mxu1 %v10792_v24  ;;  %v7560_v42 = vpop.f32.mrf.mxu1  ;;  %v10858_v17 = vld [vmem:[%s11622_s25 + $0x1384] ss:$8 sps:$4 sm:$0xff]   ;;  %v10861_v44 = vld [vmem:[%s11622_s25 + $0x1474] ss:$8 sps:$4 sm:$0xff]   ;;  %v8702_v24 = vcombine.low %v12598_v59, %v12608_v15 }
 0x281   : > { %v10864_v23 = vld [vmem:[%s11622_s25 + $0x1574] ss:$8 sps:$4 sm:$0xff]   ;;  %v10867_v59 = vld [vmem:[%s11622_s25 + $0x1464] ss:$8 sps:$4 sm:$0xff]   ;;  %v10865_v42 = vld [vmem:[%s11622_s25 + $0x1460] ss:$8 sps:$4 sm:$0xff]  }
 0x282   : > { %7877 = vmatpush1.bf16.msra.mxu0 %v10787_v52  ;;  %v248_v40 = vld [vmem:[%s13420_s0 + $0x290] sm:$0xff]  ;;  %v249_v27 = vld [vmem:[%s13420_s0 + $0x298] sm:$0xff]  ;;  %v10870_v15 = vld [vmem:[%s11622_s25 + $0x1564] ss:$8 sps:$4 sm:$0xff]  }
 0x283   : > { %7928 = vmatpush1.bf16.msra.mxu1 %v10790_v39  ;;  %7878 = vmatprep.subr.bf16.mxu0 %v10795_v45  ;;  %v10859_v52 = vld [vmem:[%s11622_s25 + $0x1470] ss:$8 sps:$4 sm:$0xff]   ;;  %v8767_v5 = vcombine.high %v248_v40, %v248_v40  ;;  %v8769_v1 = vcombine.high %v249_v27, %v249_v27 }
 0x284   : > { %7929 = vmatprep.subr.bf16.mxu1 %v10798_v31  ;;  %v10862_v39 = vld [vmem:[%s11622_s25 + $0x1570] ss:$8 sps:$4 sm:$0xff]  }
 0x286   : > { %7879 = vmatpush1.bf16.msra.mxu0 %v10793_v28  ;;  %v10868_v28 = vld [vmem:[%s11622_s25 + $0x1560] ss:$8 sps:$4 sm:$0xff]  }
 0x287   : > { %7930 = vmatpush1.bf16.msra.mxu1 %v10796_v29  ;;  %7880 = vmatprep.subr.bf16.mxu0 %v10801_v6 }
 0x288   : > { %7931 = vmatprep.subr.bf16.mxu1 %v10804_v8  ;;  %v10875_v8 = vld [vmem:[%s11622_s25 + $0x1454] ss:$8 sps:$4 sm:$0xff]  }
 0x28a   : > { %7881 = vmatpush1.bf16.msra.mxu0 %v10799_v7  ;;  %v10878_v7 = vld [vmem:[%s11622_s25 + $0x1554] ss:$8 sps:$4 sm:$0xff]  }
 0x28b   : > { %7932 = vmatpush1.bf16.msra.mxu1 %v10802_v41  ;;  %7882 = vmatprep.subr.bf16.mxu0 %v10807_v55 }
 0x28c   : > { %7933 = vmatprep.subr.bf16.mxu1 %v10810_v61 }
 0x28e   : > { %7883 = vmatpush1.bf16.msra.mxu0 %v10805_v53 }
 0x28f   : > { %7934 = vmatpush1.bf16.msra.mxu1 %v10808_v11  ;;  %7884 = vmatprep.subr.bf16.mxu0 %v10813_v47  ;;  %v8766_v11 = vcombine.low %v248_v40, %v248_v40  ;;  %v8768_v47 = vcombine.low %v249_v27, %v249_v27  ;;  %v10899_v40 = vld [vmem:[%s11622_s25 + $0x1410] ss:$8 sps:$4 sm:$0xff]  }
 0x290   : > { %7935 = vmatprep.subr.bf16.mxu1 %v10816_v48  ;;  %v12722_v48 = vld [vmem:[%s13420_s0 + $0x1a0] sm:$0xff]  ;;  %v10902_v27 = vld [vmem:[%s11622_s25 + $0x1510] ss:$8 sps:$4 sm:$0xff]  }
 0x292   : > { %7885 = vmatpush2.bf16.msra.mxu0 %v10811_v36  ;;  %v12732_v36 = vld [vmem:[%s13420_s0 + $0x1a8] sm:$0xff] }
 0x293   : > { %7936 = vmatpush2.bf16.msra.mxu1 %v10814_v38  ;;  %7886 = vmatprep.subr.bf16.mxu0 %v10819_v43 }
 0x294   : > { %7937 = vmatprep.subr.bf16.mxu1 %v10822_v56  ;;  %v10873_v56 = vld [vmem:[%s11622_s25 + $0x1450] ss:$8 sps:$4 sm:$0xff]  }
 0x296   : > { %7887 = vmatpush2.bf16.msra.mxu0 %v10817_v49  ;;  %v10876_v49 = vld [vmem:[%s11622_s25 + $0x1550] ss:$8 sps:$4 sm:$0xff]  }
 0x297   : > { %7938 = vmatpush2.bf16.msra.mxu1 %v10820_v50  ;;  %7888 = vmatprep.subr.bf16.mxu0 %v10825_v51 }
 0x298   : > { %7939 = vmatprep.subr.bf16.mxu1 %v10828_v58  ;;  %v10883_v58 = vld [vmem:[%s11622_s25 + $0x1444] ss:$8 sps:$4 sm:$0xff]  }
 0x29a   : > { %7889 = vmatpush2.bf16.msra.mxu0 %v10823_v10  ;;  %v10886_v10 = vld [vmem:[%s11622_s25 + $0x1544] ss:$8 sps:$4 sm:$0xff]  }
 0x29b   : > { %7940 = vmatpush2.bf16.msra.mxu1 %v10826_v62  ;;  %7890 = vmatprep.subr.bf16.mxu0 %v10831_v12 }
 0x29c   : > { %7941 = vmatprep.subr.bf16.mxu1 %v10834_v25 }
 0x29e   : > { %7891 = vmatpush2.bf16.msra.mxu0 %v10829_v26 }
 0x29f   : > { %7942 = vmatpush2.bf16.msra.mxu1 %v10832_v32  ;;  %7892 = vmatprep.subr.bf16.mxu0 %v10837_v19 }
 0x2a0   : > { %7943 = vmatprep.subr.bf16.mxu1 %v10840_v63 }
 0x2a2   : > { %7893 = vmatpush2.bf16.msra.mxu0 %v10835_v3  ;;  %v10881_v3 = vld [vmem:[%s11622_s25 + $0x1440] ss:$8 sps:$4 sm:$0xff]  }
 0x2a3   : > { %7944 = vmatpush2.bf16.msra.mxu1 %v10838_v14  ;;  %7894 = vmatprep.subr.bf16.mxu0 %v10843_v4 }
 0x2a4   : > { %7945 = vmatprep.subr.bf16.mxu1 %v10846_v9  ;;  %v10889_v9 = vld [vmem:[%s11622_s25 + $0x1434] ss:$8 sps:$4 sm:$0xff]  }
 0x2a6   : > { %7895 = vmatpush2.bf16.msra.mxu0 %v10841_v18  ;;  %v10892_v18 = vld [vmem:[%s11622_s25 + $0x1534] ss:$8 sps:$4 sm:$0xff]  }
 0x2a7   : > { %7946 = vmatpush2.bf16.msra.mxu1 %v10844_v20  ;;  %7896 = vmatprep.subr.bf16.mxu0 %v10849_v37 }
 0x2a8   : > { %7947 = vmatprep.subr.bf16.mxu1 %v10852_v13 }
 0x2aa   : > { %7897 = vmatpush2.bf16.msra.mxu0 %v10847_v46 }
 0x2ab   : > { %7948 = vmatpush2.bf16.msra.mxu1 %v10850_v0  ;;  %7898 = vmatprep.subr.bf16.mxu0 %v10855_v33  ;;  %v10887_v0 = vld [vmem:[%s11622_s25 + $0x1430] ss:$8 sps:$4 sm:$0xff]  }
 0x2ac   : > { %7949 = vmatprep.subr.bf16.mxu1 %v10858_v17  ;;  %v10890_v33 = vld [vmem:[%s11622_s25 + $0x1530] ss:$8 sps:$4 sm:$0xff]   ;;  %v10898_v17 = vld [vmem:[%s11622_s25 + $0x1524] ss:$8 sps:$4 sm:$0xff]  }
 0x2ae   : > { %7899 = vmatpush2.bf16.msra.mxu0 %v10853_v22 }
 0x2af   : > { %7950 = vmatpush2.bf16.msra.mxu1 %v10856_v34  ;;  %7970 = vmatprep.subr.bf16.mxu0 %v10861_v44  ;;  %v10893_v44 = vld [vmem:[%s11622_s25 + $0x1420] ss:$8 sps:$4 sm:$0xff]  }
 0x2b0   : > { %8021 = vmatprep.subr.bf16.mxu1 %v10864_v23  ;;  %v10896_v23 = vld [vmem:[%s11622_s25 + $0x1520] ss:$8 sps:$4 sm:$0xff]  }
 0x2b1   : > { %v7596_v45 = vpop.f32.mrf.mxu0  ;;  %7901 = vmatmul.mubr.bf16.vlgmr.msra.gmra.mxu0 %v8702_v24  ;;  %v10901_v24 = vld [vmem:[%s11622_s25 + $0x1414] ss:$8 sps:$4 sm:$0xff]  }
 0x2b2   : > { %v7647_v31 = vpop.f32.mrf.mxu1  ;;  %7952 = vmatmul.mubr.bf16.vlgmr.msra.gmra.mxu1 %v8704_v54  ;;  %v7597_v35 = vadd.f32 %v7596_v45, %v12600_v57  ;;  %7971 = vmatpush1.bf16.msra.mxu0 %v10859_v52  ;;  %v12717_v57 = vld [vmem:[%s13420_s0 + $0xa0] sm:$0xff]  ;;  %v10904_v54 = vld [vmem:[%s11622_s25 + $0x1514] ss:$8 sps:$4 sm:$0xff]   ;;  %v10911_v45 = vld [vmem:[%s11622_s25 + $0x14f0] ss:$8 sps:$4 sm:$0xff]  }
 0x2b3   : > { %8022 = vmatpush1.bf16.msra.mxu1 %v10862_v39  ;;  %v7598_v29 = vpop.f32.mrf.mxu0  ;;  %7972 = vmatprep.subr.bf16.mxu0 %v10867_v59  ;;  %v8707_v25 = vcombine.high %v12717_v57, %v12722_v48  ;;  %v10907_v52 = vld [vmem:[%s11622_s25 + $0x1404] ss:$8 sps:$4 sm:$0xff]   ;;  %v10905_v59 = vld [vmem:[%s11622_s25 + $0x1400] ss:$8 sps:$4 sm:$0xff]  }
 0x2b4   : > { %v7649_v6 = vpop.f32.mrf.mxu1  ;;  %8023 = vmatprep.subr.bf16.mxu1 %v10870_v15  ;;  %v12711_v41 = vadd.f32 %v7647_v31, %v7597_v35  ;;  %v7599_v55 = vadd.f32 %v7598_v29, %v12620_v2  ;;  %7910 = vmatprep.mubr.bf16.mxu0 %v8767_v5  ;;  %v12727_v2 = vld [vmem:[%s13420_s0 + $0xa8] sm:$0xff]  ;;  %v10913_v5 = vld [vmem:[%s11622_s25 + $0x14f4] ss:$8 sps:$4 sm:$0xff]   ;;  %v10914_v31 = vld [vmem:[%s11622_s25 + $0x15f0] ss:$8 sps:$4 sm:$0xff]  }
 0x2b5   : > { %7961 = vmatprep.mubr.bf16.mxu1 %v8769_v1  ;;  %v7600_v61 = vpop.f32.mrf.mxu0  ;;  %v10910_v39 = vld [vmem:[%s11622_s25 + $0x1504] ss:$8 sps:$4 sm:$0xff]   ;;  %v10908_v15 = vld [vmem:[%s11622_s25 + $0x1500] ss:$8 sps:$4 sm:$0xff]   ;;  %v10916_v1 = vld [vmem:[%s11622_s25 + $0x15f4] ss:$8 sps:$4 sm:$0xff]  }
 0x2b6   : > { %v7651_v53 = vpop.f32.mrf.mxu1  ;;  %v12734_v38 = vadd.f32 %v7649_v6, %v7599_v55  ;;  %v7601_v43 = vadd.f32 %v7600_v61, %v12625_v16  ;;  %7973 = vmatpush1.bf16.msra.mxu0 %v10865_v42  ;;  %v8709_v16 = vcombine.high %v12727_v2, %v12732_v36  ;;  %v10919_v35 = vld [vmem:[%s11622_s25 + $0x14e4] ss:$8 sps:$4 sm:$0xff]   ;;  %v10920_v29 = vld [vmem:[%s11622_s25 + $0x15e0] ss:$8 sps:$4 sm:$0xff]   ;;  %v10925_v6 = vld [vmem:[%s11622_s25 + $0x14d4] ss:$8 sps:$4 sm:$0xff]  }
 0x2b7   : > { %8024 = vmatpush1.bf16.msra.mxu1 %v10868_v28  ;;  %v7602_v50 = vpop.f32.mrf.mxu0  ;;  %7974 = vmatprep.subr.bf16.mxu0 %v10875_v8  ;;  %v10922_v42 = vld [vmem:[%s11622_s25 + $0x15e4] ss:$8 sps:$4 sm:$0xff]   ;;  %v10917_v28 = vld [vmem:[%s11622_s25 + $0x14e0] ss:$8 sps:$4 sm:$0xff]   ;;  %v10928_v8 = vld [vmem:[%s11622_s25 + $0x15d4] ss:$8 sps:$4 sm:$0xff]  }
 0x2b8   : > { %v7653_v51 = vpop.f32.mrf.mxu1  ;;  %8025 = vmatprep.subr.bf16.mxu1 %v10878_v7  ;;  %v12741_v62 = vadd.f32 %v7651_v53, %v7601_v43  ;;  %v7603_v12 = vadd.f32 %v7602_v50, %v12634_v21  ;;  %v10884_v21 = vld [vmem:[%s11622_s25 + $0x1540] ss:$8 sps:$4 sm:$0xff]   ;;  %v10923_v7 = vld [vmem:[%s11622_s25 + $0x14d0] ss:$8 sps:$4 sm:$0xff]   ;;  %v10931_v61 = vld [vmem:[%s11622_s25 + $0x14c4] ss:$8 sps:$4 sm:$0xff]  }
 0x2b9   : > { %v7606_v26 = vpop.f32.mrf.mxu0  ;;  %7911 = vmatmul.mubr.bf16.gmra.mxu0 %v8766_v11  ;;  %v10926_v55 = vld [vmem:[%s11622_s25 + $0x15d0] ss:$8 sps:$4 sm:$0xff]   ;;  %v10934_v53 = vld [vmem:[%s11622_s25 + $0x15c4] ss:$8 sps:$4 sm:$0xff]   ;;  %v10929_v11 = vld [vmem:[%s11622_s25 + $0x14c0] ss:$8 sps:$4 sm:$0xff]  }
 0x2ba   : > { %v7657_v32 = vpop.f32.mrf.mxu1  ;;  %7962 = vmatmul.mubr.bf16.gmra.mxu1 %v8768_v47  ;;  %v12748_v19 = vadd.f32 %v7653_v51, %v7603_v12  ;;  %v7607_v63 = vadd.f32 %v7606_v26, %v12640_v60  ;;  %7975 = vmatpush1.bf16.msra.mxu0 %v10873_v56  ;;  %v10932_v47 = vld [vmem:[%s11622_s25 + $0x15c0] ss:$8 sps:$4 sm:$0xff]   ;;  %v10937_v43 = vld [vmem:[%s11622_s25 + $0x14b4] ss:$8 sps:$4 sm:$0xff]   ;;  %v10938_v50 = vld [vmem:[%s11622_s25 + $0x15b0] ss:$8 sps:$4 sm:$0xff]  }
 0x2bb   : > { %8026 = vmatpush1.bf16.msra.mxu1 %v10876_v49  ;;  %v7608_v14 = vpop.f32.mrf.mxu0  ;;  %7976 = vmatprep.subr.bf16.mxu0 %v10883_v58  ;;  %v10940_v56 = vld [vmem:[%s11622_s25 + $0x15b4] ss:$8 sps:$4 sm:$0xff]   ;;  %v10935_v49 = vld [vmem:[%s11622_s25 + $0x14b0] ss:$8 sps:$4 sm:$0xff]   ;;  %v10943_v51 = vld [vmem:[%s11622_s25 + $0x14a4] ss:$8 sps:$4 sm:$0xff]  }
 0x2bc   : > { %v7659_v4 = vpop.f32.mrf.mxu1  ;;  %8027 = vmatprep.subr.bf16.mxu1 %v10886_v10  ;;  %v7609_v20 = vadd.f32 %v7608_v14, %v12642_v30  ;;  %v12756_v37 = vadd.f32 %v7657_v32, %v7607_v63  ;;  %8002 = vmatprep.mubr.bf16.mxu0 %v8707_v25  ;;  %v10895_v30 = vld [vmem:[%s11622_s25 + $0x1424] ss:$8 sps:$4 sm:$0xff]   ;;  %v10941_v10 = vld [vmem:[%s11622_s25 + $0x14a0] ss:$8 sps:$4 sm:$0xff]   ;;  %v10949_v25 = vld [vmem:[%s11622_s25 + $0x1494] ss:$8 sps:$4 sm:$0xff]  }
 0x2bd   : > { %8053 = vmatprep.mubr.bf16.mxu1 %v8709_v16  ;;  %v7610_v60 = vpop.f32.mrf.mxu0  ;;  %v10946_v58 = vld [vmem:[%s11622_s25 + $0x15a4] ss:$8 sps:$4 sm:$0xff]   ;;  %v10944_v12 = vld [vmem:[%s11622_s25 + $0x15a0] ss:$8 sps:$4 sm:$0xff]   ;;  %v10952_v16 = vld [vmem:[%s11622_s25 + $0x1594] ss:$8 sps:$4 sm:$0xff]  }
 0x2be   : > { %v7661_v13 = vpop.f32.mrf.mxu1  ;;  %v12758_v46 = vadd.f32 %v7659_v4, %v7609_v20  ;;  %7977 = vmatpush1.bf16.msra.mxu0 %v10881_v3  ;;  %v10947_v26 = vld [vmem:[%s11622_s25 + $0x1490] ss:$8 sps:$4 sm:$0xff]   ;;  %v10955_v63 = vld [vmem:[%s11622_s25 + $0x1484] ss:$8 sps:$4 sm:$0xff]   ;;  %v10956_v14 = vld [vmem:[%s11622_s25 + $0x1580] ss:$8 sps:$4 sm:$0xff]   ;;  %v8708_v20 = vcombine.low %v12727_v2, %v12732_v36 }
 0x2bf   : > { %8028 = vmatpush1.bf16.msra.mxu1 %v10884_v21  ;;  %7978 = vmatprep.subr.bf16.mxu0 %v10889_v9  ;;  %v7611_v22 = vpop.f32.mrf.mxu0  ;;  %v10950_v32 = vld [vmem:[%s11622_s25 + $0x1590] ss:$8 sps:$4 sm:$0xff]   ;;  %v10958_v3 = vld [vmem:[%s11622_s25 + $0x1584] ss:$8 sps:$4 sm:$0xff]   ;;  %v10953_v21 = vld [vmem:[%s11622_s25 + $0x1480] ss:$8 sps:$4 sm:$0xff]  }
 0x2c0   : > { %8029 = vmatprep.subr.bf16.mxu1 %v10892_v18  ;;  %v7662_v34 = vpop.f32.mrf.mxu1  ;;  %v10961_v4 = vld [vmem:[%s11622_s25 + $0x1674] ss:$8 sps:$4 sm:$0xff]   ;;  %v8706_v18 = vcombine.low %v12717_v57, %v12722_v48  ;;  %v250_v60 = vld [vmem:[%s13420_s0 + $0x2a0] sm:$0xff]  ;;  %v251_v13 = vld [vmem:[%s13420_s0 + $0x2a8] sm:$0xff] }
 0x2c1   : > { %v10964_v9 = vld [vmem:[%s11622_s25 + $0x1774] ss:$8 sps:$4 sm:$0xff]   ;;  %v10967_v57 = vld [vmem:[%s11622_s25 + $0x1664] ss:$8 sps:$4 sm:$0xff]   ;;  %v8771_v2 = vcombine.high %v250_v60, %v250_v60  ;;  %v8773_v36 = vcombine.high %v251_v13, %v251_v13  ;;  %v10965_v34 = vld [vmem:[%s11622_s25 + $0x1660] ss:$8 sps:$4 sm:$0xff]  }
 0x2c2   : > { %7979 = vmatpush1.bf16.msra.mxu0 %v10887_v0  ;;  %v10959_v0 = vld [vmem:[%s11622_s25 + $0x1670] ss:$8 sps:$4 sm:$0xff]   ;;  %v10970_v48 = vld [vmem:[%s11622_s25 + $0x1764] ss:$8 sps:$4 sm:$0xff]  }
 0x2c3   : > { %8030 = vmatpush1.bf16.msra.mxu1 %v10890_v33  ;;  %7980 = vmatprep.subr.bf16.mxu0 %v10895_v30  ;;  %v10962_v33 = vld [vmem:[%s11622_s25 + $0x1770] ss:$8 sps:$4 sm:$0xff]  }
 0x2c4   : > { %8031 = vmatprep.subr.bf16.mxu1 %v10898_v17 }
 0x2c6   : > { %7981 = vmatpush1.bf16.msra.mxu0 %v10893_v44  ;;  %v10968_v44 = vld [vmem:[%s11622_s25 + $0x1760] ss:$8 sps:$4 sm:$0xff]  }
 0x2c7   : > { %8032 = vmatpush1.bf16.msra.mxu1 %v10896_v23  ;;  %7982 = vmatprep.subr.bf16.mxu0 %v10901_v24 }
 0x2c8   : > { %8033 = vmatprep.subr.bf16.mxu1 %v10904_v54  ;;  %v10975_v54 = vld [vmem:[%s11622_s25 + $0x1654] ss:$8 sps:$4 sm:$0xff]  }
 0x2ca   : > { %7983 = vmatpush1.bf16.msra.mxu0 %v10899_v40  ;;  %v10978_v40 = vld [vmem:[%s11622_s25 + $0x1754] ss:$8 sps:$4 sm:$0xff]  }
 0x2cb   : > { %8034 = vmatpush1.bf16.msra.mxu1 %v10902_v27  ;;  %7984 = vmatprep.subr.bf16.mxu0 %v10907_v52 }
 0x2cc   : > { %8035 = vmatprep.subr.bf16.mxu1 %v10910_v39 }
 0x2ce   : > { %7985 = vmatpush1.bf16.msra.mxu0 %v10905_v59 }
 0x2cf   : > { %8036 = vmatpush1.bf16.msra.mxu1 %v10908_v15  ;;  %7986 = vmatprep.subr.bf16.mxu0 %v10913_v5  ;;  %v8770_v15 = vcombine.low %v250_v60, %v250_v60  ;;  %v8772_v5 = vcombine.low %v251_v13, %v251_v13  ;;  %v10999_v60 = vld [vmem:[%s11622_s25 + $0x1610] ss:$8 sps:$4 sm:$0xff]  }
 0x2d0   : > { %8037 = vmatprep.subr.bf16.mxu1 %v10916_v1  ;;  %v12838_v1 = vld [vmem:[%s13420_s0 + $0x1b0] sm:$0xff] }
 0x2d1   : > { %v11002_v13 = vld [vmem:[%s11622_s25 + $0x1710] ss:$8 sps:$4 sm:$0xff]  }
 0x2d2   : > { %7987 = vmatpush2.bf16.msra.mxu0 %v10911_v45  ;;  %v12848_v45 = vld [vmem:[%s13420_s0 + $0x1b8] sm:$0xff] }
 0x2d3   : > { %8038 = vmatpush2.bf16.msra.mxu1 %v10914_v31  ;;  %7988 = vmatprep.subr.bf16.mxu0 %v10919_v35 }
 0x2d4   : > { %8039 = vmatprep.subr.bf16.mxu1 %v10922_v42  ;;  %v10973_v42 = vld [vmem:[%s11622_s25 + $0x1650] ss:$8 sps:$4 sm:$0xff]  }
 0x2d6   : > { %7989 = vmatpush2.bf16.msra.mxu0 %v10917_v28  ;;  %v10976_v28 = vld [vmem:[%s11622_s25 + $0x1750] ss:$8 sps:$4 sm:$0xff]  }
 0x2d7   : > { %8040 = vmatpush2.bf16.msra.mxu1 %v10920_v29  ;;  %7990 = vmatprep.subr.bf16.mxu0 %v10925_v6 }
 0x2d8   : > { %8041 = vmatprep.subr.bf16.mxu1 %v10928_v8  ;;  %v10983_v8 = vld [vmem:[%s11622_s25 + $0x1644] ss:$8 sps:$4 sm:$0xff]  }
 0x2da   : > { %7991 = vmatpush2.bf16.msra.mxu0 %v10923_v7  ;;  %v10986_v7 = vld [vmem:[%s11622_s25 + $0x1744] ss:$8 sps:$4 sm:$0xff]  }
 0x2db   : > { %8042 = vmatpush2.bf16.msra.mxu1 %v10926_v55  ;;  %7992 = vmatprep.subr.bf16.mxu0 %v10931_v61 }
 0x2dc   : > { %8043 = vmatprep.subr.bf16.mxu1 %v10934_v53 }
 0x2de   : > { %7993 = vmatpush2.bf16.msra.mxu0 %v10929_v11 }
 0x2df   : > { %8044 = vmatpush2.bf16.msra.mxu1 %v10932_v47  ;;  %7994 = vmatprep.subr.bf16.mxu0 %v10937_v43 }
 0x2e0   : > { %8045 = vmatprep.subr.bf16.mxu1 %v10940_v56 }
 0x2e2   : > { %7995 = vmatpush2.bf16.msra.mxu0 %v10935_v49  ;;  %v10981_v49 = vld [vmem:[%s11622_s25 + $0x1640] ss:$8 sps:$4 sm:$0xff]  }
 0x2e3   : > { %8046 = vmatpush2.bf16.msra.mxu1 %v10938_v50  ;;  %7996 = vmatprep.subr.bf16.mxu0 %v10943_v51 }
 0x2e4   : > { %8047 = vmatprep.subr.bf16.mxu1 %v10946_v58  ;;  %v10989_v58 = vld [vmem:[%s11622_s25 + $0x1634] ss:$8 sps:$4 sm:$0xff]  }
 0x2e6   : > { %7997 = vmatpush2.bf16.msra.mxu0 %v10941_v10  ;;  %v10992_v10 = vld [vmem:[%s11622_s25 + $0x1734] ss:$8 sps:$4 sm:$0xff]  }
 0x2e7   : > { %8048 = vmatpush2.bf16.msra.mxu1 %v10944_v12  ;;  %7998 = vmatprep.subr.bf16.mxu0 %v10949_v25 }
 0x2e8   : > { %8049 = vmatprep.subr.bf16.mxu1 %v10952_v16 }
 0x2ea   : > { %7999 = vmatpush2.bf16.msra.mxu0 %v10947_v26 }
 0x2eb   : > { %8050 = vmatpush2.bf16.msra.mxu1 %v10950_v32  ;;  %8000 = vmatprep.subr.bf16.mxu0 %v10955_v63  ;;  %v10987_v32 = vld [vmem:[%s11622_s25 + $0x1630] ss:$8 sps:$4 sm:$0xff]  }
 0x2ec   : > { %8051 = vmatprep.subr.bf16.mxu1 %v10958_v3  ;;  %v10990_v63 = vld [vmem:[%s11622_s25 + $0x1730] ss:$8 sps:$4 sm:$0xff]   ;;  %v10998_v3 = vld [vmem:[%s11622_s25 + $0x1724] ss:$8 sps:$4 sm:$0xff]  }
 0x2ee   : > { %8001 = vmatpush2.bf16.msra.mxu0 %v10953_v21 }
 0x2ef   : > { %8052 = vmatpush2.bf16.msra.mxu1 %v10956_v14  ;;  %8072 = vmatprep.subr.bf16.mxu0 %v10961_v4  ;;  %v10993_v4 = vld [vmem:[%s11622_s25 + $0x1620] ss:$8 sps:$4 sm:$0xff]  }
 0x2f0   : > { %8123 = vmatprep.subr.bf16.mxu1 %v10964_v9  ;;  %v10996_v9 = vld [vmem:[%s11622_s25 + $0x1720] ss:$8 sps:$4 sm:$0xff]  }
 0x2f1   : > { %v7698_v30 = vpop.f32.mrf.mxu0  ;;  %8003 = vmatmul.mubr.bf16.vlgmr.msra.gmra.mxu0 %v8706_v18  ;;  %v11001_v18 = vld [vmem:[%s11622_s25 + $0x1614] ss:$8 sps:$4 sm:$0xff]  }
 0x2f2   : > { %v7749_v17 = vpop.f32.mrf.mxu1  ;;  %8054 = vmatmul.mubr.bf16.vlgmr.msra.gmra.mxu1 %v8708_v20  ;;  %v7699_v22 = vadd.f32 %v7698_v30, %v12711_v41  ;;  %8073 = vmatpush1.bf16.msra.mxu0 %v10959_v0  ;;  %v12833_v41 = vld [vmem:[%s13420_s0 + $0xb0] sm:$0xff]  ;;  %v11007_v0 = vld [vmem:[%s11622_s25 + $0x1604] ss:$8 sps:$4 sm:$0xff]  }
 0x2f3   : > { %8124 = vmatpush1.bf16.msra.mxu1 %v10962_v33  ;;  %v7700_v23 = vpop.f32.mrf.mxu0  ;;  %8074 = vmatprep.subr.bf16.mxu0 %v10967_v57  ;;  %v8711_v53 = vcombine.high %v12833_v41, %v12838_v1  ;;  %v11004_v20 = vld [vmem:[%s11622_s25 + $0x1714] ss:$8 sps:$4 sm:$0xff]   ;;  %v11010_v33 = vld [vmem:[%s11622_s25 + $0x1704] ss:$8 sps:$4 sm:$0xff]   ;;  %v11005_v57 = vld [vmem:[%s11622_s25 + $0x1600] ss:$8 sps:$4 sm:$0xff]  }
 0x2f4   : > { %v7751_v24 = vpop.f32.mrf.mxu1  ;;  %8125 = vmatprep.subr.bf16.mxu1 %v10970_v48  ;;  %v12827_v27 = vadd.f32 %v7749_v17, %v7699_v22  ;;  %v7701_v52 = vadd.f32 %v7700_v23, %v12734_v38  ;;  %8012 = vmatprep.mubr.bf16.mxu0 %v8771_v2  ;;  %v12843_v38 = vld [vmem:[%s13420_s0 + $0xb8] sm:$0xff]  ;;  %v11008_v48 = vld [vmem:[%s11622_s25 + $0x1700] ss:$8 sps:$4 sm:$0xff]   ;;  %v11019_v22 = vld [vmem:[%s11622_s25 + $0x16e4] ss:$8 sps:$4 sm:$0xff]  }
 0x2f5   : > { %8063 = vmatprep.mubr.bf16.mxu1 %v8773_v36  ;;  %v7702_v39 = vpop.f32.mrf.mxu0  ;;  %v11013_v2 = vld [vmem:[%s11622_s25 + $0x16f4] ss:$8 sps:$4 sm:$0xff]   ;;  %v11011_v30 = vld [vmem:[%s11622_s25 + $0x16f0] ss:$8 sps:$4 sm:$0xff]   ;;  %v11020_v23 = vld [vmem:[%s11622_s25 + $0x17e0] ss:$8 sps:$4 sm:$0xff]  }
 0x2f6   : > { %v7753_v59 = vpop.f32.mrf.mxu1  ;;  %v12850_v31 = vadd.f32 %v7751_v24, %v7701_v52  ;;  %v7703_v35 = vadd.f32 %v7702_v39, %v12741_v62  ;;  %8075 = vmatpush1.bf16.msra.mxu0 %v10965_v34  ;;  %v8713_v62 = vcombine.high %v12843_v38, %v12848_v45  ;;  %v11016_v36 = vld [vmem:[%s11622_s25 + $0x17f4] ss:$8 sps:$4 sm:$0xff]   ;;  %v11014_v17 = vld [vmem:[%s11622_s25 + $0x17f0] ss:$8 sps:$4 sm:$0xff]   ;;  %v11022_v34 = vld [vmem:[%s11622_s25 + $0x17e4] ss:$8 sps:$4 sm:$0xff]  }
 0x2f7   : > { %8126 = vmatpush1.bf16.msra.mxu1 %v10968_v44  ;;  %v7704_v29 = vpop.f32.mrf.mxu0  ;;  %8076 = vmatprep.subr.bf16.mxu0 %v10975_v54  ;;  %v11017_v44 = vld [vmem:[%s11622_s25 + $0x16e0] ss:$8 sps:$4 sm:$0xff]   ;;  %v11025_v24 = vld [vmem:[%s11622_s25 + $0x16d4] ss:$8 sps:$4 sm:$0xff]   ;;  %v11026_v52 = vld [vmem:[%s11622_s25 + $0x17d0] ss:$8 sps:$4 sm:$0xff]  }
 0x2f8   : > { %v7755_v6 = vpop.f32.mrf.mxu1  ;;  %8127 = vmatprep.subr.bf16.mxu1 %v10978_v40  ;;  %v12857_v55 = vadd.f32 %v7753_v59, %v7703_v35  ;;  %v7705_v61 = vadd.f32 %v7704_v29, %v12748_v19  ;;  %v10984_v19 = vld [vmem:[%s11622_s25 + $0x1740] ss:$8 sps:$4 sm:$0xff]   ;;  %v11028_v54 = vld [vmem:[%s11622_s25 + $0x17d4] ss:$8 sps:$4 sm:$0xff]   ;;  %v11023_v40 = vld [vmem:[%s11622_s25 + $0x16d0] ss:$8 sps:$4 sm:$0xff]  }
 0x2f9   : > { %v7708_v11 = vpop.f32.mrf.mxu0  ;;  %8013 = vmatmul.mubr.bf16.gmra.mxu0 %v8770_v15  ;;  %v11031_v39 = vld [vmem:[%s11622_s25 + $0x16c4] ss:$8 sps:$4 sm:$0xff]   ;;  %v11029_v15 = vld [vmem:[%s11622_s25 + $0x16c0] ss:$8 sps:$4 sm:$0xff]   ;;  %v11037_v35 = vld [vmem:[%s11622_s25 + $0x16b4] ss:$8 sps:$4 sm:$0xff]  }
 0x2fa   : > { %v7759_v47 = vpop.f32.mrf.mxu1  ;;  %8064 = vmatmul.mubr.bf16.gmra.mxu1 %v8772_v5  ;;  %v12864_v43 = vadd.f32 %v7755_v6, %v7705_v61  ;;  %v7709_v56 = vadd.f32 %v7708_v11, %v12756_v37  ;;  %8077 = vmatpush1.bf16.msra.mxu0 %v10973_v42  ;;  %v11034_v59 = vld [vmem:[%s11622_s25 + $0x17c4] ss:$8 sps:$4 sm:$0xff]   ;;  %v11032_v5 = vld [vmem:[%s11622_s25 + $0x17c0] ss:$8 sps:$4 sm:$0xff]   ;;  %v11040_v42 = vld [vmem:[%s11622_s25 + $0x17b4] ss:$8 sps:$4 sm:$0xff]  }
 0x2fb   : > { %8128 = vmatpush1.bf16.msra.mxu1 %v10976_v28  ;;  %v7710_v50 = vpop.f32.mrf.mxu0  ;;  %8078 = vmatprep.subr.bf16.mxu0 %v10983_v8  ;;  %v11035_v28 = vld [vmem:[%s11622_s25 + $0x16b0] ss:$8 sps:$4 sm:$0xff]   ;;  %v11043_v6 = vld [vmem:[%s11622_s25 + $0x16a4] ss:$8 sps:$4 sm:$0xff]   ;;  %v11044_v61 = vld [vmem:[%s11622_s25 + $0x17a0] ss:$8 sps:$4 sm:$0xff]  }
 0x2fc   : > { %v7761_v51 = vpop.f32.mrf.mxu1  ;;  %8129 = vmatprep.subr.bf16.mxu1 %v10986_v7  ;;  %v7711_v12 = vadd.f32 %v7710_v50, %v12758_v46  ;;  %v12872_v25 = vadd.f32 %v7759_v47, %v7709_v56  ;;  %8104 = vmatprep.mubr.bf16.mxu0 %v8711_v53  ;;  %v10995_v46 = vld [vmem:[%s11622_s25 + $0x1624] ss:$8 sps:$4 sm:$0xff]   ;;  %v11038_v29 = vld [vmem:[%s11622_s25 + $0x17b0] ss:$8 sps:$4 sm:$0xff]   ;;  %v11041_v7 = vld [vmem:[%s11622_s25 + $0x16a0] ss:$8 sps:$4 sm:$0xff]  }
 0x2fd   : > { %8155 = vmatprep.mubr.bf16.mxu1 %v8713_v62  ;;  %v7712_v37 = vpop.f32.mrf.mxu0  ;;  %v11046_v8 = vld [vmem:[%s11622_s25 + $0x17a4] ss:$8 sps:$4 sm:$0xff]   ;;  %v11049_v53 = vld [vmem:[%s11622_s25 + $0x1694] ss:$8 sps:$4 sm:$0xff]   ;;  %v11047_v11 = vld [vmem:[%s11622_s25 + $0x1690] ss:$8 sps:$4 sm:$0xff]  }
 0x2fe   : > { %v7763_v16 = vpop.f32.mrf.mxu1  ;;  %v12874_v26 = vadd.f32 %v7761_v51, %v7711_v12  ;;  %8079 = vmatpush1.bf16.msra.mxu0 %v10981_v49  ;;  %v11052_v62 = vld [vmem:[%s11622_s25 + $0x1794] ss:$8 sps:$4 sm:$0xff]   ;;  %v11050_v47 = vld [vmem:[%s11622_s25 + $0x1790] ss:$8 sps:$4 sm:$0xff]   ;;  %v11055_v56 = vld [vmem:[%s11622_s25 + $0x1684] ss:$8 sps:$4 sm:$0xff]   ;;  %v8712_v12 = vcombine.low %v12843_v38, %v12848_v45 }
 0x2ff   : > { %8130 = vmatpush1.bf16.msra.mxu1 %v10984_v19  ;;  %8080 = vmatprep.subr.bf16.mxu0 %v10989_v58  ;;  %v7713_v21 = vpop.f32.mrf.mxu0  ;;  %v11058_v49 = vld [vmem:[%s11622_s25 + $0x1784] ss:$8 sps:$4 sm:$0xff]   ;;  %v11053_v19 = vld [vmem:[%s11622_s25 + $0x1680] ss:$8 sps:$4 sm:$0xff]   ;;  %v11061_v51 = vld [vmem:[%s11622_s25 + $0x1874] ss:$8 sps:$4 sm:$0xff]  }
 0x300   : > { %8131 = vmatprep.subr.bf16.mxu1 %v10992_v10  ;;  %v7764_v14 = vpop.f32.mrf.mxu1  ;;  %v11056_v50 = vld [vmem:[%s11622_s25 + $0x1780] ss:$8 sps:$4 sm:$0xff]   ;;  %v11064_v58 = vld [vmem:[%s11622_s25 + $0x1974] ss:$8 sps:$4 sm:$0xff]   ;;  %v8710_v10 = vcombine.low %v12833_v41, %v12838_v1  ;;  %v11067_v41 = vld [vmem:[%s11622_s25 + $0x1864] ss:$8 sps:$4 sm:$0xff]  }
 0x301   : > { %v252_v37 = vld [vmem:[%s13420_s0 + $0x2b0] sm:$0xff]  ;;  %v253_v16 = vld [vmem:[%s13420_s0 + $0x2b8] sm:$0xff]  ;;  %v11070_v1 = vld [vmem:[%s11622_s25 + $0x1964] ss:$8 sps:$4 sm:$0xff]  }
 0x302   : > { %8081 = vmatpush1.bf16.msra.mxu0 %v10987_v32  ;;  %v11059_v32 = vld [vmem:[%s11622_s25 + $0x1870] ss:$8 sps:$4 sm:$0xff]   ;;  %v8775_v38 = vcombine.high %v252_v37, %v252_v37  ;;  %v8777_v45 = vcombine.high %v253_v16, %v253_v16  ;;  %v11065_v14 = vld [vmem:[%s11622_s25 + $0x1860] ss:$8 sps:$4 sm:$0xff]  }
 0x303   : > { %8132 = vmatpush1.bf16.msra.mxu1 %v10990_v63  ;;  %8082 = vmatprep.subr.bf16.mxu0 %v10995_v46  ;;  %v11062_v63 = vld [vmem:[%s11622_s25 + $0x1970] ss:$8 sps:$4 sm:$0xff]  }
 0x304   : > { %8133 = vmatprep.subr.bf16.mxu1 %v10998_v3 }
 0x306   : > { %8083 = vmatpush1.bf16.msra.mxu0 %v10993_v4  ;;  %v11068_v4 = vld [vmem:[%s11622_s25 + $0x1960] ss:$8 sps:$4 sm:$0xff]  }
 0x307   : > { %8134 = vmatpush1.bf16.msra.mxu1 %v10996_v9  ;;  %8084 = vmatprep.subr.bf16.mxu0 %v11001_v18 }
 0x308   : > { %8135 = vmatprep.subr.bf16.mxu1 %v11004_v20  ;;  %v11075_v20 = vld [vmem:[%s11622_s25 + $0x1854] ss:$8 sps:$4 sm:$0xff]  }
 0x30a   : > { %8085 = vmatpush1.bf16.msra.mxu0 %v10999_v60  ;;  %v11078_v60 = vld [vmem:[%s11622_s25 + $0x1954] ss:$8 sps:$4 sm:$0xff]  }
 0x30b   : > { %8136 = vmatpush1.bf16.msra.mxu1 %v11002_v13  ;;  %8086 = vmatprep.subr.bf16.mxu0 %v11007_v0 }
 0x30c   : > { %8137 = vmatprep.subr.bf16.mxu1 %v11010_v33 }
 0x30e   : > { %8087 = vmatpush1.bf16.msra.mxu0 %v11005_v57 }
 0x30f   : > { %8138 = vmatpush1.bf16.msra.mxu1 %v11008_v48  ;;  %8088 = vmatprep.subr.bf16.mxu0 %v11013_v2  ;;  %v8774_v48 = vcombine.low %v252_v37, %v252_v37  ;;  %v8776_v2 = vcombine.low %v253_v16, %v253_v16  ;;  %v11099_v37 = vld [vmem:[%s11622_s25 + $0x1810] ss:$8 sps:$4 sm:$0xff]  }
 0x310   : > { %8139 = vmatprep.subr.bf16.mxu1 %v11016_v36  ;;  %v12954_v36 = vld [vmem:[%s13420_s0 + $0x1c0] sm:$0xff]  ;;  %v11102_v16 = vld [vmem:[%s11622_s25 + $0x1910] ss:$8 sps:$4 sm:$0xff]  }
 0x312   : > { %8089 = vmatpush2.bf16.msra.mxu0 %v11011_v30  ;;  %v12964_v30 = vld [vmem:[%s13420_s0 + $0x1c8] sm:$0xff] }
 0x313   : > { %8140 = vmatpush2.bf16.msra.mxu1 %v11014_v17  ;;  %8090 = vmatprep.subr.bf16.mxu0 %v11019_v22 }
 0x314   : > { %8141 = vmatprep.subr.bf16.mxu1 %v11022_v34  ;;  %v11073_v34 = vld [vmem:[%s11622_s25 + $0x1850] ss:$8 sps:$4 sm:$0xff]  }
 0x316   : > { %8091 = vmatpush2.bf16.msra.mxu0 %v11017_v44  ;;  %v11076_v44 = vld [vmem:[%s11622_s25 + $0x1950] ss:$8 sps:$4 sm:$0xff]  }
 0x317   : > { %8142 = vmatpush2.bf16.msra.mxu1 %v11020_v23  ;;  %8092 = vmatprep.subr.bf16.mxu0 %v11025_v24 }
 0x318   : > { %8143 = vmatprep.subr.bf16.mxu1 %v11028_v54  ;;  %v11083_v54 = vld [vmem:[%s11622_s25 + $0x1844] ss:$8 sps:$4 sm:$0xff]  }
 0x31a   : > { %8093 = vmatpush2.bf16.msra.mxu0 %v11023_v40  ;;  %v11086_v40 = vld [vmem:[%s11622_s25 + $0x1944] ss:$8 sps:$4 sm:$0xff]  }
 0x31b   : > { %8144 = vmatpush2.bf16.msra.mxu1 %v11026_v52  ;;  %8094 = vmatprep.subr.bf16.mxu0 %v11031_v39 }
 0x31c   : > { %8145 = vmatprep.subr.bf16.mxu1 %v11034_v59 }
 0x31e   : > { %8095 = vmatpush2.bf16.msra.mxu0 %v11029_v15 }
 0x31f   : > { %8146 = vmatpush2.bf16.msra.mxu1 %v11032_v5  ;;  %8096 = vmatprep.subr.bf16.mxu0 %v11037_v35 }
 0x320   : > { %8147 = vmatprep.subr.bf16.mxu1 %v11040_v42 }
 0x322   : > { %8097 = vmatpush2.bf16.msra.mxu0 %v11035_v28  ;;  %v11081_v28 = vld [vmem:[%s11622_s25 + $0x1840] ss:$8 sps:$4 sm:$0xff]  }
 0x323   : > { %8148 = vmatpush2.bf16.msra.mxu1 %v11038_v29  ;;  %8098 = vmatprep.subr.bf16.mxu0 %v11043_v6 }
 0x324   : > { %8149 = vmatprep.subr.bf16.mxu1 %v11046_v8  ;;  %v11089_v8 = vld [vmem:[%s11622_s25 + $0x1834] ss:$8 sps:$4 sm:$0xff]  }
 0x326   : > { %8099 = vmatpush2.bf16.msra.mxu0 %v11041_v7  ;;  %v11092_v7 = vld [vmem:[%s11622_s25 + $0x1934] ss:$8 sps:$4 sm:$0xff]  }
 0x327   : > { %8150 = vmatpush2.bf16.msra.mxu1 %v11044_v61  ;;  %8100 = vmatprep.subr.bf16.mxu0 %v11049_v53 }
 0x328   : > { %8151 = vmatprep.subr.bf16.mxu1 %v11052_v62 }
 0x32a   : > { %8101 = vmatpush2.bf16.msra.mxu0 %v11047_v11 }
 0x32b   : > { %8152 = vmatpush2.bf16.msra.mxu1 %v11050_v47  ;;  %8102 = vmatprep.subr.bf16.mxu0 %v11055_v56  ;;  %v11087_v47 = vld [vmem:[%s11622_s25 + $0x1830] ss:$8 sps:$4 sm:$0xff]  }
 0x32c   : > { %8153 = vmatprep.subr.bf16.mxu1 %v11058_v49  ;;  %v11090_v56 = vld [vmem:[%s11622_s25 + $0x1930] ss:$8 sps:$4 sm:$0xff]   ;;  %v11098_v49 = vld [vmem:[%s11622_s25 + $0x1924] ss:$8 sps:$4 sm:$0xff]  }
 0x32e   : > { %8103 = vmatpush2.bf16.msra.mxu0 %v11053_v19 }
 0x32f   : > { %8154 = vmatpush2.bf16.msra.mxu1 %v11056_v50  ;;  %8174 = vmatprep.subr.bf16.mxu0 %v11061_v51  ;;  %v11093_v51 = vld [vmem:[%s11622_s25 + $0x1820] ss:$8 sps:$4 sm:$0xff]  }
 0x330   : > { %8225 = vmatprep.subr.bf16.mxu1 %v11064_v58  ;;  %v11096_v58 = vld [vmem:[%s11622_s25 + $0x1920] ss:$8 sps:$4 sm:$0xff]  }
 0x331   : > { %v7800_v46 = vpop.f32.mrf.mxu0  ;;  %8105 = vmatmul.mubr.bf16.vlgmr.msra.gmra.mxu0 %v8710_v10  ;;  %v11101_v10 = vld [vmem:[%s11622_s25 + $0x1814] ss:$8 sps:$4 sm:$0xff]  }
 0x332   : > { %v7851_v3 = vpop.f32.mrf.mxu1  ;;  %8156 = vmatmul.mubr.bf16.vlgmr.msra.gmra.mxu1 %v8712_v12  ;;  %v7801_v21 = vadd.f32 %v7800_v46, %v12827_v27  ;;  %8175 = vmatpush1.bf16.msra.mxu0 %v11059_v32  ;;  %v12949_v27 = vld [vmem:[%s13420_s0 + $0xc0] sm:$0xff]  ;;  %v11104_v12 = vld [vmem:[%s11622_s25 + $0x1914] ss:$8 sps:$4 sm:$0xff]   ;;  %v11111_v46 = vld [vmem:[%s11622_s25 + $0x18f0] ss:$8 sps:$4 sm:$0xff]  }
 0x333   : > { %8226 = vmatpush1.bf16.msra.mxu1 %v11062_v63  ;;  %v7802_v9 = vpop.f32.mrf.mxu0  ;;  %8176 = vmatprep.subr.bf16.mxu0 %v11067_v41  ;;  %v8715_v59 = vcombine.high %v12949_v27, %v12954_v36  ;;  %v11107_v32 = vld [vmem:[%s11622_s25 + $0x1804] ss:$8 sps:$4 sm:$0xff]   ;;  %v11105_v41 = vld [vmem:[%s11622_s25 + $0x1800] ss:$8 sps:$4 sm:$0xff]  }
 0x334   : > { %v7853_v18 = vpop.f32.mrf.mxu1  ;;  %8227 = vmatprep.subr.bf16.mxu1 %v11070_v1  ;;  %v12943_v13 = vadd.f32 %v7851_v3, %v7801_v21  ;;  %v7803_v0 = vadd.f32 %v7802_v9, %v12850_v31  ;;  %8114 = vmatprep.mubr.bf16.mxu0 %v8775_v38  ;;  %v12959_v31 = vld [vmem:[%s13420_s0 + $0xc8] sm:$0xff]  ;;  %v11113_v38 = vld [vmem:[%s11622_s25 + $0x18f4] ss:$8 sps:$4 sm:$0xff]   ;;  %v11114_v3 = vld [vmem:[%s11622_s25 + $0x19f0] ss:$8 sps:$4 sm:$0xff]  }
 0x335   : > { %8165 = vmatprep.mubr.bf16.mxu1 %v8777_v45  ;;  %v7804_v33 = vpop.f32.mrf.mxu0  ;;  %v11110_v63 = vld [vmem:[%s11622_s25 + $0x1904] ss:$8 sps:$4 sm:$0xff]   ;;  %v11108_v1 = vld [vmem:[%s11622_s25 + $0x1900] ss:$8 sps:$4 sm:$0xff]   ;;  %v11116_v45 = vld [vmem:[%s11622_s25 + $0x19f4] ss:$8 sps:$4 sm:$0xff]  }
 0x336   : > { %v7855_v57 = vpop.f32.mrf.mxu1  ;;  %v12966_v17 = vadd.f32 %v7853_v18, %v7803_v0  ;;  %v7805_v22 = vadd.f32 %v7804_v33, %v12857_v55  ;;  %8177 = vmatpush1.bf16.msra.mxu0 %v11065_v14  ;;  %v8717_v55 = vcombine.high %v12959_v31, %v12964_v30  ;;  %v11119_v21 = vld [vmem:[%s11622_s25 + $0x18e4] ss:$8 sps:$4 sm:$0xff]   ;;  %v11120_v9 = vld [vmem:[%s11622_s25 + $0x19e0] ss:$8 sps:$4 sm:$0xff]   ;;  %v11125_v18 = vld [vmem:[%s11622_s25 + $0x18d4] ss:$8 sps:$4 sm:$0xff]  }
 0x337   : > { %8228 = vmatpush1.bf16.msra.mxu1 %v11068_v4  ;;  %v7806_v23 = vpop.f32.mrf.mxu0  ;;  %8178 = vmatprep.subr.bf16.mxu0 %v11075_v20  ;;  %v11122_v14 = vld [vmem:[%s11622_s25 + $0x19e4] ss:$8 sps:$4 sm:$0xff]   ;;  %v11117_v4 = vld [vmem:[%s11622_s25 + $0x18e0] ss:$8 sps:$4 sm:$0xff]   ;;  %v11128_v20 = vld [vmem:[%s11622_s25 + $0x19d4] ss:$8 sps:$4 sm:$0xff]  }
 0x338   : > { %v7857_v24 = vpop.f32.mrf.mxu1  ;;  %8229 = vmatprep.subr.bf16.mxu1 %v11078_v60  ;;  %v12973_v52 = vadd.f32 %v7855_v57, %v7805_v22  ;;  %v7807_v39 = vadd.f32 %v7806_v23, %v12864_v43  ;;  %v11084_v43 = vld [vmem:[%s11622_s25 + $0x1940] ss:$8 sps:$4 sm:$0xff]   ;;  %v11123_v60 = vld [vmem:[%s11622_s25 + $0x18d0] ss:$8 sps:$4 sm:$0xff]   ;;  %v11131_v33 = vld [vmem:[%s11622_s25 + $0x18c4] ss:$8 sps:$4 sm:$0xff]  }
 0x339   : > { %v7810_v15 = vpop.f32.mrf.mxu0  ;;  %8115 = vmatmul.mubr.bf16.gmra.mxu0 %v8774_v48  ;;  %v11126_v0 = vld [vmem:[%s11622_s25 + $0x19d0] ss:$8 sps:$4 sm:$0xff]   ;;  %v11134_v57 = vld [vmem:[%s11622_s25 + $0x19c4] ss:$8 sps:$4 sm:$0xff]   ;;  %v11129_v48 = vld [vmem:[%s11622_s25 + $0x18c0] ss:$8 sps:$4 sm:$0xff]  }
 0x33a   : > { %v7861_v5 = vpop.f32.mrf.mxu1  ;;  %8166 = vmatmul.mubr.bf16.gmra.mxu1 %v8776_v2  ;;  %v12980_v35 = vadd.f32 %v7857_v24, %v7807_v39  ;;  %v7811_v42 = vadd.f32 %v7810_v15, %v12872_v25  ;;  %8179 = vmatpush1.bf16.msra.mxu0 %v11073_v34  ;;  %v11132_v2 = vld [vmem:[%s11622_s25 + $0x19c0] ss:$8 sps:$4 sm:$0xff]   ;;  %v11137_v22 = vld [vmem:[%s11622_s25 + $0x18b4] ss:$8 sps:$4 sm:$0xff]   ;;  %v11138_v23 = vld [vmem:[%s11622_s25 + $0x19b0] ss:$8 sps:$4 sm:$0xff]  }
 0x33b   : > { %8230 = vmatpush1.bf16.msra.mxu1 %v11076_v44  ;;  %v7812_v29 = vpop.f32.mrf.mxu0  ;;  %8180 = vmatprep.subr.bf16.mxu0 %v11083_v54  ;;  %v11140_v34 = vld [vmem:[%s11622_s25 + $0x19b4] ss:$8 sps:$4 sm:$0xff]   ;;  %v11135_v44 = vld [vmem:[%s11622_s25 + $0x18b0] ss:$8 sps:$4 sm:$0xff]   ;;  %v11143_v24 = vld [vmem:[%s11622_s25 + $0x18a4] ss:$8 sps:$4 sm:$0xff]  }
 0x33c   : > { %v7863_v6 = vpop.f32.mrf.mxu1  ;;  %8231 = vmatprep.subr.bf16.mxu1 %v11086_v40  ;;  %v7813_v61 = vadd.f32 %v7812_v29, %v12874_v26  ;;  %v12988_v53 = vadd.f32 %v7861_v5, %v7811_v42  ;;  %8206 = vmatprep.mubr.bf16.mxu0 %v8715_v59  ;;  %v11095_v26 = vld [vmem:[%s11622_s25 + $0x1824] ss:$8 sps:$4 sm:$0xff]   ;;  %v11141_v40 = vld [vmem:[%s11622_s25 + $0x18a0] ss:$8 sps:$4 sm:$0xff]   ;;  %v11149_v59 = vld [vmem:[%s11622_s25 + $0x1894] ss:$8 sps:$4 sm:$0xff]  }
 0x33d   : > { %8257 = vmatprep.mubr.bf16.mxu1 %v8717_v55  ;;  %v7814_v25 = vpop.f32.mrf.mxu0  ;;  %v11146_v54 = vld [vmem:[%s11622_s25 + $0x19a4] ss:$8 sps:$4 sm:$0xff]   ;;  %v11144_v39 = vld [vmem:[%s11622_s25 + $0x19a0] ss:$8 sps:$4 sm:$0xff]   ;;  %v11152_v55 = vld [vmem:[%s11622_s25 + $0x1994] ss:$8 sps:$4 sm:$0xff]  }
 0x33e   : > { %v7865_v62 = vpop.f32.mrf.mxu1  ;;  %v12990_v11 = vadd.f32 %v7863_v6, %v7813_v61  ;;  %8181 = vmatpush1.bf16.msra.mxu0 %v11081_v28  ;;  %v11147_v15 = vld [vmem:[%s11622_s25 + $0x1890] ss:$8 sps:$4 sm:$0xff]   ;;  %v11155_v42 = vld [vmem:[%s11622_s25 + $0x1884] ss:$8 sps:$4 sm:$0xff]   ;;  %v11156_v29 = vld [vmem:[%s11622_s25 + $0x1980] ss:$8 sps:$4 sm:$0xff]   ;;  %v8716_v61 = vcombine.low %v12959_v31, %v12964_v30 }
 0x33f   : > { %8232 = vmatpush1.bf16.msra.mxu1 %v11084_v43  ;;  %8182 = vmatprep.subr.bf16.mxu0 %v11089_v8  ;;  %v7815_v19 = vpop.f32.mrf.mxu0  ;;  %v11150_v5 = vld [vmem:[%s11622_s25 + $0x1990] ss:$8 sps:$4 sm:$0xff]   ;;  %v11158_v28 = vld [vmem:[%s11622_s25 + $0x1984] ss:$8 sps:$4 sm:$0xff]   ;;  %v11153_v43 = vld [vmem:[%s11622_s25 + $0x1880] ss:$8 sps:$4 sm:$0xff]  }
 0x340   : > { %8233 = vmatprep.subr.bf16.mxu1 %v11092_v7  ;;  %v7866_v50 = vpop.f32.mrf.mxu1  ;;  %v11161_v6 = vld [vmem:[%s11622_s25 + $0x1a74] ss:$8 sps:$4 sm:$0xff]   ;;  %v8714_v7 = vcombine.low %v12949_v27, %v12954_v36  ;;  %v254_v25 = vld [vmem:[%s13420_s0 + $0x2c0] sm:$0xff]  ;;  %v255_v62 = vld [vmem:[%s13420_s0 + $0x2c8] sm:$0xff] }
 0x341   : > { %v11164_v8 = vld [vmem:[%s11622_s25 + $0x1b74] ss:$8 sps:$4 sm:$0xff]   ;;  %v11167_v27 = vld [vmem:[%s11622_s25 + $0x1a64] ss:$8 sps:$4 sm:$0xff]   ;;  %v8779_v31 = vcombine.high %v254_v25, %v254_v25  ;;  %v8781_v30 = vcombine.high %v255_v62, %v255_v62  ;;  %v11165_v50 = vld [vmem:[%s11622_s25 + $0x1a60] ss:$8 sps:$4 sm:$0xff]  }
 0x342   : > { %8183 = vmatpush1.bf16.msra.mxu0 %v11087_v47  ;;  %v11159_v47 = vld [vmem:[%s11622_s25 + $0x1a70] ss:$8 sps:$4 sm:$0xff]   ;;  %v11170_v36 = vld [vmem:[%s11622_s25 + $0x1b64] ss:$8 sps:$4 sm:$0xff]  }
 0x343   : > { %8234 = vmatpush1.bf16.msra.mxu1 %v11090_v56  ;;  %8184 = vmatprep.subr.bf16.mxu0 %v11095_v26  ;;  %v11162_v56 = vld [vmem:[%s11622_s25 + $0x1b70] ss:$8 sps:$4 sm:$0xff]  }
 0x344   : > { %8235 = vmatprep.subr.bf16.mxu1 %v11098_v49 }
 0x346   : > { %8185 = vmatpush1.bf16.msra.mxu0 %v11093_v51  ;;  %v11168_v51 = vld [vmem:[%s11622_s25 + $0x1b60] ss:$8 sps:$4 sm:$0xff]  }
 0x347   : > { %8236 = vmatpush1.bf16.msra.mxu1 %v11096_v58  ;;  %8186 = vmatprep.subr.bf16.mxu0 %v11101_v10 }
 0x348   : > { %8237 = vmatprep.subr.bf16.mxu1 %v11104_v12  ;;  %v11175_v12 = vld [vmem:[%s11622_s25 + $0x1a54] ss:$8 sps:$4 sm:$0xff]  }
 0x34a   : > { %8187 = vmatpush1.bf16.msra.mxu0 %v11099_v37  ;;  %v11178_v37 = vld [vmem:[%s11622_s25 + $0x1b54] ss:$8 sps:$4 sm:$0xff]  }
 0x34b   : > { %8238 = vmatpush1.bf16.msra.mxu1 %v11102_v16  ;;  %8188 = vmatprep.subr.bf16.mxu0 %v11107_v32 }
 0x34c   : > { %8239 = vmatprep.subr.bf16.mxu1 %v11110_v63 }
 0x34e   : > { %8189 = vmatpush1.bf16.msra.mxu0 %v11105_v41 }
 0x34f   : > { %8240 = vmatpush1.bf16.msra.mxu1 %v11108_v1  ;;  %8190 = vmatprep.subr.bf16.mxu0 %v11113_v38  ;;  %v8778_v1 = vcombine.low %v254_v25, %v254_v25  ;;  %v8780_v38 = vcombine.low %v255_v62, %v255_v62  ;;  %v11199_v25 = vld [vmem:[%s11622_s25 + $0x1a10] ss:$8 sps:$4 sm:$0xff]  }
 0x350   : > { %8241 = vmatprep.subr.bf16.mxu1 %v11116_v45  ;;  %v13070_v45 = vld [vmem:[%s13420_s0 + $0x1d0] sm:$0xff] }
 0x351   : > { %v11202_v62 = vld [vmem:[%s11622_s25 + $0x1b10] ss:$8 sps:$4 sm:$0xff]  }
 0x352   : > { %8191 = vmatpush2.bf16.msra.mxu0 %v11111_v46  ;;  %v13080_v46 = vld [vmem:[%s13420_s0 + $0x1d8] sm:$0xff] }
 0x353   : > { %8242 = vmatpush2.bf16.msra.mxu1 %v11114_v3  ;;  %8192 = vmatprep.subr.bf16.mxu0 %v11119_v21 }
 0x354   : > { %8243 = vmatprep.subr.bf16.mxu1 %v11122_v14  ;;  %v11173_v14 = vld [vmem:[%s11622_s25 + $0x1a50] ss:$8 sps:$4 sm:$0xff]  }
 0x356   : > { %8193 = vmatpush2.bf16.msra.mxu0 %v11117_v4  ;;  %v11176_v4 = vld [vmem:[%s11622_s25 + $0x1b50] ss:$8 sps:$4 sm:$0xff]  }
 0x357   : > { %8244 = vmatpush2.bf16.msra.mxu1 %v11120_v9  ;;  %8194 = vmatprep.subr.bf16.mxu0 %v11125_v18 }
 0x358   : > { %8245 = vmatprep.subr.bf16.mxu1 %v11128_v20  ;;  %v11183_v20 = vld [vmem:[%s11622_s25 + $0x1a44] ss:$8 sps:$4 sm:$0xff]  }
 0x35a   : > { %8195 = vmatpush2.bf16.msra.mxu0 %v11123_v60  ;;  %v11186_v60 = vld [vmem:[%s11622_s25 + $0x1b44] ss:$8 sps:$4 sm:$0xff]  }
 0x35b   : > { %8246 = vmatpush2.bf16.msra.mxu1 %v11126_v0  ;;  %8196 = vmatprep.subr.bf16.mxu0 %v11131_v33 }
 0x35c   : > { %8247 = vmatprep.subr.bf16.mxu1 %v11134_v57 }
 0x35e   : > { %8197 = vmatpush2.bf16.msra.mxu0 %v11129_v48 }
 0x35f   : > { %8248 = vmatpush2.bf16.msra.mxu1 %v11132_v2  ;;  %8198 = vmatprep.subr.bf16.mxu0 %v11137_v22 }
 0x360   : > { %8249 = vmatprep.subr.bf16.mxu1 %v11140_v34 }
 0x362   : > { %8199 = vmatpush2.bf16.msra.mxu0 %v11135_v44  ;;  %v11181_v44 = vld [vmem:[%s11622_s25 + $0x1a40] ss:$8 sps:$4 sm:$0xff]  }
 0x363   : > { %8250 = vmatpush2.bf16.msra.mxu1 %v11138_v23  ;;  %8200 = vmatprep.subr.bf16.mxu0 %v11143_v24 }
 0x364   : > { %8251 = vmatprep.subr.bf16.mxu1 %v11146_v54  ;;  %v11189_v54 = vld [vmem:[%s11622_s25 + $0x1a34] ss:$8 sps:$4 sm:$0xff]  }
 0x366   : > { %8201 = vmatpush2.bf16.msra.mxu0 %v11141_v40  ;;  %v11192_v40 = vld [vmem:[%s11622_s25 + $0x1b34] ss:$8 sps:$4 sm:$0xff]  }
 0x367   : > { %8252 = vmatpush2.bf16.msra.mxu1 %v11144_v39  ;;  %8202 = vmatprep.subr.bf16.mxu0 %v11149_v59 }
 0x368   : > { %8253 = vmatprep.subr.bf16.mxu1 %v11152_v55 }
 0x36a   : > { %8203 = vmatpush2.bf16.msra.mxu0 %v11147_v15 }
 0x36b   : > { %8254 = vmatpush2.bf16.msra.mxu1 %v11150_v5  ;;  %8204 = vmatprep.subr.bf16.mxu0 %v11155_v42  ;;  %v11187_v5 = vld [vmem:[%s11622_s25 + $0x1a30] ss:$8 sps:$4 sm:$0xff]  }
 0x36c   : > { %8255 = vmatprep.subr.bf16.mxu1 %v11158_v28  ;;  %v11190_v42 = vld [vmem:[%s11622_s25 + $0x1b30] ss:$8 sps:$4 sm:$0xff]   ;;  %v11198_v28 = vld [vmem:[%s11622_s25 + $0x1b24] ss:$8 sps:$4 sm:$0xff]  }
 0x36e   : > { %8205 = vmatpush2.bf16.msra.mxu0 %v11153_v43 }
 0x36f   : > { %8256 = vmatpush2.bf16.msra.mxu1 %v11156_v29  ;;  %8276 = vmatprep.subr.bf16.mxu0 %v11161_v6  ;;  %v11193_v6 = vld [vmem:[%s11622_s25 + $0x1a20] ss:$8 sps:$4 sm:$0xff]  }
 0x370   : > { %8327 = vmatprep.subr.bf16.mxu1 %v11164_v8  ;;  %v11196_v8 = vld [vmem:[%s11622_s25 + $0x1b20] ss:$8 sps:$4 sm:$0xff]  }
 0x371   : > { %v7902_v26 = vpop.f32.mrf.mxu0  ;;  %8207 = vmatmul.mubr.bf16.vlgmr.msra.gmra.mxu0 %v8714_v7  ;;  %v11201_v7 = vld [vmem:[%s11622_s25 + $0x1a14] ss:$8 sps:$4 sm:$0xff]  }
 0x372   : > { %v7953_v49 = vpop.f32.mrf.mxu1  ;;  %8258 = vmatmul.mubr.bf16.vlgmr.msra.gmra.mxu1 %v8716_v61  ;;  %v7903_v19 = vadd.f32 %v7902_v26, %v12943_v13  ;;  %8277 = vmatpush1.bf16.msra.mxu0 %v11159_v47  ;;  %v13065_v13 = vld [vmem:[%s13420_s0 + $0xd0] sm:$0xff]  ;;  %v11207_v47 = vld [vmem:[%s11622_s25 + $0x1a04] ss:$8 sps:$4 sm:$0xff]  }
 0x373   : > { %8328 = vmatpush1.bf16.msra.mxu1 %v11162_v56  ;;  %v7904_v58 = vpop.f32.mrf.mxu0  ;;  %8278 = vmatprep.subr.bf16.mxu0 %v11167_v27  ;;  %v8719_v57 = vcombine.high %v13065_v13, %v13070_v45  ;;  %v11204_v61 = vld [vmem:[%s11622_s25 + $0x1b14] ss:$8 sps:$4 sm:$0xff]   ;;  %v11210_v56 = vld [vmem:[%s11622_s25 + $0x1b04] ss:$8 sps:$4 sm:$0xff]   ;;  %v11205_v27 = vld [vmem:[%s11622_s25 + $0x1a00] ss:$8 sps:$4 sm:$0xff]  }
 0x374   : > { %v7955_v10 = vpop.f32.mrf.mxu1  ;;  %8329 = vmatprep.subr.bf16.mxu1 %v11170_v36  ;;  %v13059_v16 = vadd.f32 %v7953_v49, %v7903_v19  ;;  %v7905_v32 = vadd.f32 %v7904_v58, %v12966_v17  ;;  %8216 = vmatprep.mubr.bf16.mxu0 %v8779_v31  ;;  %v13075_v17 = vld [vmem:[%s13420_s0 + $0xd8] sm:$0xff]  ;;  %v11208_v36 = vld [vmem:[%s11622_s25 + $0x1b00] ss:$8 sps:$4 sm:$0xff]   ;;  %v11219_v19 = vld [vmem:[%s11622_s25 + $0x1ae4] ss:$8 sps:$4 sm:$0xff]  }
 0x375   : > { %8267 = vmatprep.mubr.bf16.mxu1 %v8781_v30  ;;  %v7906_v63 = vpop.f32.mrf.mxu0  ;;  %v11213_v31 = vld [vmem:[%s11622_s25 + $0x1af4] ss:$8 sps:$4 sm:$0xff]   ;;  %v11211_v26 = vld [vmem:[%s11622_s25 + $0x1af0] ss:$8 sps:$4 sm:$0xff]   ;;  %v11220_v58 = vld [vmem:[%s11622_s25 + $0x1be0] ss:$8 sps:$4 sm:$0xff]  }
 0x376   : > { %v7957_v41 = vpop.f32.mrf.mxu1  ;;  %v13082_v3 = vadd.f32 %v7955_v10, %v7905_v32  ;;  %v7907_v21 = vadd.f32 %v7906_v63, %v12973_v52  ;;  %8279 = vmatpush1.bf16.msra.mxu0 %v11165_v50  ;;  %v8721_v52 = vcombine.high %v13075_v17, %v13080_v46  ;;  %v11216_v30 = vld [vmem:[%s11622_s25 + $0x1bf4] ss:$8 sps:$4 sm:$0xff]   ;;  %v11214_v49 = vld [vmem:[%s11622_s25 + $0x1bf0] ss:$8 sps:$4 sm:$0xff]   ;;  %v11222_v50 = vld [vmem:[%s11622_s25 + $0x1be4] ss:$8 sps:$4 sm:$0xff]  }
 0x377   : > { %8330 = vmatpush1.bf16.msra.mxu1 %v11168_v51  ;;  %v7908_v9 = vpop.f32.mrf.mxu0  ;;  %8280 = vmatprep.subr.bf16.mxu0 %v11175_v12  ;;  %v11217_v51 = vld [vmem:[%s11622_s25 + $0x1ae0] ss:$8 sps:$4 sm:$0xff]   ;;  %v11225_v10 = vld [vmem:[%s11622_s25 + $0x1ad4] ss:$8 sps:$4 sm:$0xff]   ;;  %v11226_v32 = vld [vmem:[%s11622_s25 + $0x1bd0] ss:$8 sps:$4 sm:$0xff]  }
 0x378   : > { %v7959_v18 = vpop.f32.mrf.mxu1  ;;  %8331 = vmatprep.subr.bf16.mxu1 %v11178_v37  ;;  %v13089_v0 = vadd.f32 %v7957_v41, %v7907_v21  ;;  %v7909_v33 = vadd.f32 %v7908_v9, %v12980_v35  ;;  %v11184_v35 = vld [vmem:[%s11622_s25 + $0x1b40] ss:$8 sps:$4 sm:$0xff]   ;;  %v11228_v12 = vld [vmem:[%s11622_s25 + $0x1bd4] ss:$8 sps:$4 sm:$0xff]   ;;  %v11223_v37 = vld [vmem:[%s11622_s25 + $0x1ad0] ss:$8 sps:$4 sm:$0xff]  }
 0x379   : > { %v7912_v48 = vpop.f32.mrf.mxu0  ;;  %8217 = vmatmul.mubr.bf16.gmra.mxu0 %v8778_v1  ;;  %v11231_v63 = vld [vmem:[%s11622_s25 + $0x1ac4] ss:$8 sps:$4 sm:$0xff]   ;;  %v11229_v1 = vld [vmem:[%s11622_s25 + $0x1ac0] ss:$8 sps:$4 sm:$0xff]   ;;  %v11237_v21 = vld [vmem:[%s11622_s25 + $0x1ab4] ss:$8 sps:$4 sm:$0xff]  }
 0x37a   : > { %v7963_v2 = vpop.f32.mrf.mxu1  ;;  %8268 = vmatmul.mubr.bf16.gmra.mxu1 %v8780_v38  ;;  %v13096_v22 = vadd.f32 %v7959_v18, %v7909_v33  ;;  %v7913_v34 = vadd.f32 %v7912_v48, %v12988_v53  ;;  %8281 = vmatpush1.bf16.msra.mxu0 %v11173_v14  ;;  %v11234_v41 = vld [vmem:[%s11622_s25 + $0x1bc4] ss:$8 sps:$4 sm:$0xff]   ;;  %v11232_v38 = vld [vmem:[%s11622_s25 + $0x1bc0] ss:$8 sps:$4 sm:$0xff]   ;;  %v11240_v14 = vld [vmem:[%s11622_s25 + $0x1bb4] ss:$8 sps:$4 sm:$0xff]  }
 0x37b   : > { %8332 = vmatpush1.bf16.msra.mxu1 %v11176_v4  ;;  %v7914_v23 = vpop.f32.mrf.mxu0  ;;  %8282 = vmatprep.subr.bf16.mxu0 %v11183_v20  ;;  %v11235_v4 = vld [vmem:[%s11622_s25 + $0x1ab0] ss:$8 sps:$4 sm:$0xff]   ;;  %v11243_v18 = vld [vmem:[%s11622_s25 + $0x1aa4] ss:$8 sps:$4 sm:$0xff]   ;;  %v11244_v33 = vld [vmem:[%s11622_s25 + $0x1ba0] ss:$8 sps:$4 sm:$0xff]  }
 0x37c   : > { %v7965_v24 = vpop.f32.mrf.mxu1  ;;  %8333 = vmatprep.subr.bf16.mxu1 %v11186_v60  ;;  %v7915_v39 = vadd.f32 %v7914_v23, %v12990_v11  ;;  %v13104_v59 = vadd.f32 %v7963_v2, %v7913_v34  ;;  %8308 = vmatprep.mubr.bf16.mxu0 %v8719_v57  ;;  %v11195_v11 = vld [vmem:[%s11622_s25 + $0x1a24] ss:$8 sps:$4 sm:$0xff]   ;;  %v11238_v9 = vld [vmem:[%s11622_s25 + $0x1bb0] ss:$8 sps:$4 sm:$0xff]   ;;  %v11241_v60 = vld [vmem:[%s11622_s25 + $0x1aa0] ss:$8 sps:$4 sm:$0xff]  }
 0x37d   : > { %8359 = vmatprep.mubr.bf16.mxu1 %v8721_v52  ;;  %v7916_v53 = vpop.f32.mrf.mxu0  ;;  %v11246_v20 = vld [vmem:[%s11622_s25 + $0x1ba4] ss:$8 sps:$4 sm:$0xff]   ;;  %v11249_v57 = vld [vmem:[%s11622_s25 + $0x1a94] ss:$8 sps:$4 sm:$0xff]   ;;  %v11247_v48 = vld [vmem:[%s11622_s25 + $0x1a90] ss:$8 sps:$4 sm:$0xff]  }
 0x37e   : > { %v7967_v55 = vpop.f32.mrf.mxu1  ;;  %v13106_v15 = vadd.f32 %v7965_v24, %v7915_v39  ;;  %8283 = vmatpush1.bf16.msra.mxu0 %v11181_v44  ;;  %v11252_v52 = vld [vmem:[%s11622_s25 + $0x1b94] ss:$8 sps:$4 sm:$0xff]   ;;  %v11250_v2 = vld [vmem:[%s11622_s25 + $0x1b90] ss:$8 sps:$4 sm:$0xff]   ;;  %v11255_v34 = vld [vmem:[%s11622_s25 + $0x1a84] ss:$8 sps:$4 sm:$0xff]   ;;  %v8720_v39 = vcombine.low %v13075_v17, %v13080_v46 }
 0x37f   : > { %8334 = vmatpush1.bf16.msra.mxu1 %v11184_v35  ;;  %8284 = vmatprep.subr.bf16.mxu0 %v11189_v54  ;;  %v7917_v43 = vpop.f32.mrf.mxu0  ;;  %v11258_v44 = vld [vmem:[%s11622_s25 + $0x1b84] ss:$8 sps:$4 sm:$0xff]   ;;  %v11253_v35 = vld [vmem:[%s11622_s25 + $0x1a80] ss:$8 sps:$4 sm:$0xff]   ;;  %v11261_v24 = vld [vmem:[%s11622_s25 + $0x1c74] ss:$8 sps:$4 sm:$0xff]  }
 0x380   : > { %8335 = vmatprep.subr.bf16.mxu1 %v11192_v40  ;;  %v7968_v29 = vpop.f32.mrf.mxu1  ;;  %v11256_v23 = vld [vmem:[%s11622_s25 + $0x1b80] ss:$8 sps:$4 sm:$0xff]   ;;  %v11264_v54 = vld [vmem:[%s11622_s25 + $0x1d74] ss:$8 sps:$4 sm:$0xff]   ;;  %v8718_v40 = vcombine.low %v13065_v13, %v13070_v45  ;;  %v11267_v13 = vld [vmem:[%s11622_s25 + $0x1c64] ss:$8 sps:$4 sm:$0xff]  }
 0x381   : > { %v256_v53 = vld [vmem:[%s13420_s0 + $0x2d0] sm:$0xff]  ;;  %v257_v55 = vld [vmem:[%s13420_s0 + $0x2d8] sm:$0xff]  ;;  %v11270_v45 = vld [vmem:[%s11622_s25 + $0x1d64] ss:$8 sps:$4 sm:$0xff]  }
 0x382   : > { %8285 = vmatpush1.bf16.msra.mxu0 %v11187_v5  ;;  %v11259_v5 = vld [vmem:[%s11622_s25 + $0x1c70] ss:$8 sps:$4 sm:$0xff]   ;;  %v8783_v17 = vcombine.high %v256_v53, %v256_v53  ;;  %v8785_v46 = vcombine.high %v257_v55, %v257_v55  ;;  %v11265_v29 = vld [vmem:[%s11622_s25 + $0x1c60] ss:$8 sps:$4 sm:$0xff]  }
 0x383   : > { %8336 = vmatpush1.bf16.msra.mxu1 %v11190_v42  ;;  %8286 = vmatprep.subr.bf16.mxu0 %v11195_v11  ;;  %v11262_v42 = vld [vmem:[%s11622_s25 + $0x1d70] ss:$8 sps:$4 sm:$0xff]  }
 0x384   : > { %8337 = vmatprep.subr.bf16.mxu1 %v11198_v28 }
 0x386   : > { %8287 = vmatpush1.bf16.msra.mxu0 %v11193_v6  ;;  %v11268_v6 = vld [vmem:[%s11622_s25 + $0x1d60] ss:$8 sps:$4 sm:$0xff]  }
 0x387   : > { %8338 = vmatpush1.bf16.msra.mxu1 %v11196_v8  ;;  %8288 = vmatprep.subr.bf16.mxu0 %v11201_v7 }
 0x388   : > { %8339 = vmatprep.subr.bf16.mxu1 %v11204_v61  ;;  %v11275_v61 = vld [vmem:[%s11622_s25 + $0x1c54] ss:$8 sps:$4 sm:$0xff]  }
 0x38a   : > { %8289 = vmatpush1.bf16.msra.mxu0 %v11199_v25  ;;  %v11278_v25 = vld [vmem:[%s11622_s25 + $0x1d54] ss:$8 sps:$4 sm:$0xff]  }
 0x38b   : > { %8340 = vmatpush1.bf16.msra.mxu1 %v11202_v62  ;;  %8290 = vmatprep.subr.bf16.mxu0 %v11207_v47 }
 0x38c   : > { %8341 = vmatprep.subr.bf16.mxu1 %v11210_v56 }
 0x38e   : > { %8291 = vmatpush1.bf16.msra.mxu0 %v11205_v27 }
 0x38f   : > { %8342 = vmatpush1.bf16.msra.mxu1 %v11208_v36  ;;  %8292 = vmatprep.subr.bf16.mxu0 %v11213_v31  ;;  %v8782_v36 = vcombine.low %v256_v53, %v256_v53  ;;  %v8784_v31 = vcombine.low %v257_v55, %v257_v55  ;;  %v11299_v53 = vld [vmem:[%s11622_s25 + $0x1c10] ss:$8 sps:$4 sm:$0xff]  }
 0x390   : > { %8343 = vmatprep.subr.bf16.mxu1 %v11216_v30  ;;  %v13186_v30 = vld [vmem:[%s13420_s0 + $0x1e0] sm:$0xff]  ;;  %v11302_v55 = vld [vmem:[%s11622_s25 + $0x1d10] ss:$8 sps:$4 sm:$0xff]  }
 0x392   : > { %8293 = vmatpush2.bf16.msra.mxu0 %v11211_v26  ;;  %v13196_v26 = vld [vmem:[%s13420_s0 + $0x1e8] sm:$0xff] }
 0x393   : > { %8344 = vmatpush2.bf16.msra.mxu1 %v11214_v49  ;;  %8294 = vmatprep.subr.bf16.mxu0 %v11219_v19 }
 0x394   : > { %8345 = vmatprep.subr.bf16.mxu1 %v11222_v50  ;;  %v11273_v50 = vld [vmem:[%s11622_s25 + $0x1c50] ss:$8 sps:$4 sm:$0xff]  }
 0x396   : > { %8295 = vmatpush2.bf16.msra.mxu0 %v11217_v51  ;;  %v11276_v51 = vld [vmem:[%s11622_s25 + $0x1d50] ss:$8 sps:$4 sm:$0xff]  }
 0x397   : > { %8346 = vmatpush2.bf16.msra.mxu1 %v11220_v58  ;;  %8296 = vmatprep.subr.bf16.mxu0 %v11225_v10 }
 0x398   : > { %8347 = vmatprep.subr.bf16.mxu1 %v11228_v12  ;;  %v11283_v12 = vld [vmem:[%s11622_s25 + $0x1c44] ss:$8 sps:$4 sm:$0xff]  }
 0x39a   : > { %8297 = vmatpush2.bf16.msra.mxu0 %v11223_v37  ;;  %v11286_v37 = vld [vmem:[%s11622_s25 + $0x1d44] ss:$8 sps:$4 sm:$0xff]  }
 0x39b   : > { %8348 = vmatpush2.bf16.msra.mxu1 %v11226_v32  ;;  %8298 = vmatprep.subr.bf16.mxu0 %v11231_v63 }
 0x39c   : > { %8349 = vmatprep.subr.bf16.mxu1 %v11234_v41 }
 0x39e   : > { %8299 = vmatpush2.bf16.msra.mxu0 %v11229_v1 }
 0x39f   : > { %8350 = vmatpush2.bf16.msra.mxu1 %v11232_v38  ;;  %8300 = vmatprep.subr.bf16.mxu0 %v11237_v21 }
 0x3a0   : > { %8351 = vmatprep.subr.bf16.mxu1 %v11240_v14 }
 0x3a2   : > { %8301 = vmatpush2.bf16.msra.mxu0 %v11235_v4  ;;  %v11281_v4 = vld [vmem:[%s11622_s25 + $0x1c40] ss:$8 sps:$4 sm:$0xff]  }
 0x3a3   : > { %8352 = vmatpush2.bf16.msra.mxu1 %v11238_v9  ;;  %8302 = vmatprep.subr.bf16.mxu0 %v11243_v18 }
 0x3a4   : > { %8353 = vmatprep.subr.bf16.mxu1 %v11246_v20  ;;  %v11289_v20 = vld [vmem:[%s11622_s25 + $0x1c34] ss:$8 sps:$4 sm:$0xff]  }
 0x3a6   : > { %8303 = vmatpush2.bf16.msra.mxu0 %v11241_v60  ;;  %v11292_v60 = vld [vmem:[%s11622_s25 + $0x1d34] ss:$8 sps:$4 sm:$0xff]  }
 0x3a7   : > { %8354 = vmatpush2.bf16.msra.mxu1 %v11244_v33  ;;  %8304 = vmatprep.subr.bf16.mxu0 %v11249_v57 }
 0x3a8   : > { %8355 = vmatprep.subr.bf16.mxu1 %v11252_v52 }
 0x3aa   : > { %8305 = vmatpush2.bf16.msra.mxu0 %v11247_v48 }
 0x3ab   : > { %8356 = vmatpush2.bf16.msra.mxu1 %v11250_v2  ;;  %8306 = vmatprep.subr.bf16.mxu0 %v11255_v34  ;;  %v11287_v2 = vld [vmem:[%s11622_s25 + $0x1c30] ss:$8 sps:$4 sm:$0xff]  }
 0x3ac   : > { %8357 = vmatprep.subr.bf16.mxu1 %v11258_v44  ;;  %v11290_v34 = vld [vmem:[%s11622_s25 + $0x1d30] ss:$8 sps:$4 sm:$0xff]   ;;  %v11298_v44 = vld [vmem:[%s11622_s25 + $0x1d24] ss:$8 sps:$4 sm:$0xff]  }
 0x3ae   : > { %8307 = vmatpush2.bf16.msra.mxu0 %v11253_v35 }
 0x3af   : > { %8358 = vmatpush2.bf16.msra.mxu1 %v11256_v23  ;;  %8378 = vmatprep.subr.bf16.mxu0 %v11261_v24  ;;  %v11293_v24 = vld [vmem:[%s11622_s25 + $0x1c20] ss:$8 sps:$4 sm:$0xff]  }
 0x3b0   : > { %8429 = vmatprep.subr.bf16.mxu1 %v11264_v54  ;;  %v11296_v54 = vld [vmem:[%s11622_s25 + $0x1d20] ss:$8 sps:$4 sm:$0xff]  }
 0x3b1   : > { %v8004_v11 = vpop.f32.mrf.mxu0  ;;  %8309 = vmatmul.mubr.bf16.vlgmr.msra.gmra.mxu0 %v8718_v40  ;;  %v11301_v40 = vld [vmem:[%s11622_s25 + $0x1c14] ss:$8 sps:$4 sm:$0xff]  }
 0x3b2   : > { %v8055_v28 = vpop.f32.mrf.mxu1  ;;  %8360 = vmatmul.mubr.bf16.vlgmr.msra.gmra.mxu1 %v8720_v39  ;;  %v8005_v43 = vadd.f32 %v8004_v11, %v13059_v16  ;;  %8379 = vmatpush1.bf16.msra.mxu0 %v11259_v5  ;;  %v13181_v16 = vld [vmem:[%s13420_s0 + $0xe0] sm:$0xff]  ;;  %v11304_v39 = vld [vmem:[%s11622_s25 + $0x1d14] ss:$8 sps:$4 sm:$0xff]   ;;  %v11311_v11 = vld [vmem:[%s11622_s25 + $0x1cf0] ss:$8 sps:$4 sm:$0xff]  }
 0x3b3   : > { %8430 = vmatpush1.bf16.msra.mxu1 %v11262_v42  ;;  %v8006_v8 = vpop.f32.mrf.mxu0  ;;  %8380 = vmatprep.subr.bf16.mxu0 %v11267_v13  ;;  %v8723_v41 = vcombine.high %v13181_v16, %v13186_v30  ;;  %v11307_v5 = vld [vmem:[%s11622_s25 + $0x1c04] ss:$8 sps:$4 sm:$0xff]   ;;  %v11305_v13 = vld [vmem:[%s11622_s25 + $0x1c00] ss:$8 sps:$4 sm:$0xff]  }
 0x3b4   : > { %v8057_v7 = vpop.f32.mrf.mxu1  ;;  %8431 = vmatprep.subr.bf16.mxu1 %v11270_v45  ;;  %v13175_v62 = vadd.f32 %v8055_v28, %v8005_v43  ;;  %v8007_v47 = vadd.f32 %v8006_v8, %v13082_v3  ;;  %8318 = vmatprep.mubr.bf16.mxu0 %v8783_v17  ;;  %v13191_v3 = vld [vmem:[%s13420_s0 + $0xe8] sm:$0xff]  ;;  %v11313_v17 = vld [vmem:[%s11622_s25 + $0x1cf4] ss:$8 sps:$4 sm:$0xff]   ;;  %v11314_v28 = vld [vmem:[%s11622_s25 + $0x1df0] ss:$8 sps:$4 sm:$0xff]  }
 0x3b5   : > { %8369 = vmatprep.mubr.bf16.mxu1 %v8785_v46  ;;  %v8008_v56 = vpop.f32.mrf.mxu0  ;;  %v11310_v42 = vld [vmem:[%s11622_s25 + $0x1d04] ss:$8 sps:$4 sm:$0xff]   ;;  %v11308_v45 = vld [vmem:[%s11622_s25 + $0x1d00] ss:$8 sps:$4 sm:$0xff]   ;;  %v11316_v46 = vld [vmem:[%s11622_s25 + $0x1df4] ss:$8 sps:$4 sm:$0xff]  }
 0x3b6   : > { %v8059_v27 = vpop.f32.mrf.mxu1  ;;  %v13198_v49 = vadd.f32 %v8057_v7, %v8007_v47  ;;  %v8009_v19 = vadd.f32 %v8008_v56, %v13089_v0  ;;  %8381 = vmatpush1.bf16.msra.mxu0 %v11265_v29  ;;  %v8725_v0 = vcombine.high %v13191_v3, %v13196_v26  ;;  %v11319_v43 = vld [vmem:[%s11622_s25 + $0x1ce4] ss:$8 sps:$4 sm:$0xff]   ;;  %v11320_v8 = vld [vmem:[%s11622_s25 + $0x1de0] ss:$8 sps:$4 sm:$0xff]   ;;  %v11325_v7 = vld [vmem:[%s11622_s25 + $0x1cd4] ss:$8 sps:$4 sm:$0xff]  }
 0x3b7   : > { %8432 = vmatpush1.bf16.msra.mxu1 %v11268_v6  ;;  %v8010_v58 = vpop.f32.mrf.mxu0  ;;  %8382 = vmatprep.subr.bf16.mxu0 %v11275_v61  ;;  %v11322_v29 = vld [vmem:[%s11622_s25 + $0x1de4] ss:$8 sps:$4 sm:$0xff]   ;;  %v11317_v6 = vld [vmem:[%s11622_s25 + $0x1ce0] ss:$8 sps:$4 sm:$0xff]   ;;  %v11328_v61 = vld [vmem:[%s11622_s25 + $0x1dd4] ss:$8 sps:$4 sm:$0xff]  }
 0x3b8   : > { %v8061_v10 = vpop.f32.mrf.mxu1  ;;  %8433 = vmatprep.subr.bf16.mxu1 %v11278_v25  ;;  %v13205_v32 = vadd.f32 %v8059_v27, %v8009_v19  ;;  %v8011_v63 = vadd.f32 %v8010_v58, %v13096_v22  ;;  %v11284_v22 = vld [vmem:[%s11622_s25 + $0x1d40] ss:$8 sps:$4 sm:$0xff]   ;;  %v11323_v25 = vld [vmem:[%s11622_s25 + $0x1cd0] ss:$8 sps:$4 sm:$0xff]   ;;  %v11331_v56 = vld [vmem:[%s11622_s25 + $0x1cc4] ss:$8 sps:$4 sm:$0xff]  }
 0x3b9   : > { %v8014_v1 = vpop.f32.mrf.mxu0  ;;  %8319 = vmatmul.mubr.bf16.gmra.mxu0 %v8782_v36  ;;  %v11326_v47 = vld [vmem:[%s11622_s25 + $0x1dd0] ss:$8 sps:$4 sm:$0xff]   ;;  %v11334_v27 = vld [vmem:[%s11622_s25 + $0x1dc4] ss:$8 sps:$4 sm:$0xff]   ;;  %v11329_v36 = vld [vmem:[%s11622_s25 + $0x1cc0] ss:$8 sps:$4 sm:$0xff]  }
 0x3ba   : > { %v8065_v38 = vpop.f32.mrf.mxu1  ;;  %8370 = vmatmul.mubr.bf16.gmra.mxu1 %v8784_v31  ;;  %v13212_v21 = vadd.f32 %v8061_v10, %v8011_v63  ;;  %v8015_v14 = vadd.f32 %v8014_v1, %v13104_v59  ;;  %8383 = vmatpush1.bf16.msra.mxu0 %v11273_v50  ;;  %v11332_v31 = vld [vmem:[%s11622_s25 + $0x1dc0] ss:$8 sps:$4 sm:$0xff]   ;;  %v11337_v19 = vld [vmem:[%s11622_s25 + $0x1cb4] ss:$8 sps:$4 sm:$0xff]   ;;  %v11338_v58 = vld [vmem:[%s11622_s25 + $0x1db0] ss:$8 sps:$4 sm:$0xff]  }
 0x3bb   : > { %8434 = vmatpush1.bf16.msra.mxu1 %v11276_v51  ;;  %v8016_v9 = vpop.f32.mrf.mxu0  ;;  %8384 = vmatprep.subr.bf16.mxu0 %v11283_v12  ;;  %v11340_v50 = vld [vmem:[%s11622_s25 + $0x1db4] ss:$8 sps:$4 sm:$0xff]   ;;  %v11335_v51 = vld [vmem:[%s11622_s25 + $0x1cb0] ss:$8 sps:$4 sm:$0xff]   ;;  %v11343_v10 = vld [vmem:[%s11622_s25 + $0x1ca4] ss:$8 sps:$4 sm:$0xff]  }
 0x3bc   : > { %v8067_v18 = vpop.f32.mrf.mxu1  ;;  %8435 = vmatprep.subr.bf16.mxu1 %v11286_v37  ;;  %v8017_v33 = vadd.f32 %v8016_v9, %v13106_v15  ;;  %v13220_v57 = vadd.f32 %v8065_v38, %v8015_v14  ;;  %8410 = vmatprep.mubr.bf16.mxu0 %v8723_v41  ;;  %v11295_v15 = vld [vmem:[%s11622_s25 + $0x1c24] ss:$8 sps:$4 sm:$0xff]   ;;  %v11341_v37 = vld [vmem:[%s11622_s25 + $0x1ca0] ss:$8 sps:$4 sm:$0xff]   ;;  %v11349_v41 = vld [vmem:[%s11622_s25 + $0x1c94] ss:$8 sps:$4 sm:$0xff]  }
 0x3bd   : > { %8461 = vmatprep.mubr.bf16.mxu1 %v8725_v0  ;;  %v8018_v59 = vpop.f32.mrf.mxu0  ;;  %v11346_v12 = vld [vmem:[%s11622_s25 + $0x1da4] ss:$8 sps:$4 sm:$0xff]   ;;  %v11344_v63 = vld [vmem:[%s11622_s25 + $0x1da0] ss:$8 sps:$4 sm:$0xff]   ;;  %v11352_v0 = vld [vmem:[%s11622_s25 + $0x1d94] ss:$8 sps:$4 sm:$0xff]  }
 0x3be   : > { %v8069_v52 = vpop.f32.mrf.mxu1  ;;  %v13222_v48 = vadd.f32 %v8067_v18, %v8017_v33  ;;  %8385 = vmatpush1.bf16.msra.mxu0 %v11281_v4  ;;  %v11347_v1 = vld [vmem:[%s11622_s25 + $0x1c90] ss:$8 sps:$4 sm:$0xff]   ;;  %v11355_v14 = vld [vmem:[%s11622_s25 + $0x1c84] ss:$8 sps:$4 sm:$0xff]   ;;  %v11356_v9 = vld [vmem:[%s11622_s25 + $0x1d80] ss:$8 sps:$4 sm:$0xff]   ;;  %v8724_v33 = vcombine.low %v13191_v3, %v13196_v26 }
 0x3bf   : > { %8436 = vmatpush1.bf16.msra.mxu1 %v11284_v22  ;;  %8386 = vmatprep.subr.bf16.mxu0 %v11289_v20  ;;  %v8019_v35 = vpop.f32.mrf.mxu0  ;;  %v11350_v38 = vld [vmem:[%s11622_s25 + $0x1d90] ss:$8 sps:$4 sm:$0xff]   ;;  %v11358_v4 = vld [vmem:[%s11622_s25 + $0x1d84] ss:$8 sps:$4 sm:$0xff]   ;;  %v11353_v22 = vld [vmem:[%s11622_s25 + $0x1c80] ss:$8 sps:$4 sm:$0xff]  }
 0x3c0   : > { %8437 = vmatprep.subr.bf16.mxu1 %v11292_v60  ;;  %v8070_v23 = vpop.f32.mrf.mxu1  ;;  %v11361_v18 = vld [vmem:[%s11622_s25 + $0x1e74] ss:$8 sps:$4 sm:$0xff]   ;;  %v8722_v60 = vcombine.low %v13181_v16, %v13186_v30  ;;  %v258_v59 = vld [vmem:[%s13420_s0 + $0x2e0] sm:$0xff]  ;;  %v259_v52 = vld [vmem:[%s13420_s0 + $0x2e8] sm:$0xff] }
 0x3c1   : > { %v11364_v20 = vld [vmem:[%s11622_s25 + $0x1f74] ss:$8 sps:$4 sm:$0xff]   ;;  %v11367_v16 = vld [vmem:[%s11622_s25 + $0x1e64] ss:$8 sps:$4 sm:$0xff]   ;;  %v8787_v3 = vcombine.high %v258_v59, %v258_v59  ;;  %v8789_v26 = vcombine.high %v259_v52, %v259_v52  ;;  %v11365_v23 = vld [vmem:[%s11622_s25 + $0x1e60] ss:$8 sps:$4 sm:$0xff]  }
 0x3c2   : > { %8387 = vmatpush1.bf16.msra.mxu0 %v11287_v2  ;;  %v11359_v2 = vld [vmem:[%s11622_s25 + $0x1e70] ss:$8 sps:$4 sm:$0xff]   ;;  %v11370_v30 = vld [vmem:[%s11622_s25 + $0x1f64] ss:$8 sps:$4 sm:$0xff]  }
 0x3c3   : > { %8438 = vmatpush1.bf16.msra.mxu1 %v11290_v34  ;;  %8388 = vmatprep.subr.bf16.mxu0 %v11295_v15  ;;  %v11362_v34 = vld [vmem:[%s11622_s25 + $0x1f70] ss:$8 sps:$4 sm:$0xff]  }
 0x3c4   : > { %8439 = vmatprep.subr.bf16.mxu1 %v11298_v44 }
 0x3c6   : > { %8389 = vmatpush1.bf16.msra.mxu0 %v11293_v24  ;;  %v11368_v24 = vld [vmem:[%s11622_s25 + $0x1f60] ss:$8 sps:$4 sm:$0xff]  }
 0x3c7   : > { %8440 = vmatpush1.bf16.msra.mxu1 %v11296_v54  ;;  %8390 = vmatprep.subr.bf16.mxu0 %v11301_v40 }
 0x3c8   : > { %8441 = vmatprep.subr.bf16.mxu1 %v11304_v39  ;;  %v11375_v39 = vld [vmem:[%s11622_s25 + $0x1e54] ss:$8 sps:$4 sm:$0xff]  }
 0x3ca   : > { %8391 = vmatpush1.bf16.msra.mxu0 %v11299_v53  ;;  %v11378_v53 = vld [vmem:[%s11622_s25 + $0x1f54] ss:$8 sps:$4 sm:$0xff]  }
 0x3cb   : > { %8442 = vmatpush1.bf16.msra.mxu1 %v11302_v55  ;;  %8392 = vmatprep.subr.bf16.mxu0 %v11307_v5 }
 0x3cc   : > { %8443 = vmatprep.subr.bf16.mxu1 %v11310_v42 }
 0x3ce   : > { %8393 = vmatpush1.bf16.msra.mxu0 %v11305_v13 }
 0x3cf   : > { %8444 = vmatpush1.bf16.msra.mxu1 %v11308_v45  ;;  %8394 = vmatprep.subr.bf16.mxu0 %v11313_v17  ;;  %v8786_v45 = vcombine.low %v258_v59, %v258_v59  ;;  %v8788_v17 = vcombine.low %v259_v52, %v259_v52  ;;  %v11399_v59 = vld [vmem:[%s11622_s25 + $0x1e10] ss:$8 sps:$4 sm:$0xff]  }
 0x3d0   : > { %8445 = vmatprep.subr.bf16.mxu1 %v11316_v46  ;;  %v13302_v46 = vld [vmem:[%s13420_s0 + $0x1f0] sm:$0xff] }
 0x3d1   : > { %v11402_v52 = vld [vmem:[%s11622_s25 + $0x1f10] ss:$8 sps:$4 sm:$0xff]  }
 0x3d2   : > { %8395 = vmatpush2.bf16.msra.mxu0 %v11311_v11  ;;  %v13312_v11 = vld [vmem:[%s13420_s0 + $0x1f8] sm:$0xff] }
 0x3d3   : > { %8446 = vmatpush2.bf16.msra.mxu1 %v11314_v28  ;;  %8396 = vmatprep.subr.bf16.mxu0 %v11319_v43 }
 0x3d4   : > { %8447 = vmatprep.subr.bf16.mxu1 %v11322_v29  ;;  %v11373_v29 = vld [vmem:[%s11622_s25 + $0x1e50] ss:$8 sps:$4 sm:$0xff]  }
 0x3d6   : > { %8397 = vmatpush2.bf16.msra.mxu0 %v11317_v6  ;;  %v11376_v6 = vld [vmem:[%s11622_s25 + $0x1f50] ss:$8 sps:$4 sm:$0xff]  }
 0x3d7   : > { %8448 = vmatpush2.bf16.msra.mxu1 %v11320_v8  ;;  %8398 = vmatprep.subr.bf16.mxu0 %v11325_v7 }
 0x3d8   : > { %8449 = vmatprep.subr.bf16.mxu1 %v11328_v61  ;;  %v11383_v61 = vld [vmem:[%s11622_s25 + $0x1e44] ss:$8 sps:$4 sm:$0xff]  }
 0x3da   : > { %8399 = vmatpush2.bf16.msra.mxu0 %v11323_v25  ;;  %v11386_v25 = vld [vmem:[%s11622_s25 + $0x1f44] ss:$8 sps:$4 sm:$0xff]  }
 0x3db   : > { %8450 = vmatpush2.bf16.msra.mxu1 %v11326_v47  ;;  %8400 = vmatprep.subr.bf16.mxu0 %v11331_v56 }
 0x3dc   : > { %8451 = vmatprep.subr.bf16.mxu1 %v11334_v27 }
 0x3de   : > { %8401 = vmatpush2.bf16.msra.mxu0 %v11329_v36 }
 0x3df   : > { %8452 = vmatpush2.bf16.msra.mxu1 %v11332_v31  ;;  %8402 = vmatprep.subr.bf16.mxu0 %v11337_v19 }
 0x3e0   : > { %8453 = vmatprep.subr.bf16.mxu1 %v11340_v50 }
 0x3e2   : > { %8403 = vmatpush2.bf16.msra.mxu0 %v11335_v51  ;;  %v11381_v51 = vld [vmem:[%s11622_s25 + $0x1e40] ss:$8 sps:$4 sm:$0xff]  }
 0x3e3   : > { %8454 = vmatpush2.bf16.msra.mxu1 %v11338_v58  ;;  %8404 = vmatprep.subr.bf16.mxu0 %v11343_v10 }
 0x3e4   : > { %8455 = vmatprep.subr.bf16.mxu1 %v11346_v12  ;;  %v11389_v12 = vld [vmem:[%s11622_s25 + $0x1e34] ss:$8 sps:$4 sm:$0xff]  }
 0x3e6   : > { %8405 = vmatpush2.bf16.msra.mxu0 %v11341_v37  ;;  %v11392_v37 = vld [vmem:[%s11622_s25 + $0x1f34] ss:$8 sps:$4 sm:$0xff]  }
 0x3e7   : > { %8456 = vmatpush2.bf16.msra.mxu1 %v11344_v63  ;;  %8406 = vmatprep.subr.bf16.mxu0 %v11349_v41 }
 0x3e8   : > { %8457 = vmatprep.subr.bf16.mxu1 %v11352_v0 }
 0x3ea   : > { %8407 = vmatpush2.bf16.msra.mxu0 %v11347_v1 }
 0x3eb   : > { %8458 = vmatpush2.bf16.msra.mxu1 %v11350_v38  ;;  %8408 = vmatprep.subr.bf16.mxu0 %v11355_v14  ;;  %v11387_v38 = vld [vmem:[%s11622_s25 + $0x1e30] ss:$8 sps:$4 sm:$0xff]  }
 0x3ec   : > { %8459 = vmatprep.subr.bf16.mxu1 %v11358_v4  ;;  %v11390_v14 = vld [vmem:[%s11622_s25 + $0x1f30] ss:$8 sps:$4 sm:$0xff]   ;;  %v11398_v4 = vld [vmem:[%s11622_s25 + $0x1f24] ss:$8 sps:$4 sm:$0xff]  }
 0x3ee   : > { %8409 = vmatpush2.bf16.msra.mxu0 %v11353_v22 }
 0x3ef   : > { %8460 = vmatpush2.bf16.msra.mxu1 %v11356_v9  ;;  %8480 = vmatprep.subr.bf16.mxu0 %v11361_v18  ;;  %v11393_v18 = vld [vmem:[%s11622_s25 + $0x1e20] ss:$8 sps:$4 sm:$0xff]  }
 0x3f0   : > { %8531 = vmatprep.subr.bf16.mxu1 %v11364_v20  ;;  %v11396_v20 = vld [vmem:[%s11622_s25 + $0x1f20] ss:$8 sps:$4 sm:$0xff]  }
 0x3f1   : > { %v8106_v15 = vpop.f32.mrf.mxu0  ;;  %8411 = vmatmul.mubr.bf16.vlgmr.msra.gmra.mxu0 %v8722_v60  ;;  %v11401_v60 = vld [vmem:[%s11622_s25 + $0x1e14] ss:$8 sps:$4 sm:$0xff]  }
 0x3f2   : > { %v8157_v44 = vpop.f32.mrf.mxu1  ;;  %8462 = vmatmul.mubr.bf16.vlgmr.msra.gmra.mxu1 %v8724_v33  ;;  %v8107_v35 = vadd.f32 %v8106_v15, %v13175_v62  ;;  %8481 = vmatpush1.bf16.msra.mxu0 %v11359_v2  ;;  %v13297_v62 = vld [vmem:[%s13420_s0 + $0xf0] sm:$0xff]  ;;  %v11407_v2 = vld [vmem:[%s11622_s25 + $0x1e04] ss:$8 sps:$4 sm:$0xff]  }
 0x3f3   : > { %8532 = vmatpush1.bf16.msra.mxu1 %v11362_v34  ;;  %v8108_v54 = vpop.f32.mrf.mxu0  ;;  %8482 = vmatprep.subr.bf16.mxu0 %v11367_v16  ;;  %v8727_v27 = vcombine.high %v13297_v62, %v13302_v46  ;;  %v11404_v33 = vld [vmem:[%s11622_s25 + $0x1f14] ss:$8 sps:$4 sm:$0xff]   ;;  %v11410_v34 = vld [vmem:[%s11622_s25 + $0x1f04] ss:$8 sps:$4 sm:$0xff]   ;;  %v11405_v16 = vld [vmem:[%s11622_s25 + $0x1e00] ss:$8 sps:$4 sm:$0xff]  }
 0x3f4   : > { %v8159_v40 = vpop.f32.mrf.mxu1  ;;  %8533 = vmatprep.subr.bf16.mxu1 %v11370_v30  ;;  %v13291_v55 = vadd.f32 %v8157_v44, %v8107_v35  ;;  %v8109_v5 = vadd.f32 %v8108_v54, %v13198_v49  ;;  %8420 = vmatprep.mubr.bf16.mxu0 %v8787_v3  ;;  %v13307_v49 = vld [vmem:[%s13420_s0 + $0xf8] sm:$0xff]  ;;  %v11408_v30 = vld [vmem:[%s11622_s25 + $0x1f00] ss:$8 sps:$4 sm:$0xff]   ;;  %v11419_v35 = vld [vmem:[%s11622_s25 + $0x1ee4] ss:$8 sps:$4 sm:$0xff]  }
 0x3f5   : > { %8471 = vmatprep.mubr.bf16.mxu1 %v8789_v26  ;;  %v8110_v42 = vpop.f32.mrf.mxu0  ;;  %v11413_v3 = vld [vmem:[%s11622_s25 + $0x1ef4] ss:$8 sps:$4 sm:$0xff]   ;;  %v11411_v15 = vld [vmem:[%s11622_s25 + $0x1ef0] ss:$8 sps:$4 sm:$0xff]   ;;  %v11420_v54 = vld [vmem:[%s11622_s25 + $0x1fe0] ss:$8 sps:$4 sm:$0xff]  }
 0x3f6   : > { %v8161_v13 = vpop.f32.mrf.mxu1  ;;  %v13314_v28 = vadd.f32 %v8159_v40, %v8109_v5  ;;  %v8111_v43 = vadd.f32 %v8110_v42, %v13205_v32  ;;  %8483 = vmatpush1.bf16.msra.mxu0 %v11365_v23  ;;  %v8729_v32 = vcombine.high %v13307_v49, %v13312_v11  ;;  %v11416_v26 = vld [vmem:[%s11622_s25 + $0x1ff4] ss:$8 sps:$4 sm:$0xff]   ;;  %v11414_v44 = vld [vmem:[%s11622_s25 + $0x1ff0] ss:$8 sps:$4 sm:$0xff]   ;;  %v11422_v23 = vld [vmem:[%s11622_s25 + $0x1fe4] ss:$8 sps:$4 sm:$0xff]  }
 0x3f7   : > { %8534 = vmatpush1.bf16.msra.mxu1 %v11368_v24  ;;  %v8112_v8 = vpop.f32.mrf.mxu0  ;;  %8484 = vmatprep.subr.bf16.mxu0 %v11375_v39  ;;  %v11417_v24 = vld [vmem:[%s11622_s25 + $0x1ee0] ss:$8 sps:$4 sm:$0xff]   ;;  %v11425_v40 = vld [vmem:[%s11622_s25 + $0x1ed4] ss:$8 sps:$4 sm:$0xff]   ;;  %v11426_v5 = vld [vmem:[%s11622_s25 + $0x1fd0] ss:$8 sps:$4 sm:$0xff]  }
 0x3f8   : > { %v8163_v7 = vpop.f32.mrf.mxu1  ;;  %8535 = vmatprep.subr.bf16.mxu1 %v11378_v53  ;;  %v13321_v47 = vadd.f32 %v8161_v13, %v8111_v43  ;;  %v8113_v56 = vadd.f32 %v8112_v8, %v13212_v21  ;;  %v11384_v21 = vld [vmem:[%s11622_s25 + $0x1f40] ss:$8 sps:$4 sm:$0xff]   ;;  %v11428_v39 = vld [vmem:[%s11622_s25 + $0x1fd4] ss:$8 sps:$4 sm:$0xff]   ;;  %v11423_v53 = vld [vmem:[%s11622_s25 + $0x1ed0] ss:$8 sps:$4 sm:$0xff]  }
 0x3f9   : > { %v8116_v36 = vpop.f32.mrf.mxu0  ;;  %8421 = vmatmul.mubr.bf16.gmra.mxu0 %v8786_v45  ;;  %v11431_v42 = vld [vmem:[%s11622_s25 + $0x1ec4] ss:$8 sps:$4 sm:$0xff]   ;;  %v11429_v45 = vld [vmem:[%s11622_s25 + $0x1ec0] ss:$8 sps:$4 sm:$0xff]   ;;  %v11437_v43 = vld [vmem:[%s11622_s25 + $0x1eb4] ss:$8 sps:$4 sm:$0xff]  }
 0x3fa   : > { %v8167_v31 = vpop.f32.mrf.mxu1  ;;  %8472 = vmatmul.mubr.bf16.gmra.mxu1 %v8788_v17  ;;  %v13328_v19 = vadd.f32 %v8163_v7, %v8113_v56  ;;  %v8117_v50 = vadd.f32 %v8116_v36, %v13220_v57  ;;  %8485 = vmatpush1.bf16.msra.mxu0 %v11373_v29  ;;  %v11434_v13 = vld [vmem:[%s11622_s25 + $0x1fc4] ss:$8 sps:$4 sm:$0xff]   ;;  %v11432_v17 = vld [vmem:[%s11622_s25 + $0x1fc0] ss:$8 sps:$4 sm:$0xff]   ;;  %v11440_v29 = vld [vmem:[%s11622_s25 + $0x1fb4] ss:$8 sps:$4 sm:$0xff]  }
 0x3fb   : > { %8536 = vmatpush1.bf16.msra.mxu1 %v11376_v6  ;;  %v8118_v58 = vpop.f32.mrf.mxu0  ;;  %8486 = vmatprep.subr.bf16.mxu0 %v11383_v61  ;;  %v11435_v6 = vld [vmem:[%s11622_s25 + $0x1eb0] ss:$8 sps:$4 sm:$0xff]   ;;  %v11443_v7 = vld [vmem:[%s11622_s25 + $0x1ea4] ss:$8 sps:$4 sm:$0xff]   ;;  %v11444_v56 = vld [vmem:[%s11622_s25 + $0x1fa0] ss:$8 sps:$4 sm:$0xff]  }
 0x3fc   : > { %v8169_v10 = vpop.f32.mrf.mxu1  ;;  %8537 = vmatprep.subr.bf16.mxu1 %v11386_v25  ;;  %v8119_v63 = vadd.f32 %v8118_v58, %v13222_v48  ;;  %v13336_v41 = vadd.f32 %v8167_v31, %v8117_v50  ;;  %8512 = vmatprep.mubr.bf16.mxu0 %v8727_v27  ;;  %v11395_v48 = vld [vmem:[%s11622_s25 + $0x1e24] ss:$8 sps:$4 sm:$0xff]   ;;  %v11438_v8 = vld [vmem:[%s11622_s25 + $0x1fb0] ss:$8 sps:$4 sm:$0xff]   ;;  %v11441_v25 = vld [vmem:[%s11622_s25 + $0x1ea0] ss:$8 sps:$4 sm:$0xff]  }
 0x3fd   : > { %8563 = vmatprep.mubr.bf16.mxu1 %v8729_v32  ;;  %v8120_v57 = vpop.f32.mrf.mxu0  ;;  %v11446_v61 = vld [vmem:[%s11622_s25 + $0x1fa4] ss:$8 sps:$4 sm:$0xff]   ;;  %v11449_v27 = vld [vmem:[%s11622_s25 + $0x1e94] ss:$8 sps:$4 sm:$0xff]   ;;  %v11447_v36 = vld [vmem:[%s11622_s25 + $0x1e90] ss:$8 sps:$4 sm:$0xff]  }
 0x3fe   : > { %v8171_v0 = vpop.f32.mrf.mxu1  ;;  %v13338_v1 = vadd.f32 %v8169_v10, %v8119_v63  ;;  %8487 = vmatpush1.bf16.msra.mxu0 %v11381_v51  ;;  %v11452_v32 = vld [vmem:[%s11622_s25 + $0x1f94] ss:$8 sps:$4 sm:$0xff]   ;;  %v11450_v31 = vld [vmem:[%s11622_s25 + $0x1f90] ss:$8 sps:$4 sm:$0xff]   ;;  %v11455_v50 = vld [vmem:[%s11622_s25 + $0x1e84] ss:$8 sps:$4 sm:$0xff]   ;;  %v8728_v63 = vcombine.low %v13307_v49, %v13312_v11 }
 0x3ff   : > { %8538 = vmatpush1.bf16.msra.mxu1 %v11384_v21  ;;  %8488 = vmatprep.subr.bf16.mxu0 %v11389_v12  ;;  %v8121_v22 = vpop.f32.mrf.mxu0  ;;  %v11458_v51 = vld [vmem:[%s11622_s25 + $0x1f84] ss:$8 sps:$4 sm:$0xff]   ;;  %v11453_v21 = vld [vmem:[%s11622_s25 + $0x1e80] ss:$8 sps:$4 sm:$0xff]   ;;  %v260_v10 = vld [vmem:[%s13420_s0 + $0x2f0] sm:$0xff] }
 0x400   : > { %8539 = vmatprep.subr.bf16.mxu1 %v11392_v37  ;;  %v8172_v9 = vpop.f32.mrf.mxu1  ;;  %v11456_v58 = vld [vmem:[%s11622_s25 + $0x1f80] ss:$8 sps:$4 sm:$0xff]   ;;  %v261_v12 = vld [vmem:[%s13420_s0 + $0x2f8] sm:$0xff]  ;;  %v8726_v37 = vcombine.low %v13297_v62, %v13302_v46  ;;  %v8791_v57 = vcombine.high %v260_v10, %v260_v10  ;;  %v8790_v49 = vcombine.low %v260_v10, %v260_v10  ;;  %s8664_s25 = sshll.u32 %s8655_s13, 1 }
 0x401   : > { %v8793_v0 = vcombine.high %v261_v12, %v261_v12  ;;  %v8792_v11 = vcombine.low %v261_v12, %v261_v12  ;;  %p161_p8 = scmp.lt.s32.totalorder %s8664_s25, 19 }
 0x402   : > { %8489 = vmatpush1.bf16.msra.mxu0 %v11387_v38 }
 0x403   : > { %8540 = vmatpush1.bf16.msra.mxu1 %v11390_v14  ;;  %8490 = vmatprep.subr.bf16.mxu0 %v11395_v48  ;;  %s13432_s25 = smov (!%p161_p8, %s8664_s25), 19 }
 0x404   : > { %8541 = vmatprep.subr.bf16.mxu1 %v11398_v4  ;;  %s8665_s12 = sshll.u32 %s13432_s25, 3 }
 0x405   : > { %s164_s28 = scalar_lea.vmem %s13422_s2, %s8665_s12 }
 0x406   : > { %8491 = vmatpush1.bf16.msra.mxu0 %v11393_v18 }
 0x407   : > { %8542 = vmatpush1.bf16.msra.mxu1 %v11396_v20  ;;  %8492 = vmatprep.subr.bf16.mxu0 %v11401_v60 }
 0x408   : > { %8543 = vmatprep.subr.bf16.mxu1 %v11404_v33 }
 0x40a   : > { %8493 = vmatpush1.bf16.msra.mxu0 %v11399_v59 }
 0x40b   : > { %8544 = vmatpush1.bf16.msra.mxu1 %v11402_v52  ;;  %8494 = vmatprep.subr.bf16.mxu0 %v11407_v2 }
 0x40c   : > { %8545 = vmatprep.subr.bf16.mxu1 %v11410_v34 }
 0x40e   : > { %8495 = vmatpush1.bf16.msra.mxu0 %v11405_v16 }
 0x40f   : > { %8546 = vmatpush1.bf16.msra.mxu1 %v11408_v30  ;;  %8496 = vmatprep.subr.bf16.mxu0 %v11413_v3 }
 0x410   : > { %8547 = vmatprep.subr.bf16.mxu1 %v11416_v26 }
 0x412   : > { %8497 = vmatpush2.bf16.msra.mxu0 %v11411_v15 }
 0x413   : > { %8548 = vmatpush2.bf16.msra.mxu1 %v11414_v44  ;;  %8498 = vmatprep.subr.bf16.mxu0 %v11419_v35 }
 0x414   : > { %8549 = vmatprep.subr.bf16.mxu1 %v11422_v23 }
 0x416   : > { %8499 = vmatpush2.bf16.msra.mxu0 %v11417_v24 }
 0x417   : > { %8550 = vmatpush2.bf16.msra.mxu1 %v11420_v54  ;;  %8500 = vmatprep.subr.bf16.mxu0 %v11425_v40 }
 0x418   : > { %8551 = vmatprep.subr.bf16.mxu1 %v11428_v39 }
 0x41a   : > { %8501 = vmatpush2.bf16.msra.mxu0 %v11423_v53 }
 0x41b   : > { %8552 = vmatpush2.bf16.msra.mxu1 %v11426_v5  ;;  %8502 = vmatprep.subr.bf16.mxu0 %v11431_v42 }
 0x41c   : > { %8553 = vmatprep.subr.bf16.mxu1 %v11434_v13 }
 0x41e   : > { %8503 = vmatpush2.bf16.msra.mxu0 %v11429_v45 }
 0x41f   : > { %8554 = vmatpush2.bf16.msra.mxu1 %v11432_v17  ;;  %8504 = vmatprep.subr.bf16.mxu0 %v11437_v43 }
 0x420   : > { %8555 = vmatprep.subr.bf16.mxu1 %v11440_v29 }
 0x422   : > { %8505 = vmatpush2.bf16.msra.mxu0 %v11435_v6 }
 0x423   : > { %8556 = vmatpush2.bf16.msra.mxu1 %v11438_v8  ;;  %8506 = vmatprep.subr.bf16.mxu0 %v11443_v7 }
 0x424   : > { %8557 = vmatprep.subr.bf16.mxu1 %v11446_v61 }
 0x426   : > { %8507 = vmatpush2.bf16.msra.mxu0 %v11441_v25 }
 0x427   : > { %8558 = vmatpush2.bf16.msra.mxu1 %v11444_v56  ;;  %8508 = vmatprep.subr.bf16.mxu0 %v11449_v27 }
 0x428   : > { %8559 = vmatprep.subr.bf16.mxu1 %v11452_v32 }
 0x42a   : > { %8509 = vmatpush2.bf16.msra.mxu0 %v11447_v36 }
 0x42b   : > { %8560 = vmatpush2.bf16.msra.mxu1 %v11450_v31  ;;  %8510 = vmatprep.subr.bf16.mxu0 %v11455_v50 }
 0x42c   : > { %8561 = vmatprep.subr.bf16.mxu1 %v11458_v51 }
 0x42e   : > { %8511 = vmatpush2.bf16.msra.mxu0 %v11453_v21 }
 0x42f   : > { %8562 = vmatpush2.bf16.msra.mxu1 %v11456_v58 }
 0x431   : > { %v8208_v38 = vpop.f32.mrf.mxu0  ;;  %8513 = vmatmul.mubr.bf16.vlgmr.msra.gmra.mxu0 %v8726_v37 }
 0x432   : > { %v8259_v14 = vpop.f32.mrf.mxu1  ;;  %8564 = vmatmul.mubr.bf16.vlgmr.msra.gmra.mxu1 %v8728_v63  ;;  %v8209_v48 = vadd.f32 %v8208_v38, %v13291_v55  ;;  %8522 = vmatprep.mubr.bf16.mxu0 %v8791_v57 }
 0x433   : > { %8573 = vmatprep.mubr.bf16.mxu1 %v8793_v0  ;;  %v8210_v4 = vpop.f32.mrf.mxu0 }
 0x434   : > { %v8261_v22 = vpop.f32.mrf.mxu1  ;;  %v8260_v9 = vadd.f32 %v8259_v14, %v8209_v48  ;;  %v8211_v62 = vadd.f32 %v8210_v4, %v13314_v28 }
 0x435   : > { %v8212_v46 = vpop.f32.mrf.mxu0 }
 0x436   : > { %v8263_v18 = vpop.f32.mrf.mxu1  ;;  %v8262_v20 = vadd.f32 %v8261_v22, %v8211_v62  ;;  %v8213_v60 = vadd.f32 %v8212_v46, %v13321_v47 }
 0x437   : > { %v8214_v33 = vpop.f32.mrf.mxu0 }
 0x438   : > { %v8265_v59 = vpop.f32.mrf.mxu1  ;;  %v8264_v52 = vadd.f32 %v8263_v18, %v8213_v60  ;;  %v8215_v2 = vadd.f32 %v8214_v33, %v13328_v19 }
 0x439   : > { %v8218_v55 = vpop.f32.mrf.mxu0  ;;  %8523 = vmatmul.mubr.bf16.gmra.mxu0 %v8790_v49 }
 0x43a   : > { %8574 = vmatmul.mubr.bf16.gmra.mxu1 %v8792_v11  ;;  %v8269_v34 = vpop.f32.mrf.mxu1  ;;  %v8266_v16 = vadd.f32 %v8265_v59, %v8215_v2  ;;  %v8219_v30 = vadd.f32 %v8218_v55, %v13336_v41 }
 0x43b   : > { %v8220_v28 = vpop.f32.mrf.mxu0 }
 0x43c   : > { %v8271_v3 = vpop.f32.mrf.mxu1  ;;  %v8221_v26 = vadd.f32 %v8220_v28, %v13338_v1  ;;  %v8270_v15 = vadd.f32 %v8269_v34, %v8219_v30 }
 0x43d   : > { %v8222_v44 = vpop.f32.mrf.mxu0 }
 0x43e   : > { %v8273_v35 = vpop.f32.mrf.mxu1  ;;  %v8272_v47 = vadd.f32 %v8271_v3, %v8221_v26 }
 0x43f   : > { %v8223_v23 = vpop.f32.mrf.mxu0 }
 0x440   : > { %v8274_v24 = vpop.f32.mrf.mxu1 }
 0x471   : > { %v8310_v54 = vpop.f32.mrf.mxu0 }
 0x472   : > { %v8361_v40 = vpop.f32.mrf.mxu1  ;;  %v8311_v19 = vadd.f32 %v8310_v54, %v8260_v9 }
 0x473   : > { %v8312_v39 = vpop.f32.mrf.mxu0 }
 0x474   : > { %v8363_v53 = vpop.f32.mrf.mxu1  ;;  %v8362_v5 = vadd.f32 %v8361_v40, %v8311_v19  ;;  %v8313_v42 = vadd.f32 %v8312_v39, %v8262_v20 }
 0x475   : > { %v8314_v13 = vpop.f32.mrf.mxu0 }
 0x476   : > { %v8365_v45 = vpop.f32.mrf.mxu1  ;;  %v8364_v41 = vadd.f32 %v8363_v53, %v8313_v42  ;;  %v8315_v17 = vadd.f32 %v8314_v13, %v8264_v52 }
 0x477   : > { %v8316_v43 = vpop.f32.mrf.mxu0 }
 0x478   : > { %v8367_v29 = vpop.f32.mrf.mxu1  ;;  %v8366_v1 = vadd.f32 %v8365_v45, %v8315_v17  ;;  %v8317_v6 = vadd.f32 %v8316_v43, %v8266_v16 }
 0x479   : > { %v8320_v8 = vpop.f32.mrf.mxu0 }
 0x47a   : > { %v8371_v7 = vpop.f32.mrf.mxu1  ;;  %v8368_v61 = vadd.f32 %v8367_v29, %v8317_v6  ;;  %v8321_v25 = vadd.f32 %v8320_v8, %v8270_v15 }
 0x47b   : > { %v8322_v56 = vpop.f32.mrf.mxu0 }
 0x47c   : > { %v8373_v27 = vpop.f32.mrf.mxu1  ;;  %v8323_v32 = vadd.f32 %v8322_v56, %v8272_v47  ;;  %v8372_v36 = vadd.f32 %v8371_v7, %v8321_v25 }
 0x47d   : > { %v8324_v31 = vpop.f32.mrf.mxu0 }
 0x47e   : > { %v8375_v50 = vpop.f32.mrf.mxu1  ;;  %v8374_v51 = vadd.f32 %v8373_v27, %v8323_v32 }
 0x47f   : > { %v8325_v21 = vpop.f32.mrf.mxu0 }
 0x480   : > { %v8376_v58 = vpop.f32.mrf.mxu1 }
 0x4b1   : > { %v8412_v10 = vpop.f32.mrf.mxu0 }
 0x4b2   : > { %v8463_v12 = vpop.f32.mrf.mxu1  ;;  %v8413_v37 = vadd.f32 %v8412_v10, %v8362_v5 }
 0x4b3   : > { %v8414_v63 = vpop.f32.mrf.mxu0 }
 0x4b4   : > { %v8465_v57 = vpop.f32.mrf.mxu1  ;;  %v8464_v0 = vadd.f32 %v8463_v12, %v8413_v37  ;;  %v8415_v38 = vadd.f32 %v8414_v63, %v8364_v41 }
 0x4b5   : > { %v8416_v14 = vpop.f32.mrf.mxu0 }
 0x4b6   : > { %v8467_v48 = vpop.f32.mrf.mxu1  ;;  %v8466_v4 = vadd.f32 %v8465_v57, %v8415_v38  ;;  %v8417_v22 = vadd.f32 %v8416_v14, %v8366_v1 }
 0x4b7   : > { %v8418_v9 = vpop.f32.mrf.mxu0 }
 0x4b8   : > { %v8469_v62 = vpop.f32.mrf.mxu1  ;;  %v8468_v46 = vadd.f32 %v8467_v48, %v8417_v22  ;;  %v8419_v18 = vadd.f32 %v8418_v9, %v8368_v61 }
 0x4b9   : > { %v8422_v49 = vpop.f32.mrf.mxu0 }
 0x4ba   : > { %v8473_v11 = vpop.f32.mrf.mxu1  ;;  %v8470_v20 = vadd.f32 %v8469_v62, %v8419_v18  ;;  %v8423_v3 = vadd.f32 %v8422_v49, %v8372_v36 }
 0x4bb   : > { %v8424_v60 = vpop.f32.mrf.mxu0 }
 0x4bc   : > { %v8475_v33 = vpop.f32.mrf.mxu1  ;;  %v8425_v15 = vadd.f32 %v8424_v60, %v8374_v51  ;;  %v8474_v40 = vadd.f32 %v8473_v11, %v8423_v3 }
 0x4bd   : > { %v8426_v59 = vpop.f32.mrf.mxu0 }
 0x4be   : > { %v8477_v52 = vpop.f32.mrf.mxu1  ;;  %v8476_v5 = vadd.f32 %v8475_v33, %v8425_v15 }
 0x4bf   : > { %v8427_v2 = vpop.f32.mrf.mxu0 }
 0x4c0   : > { %v8478_v55 = vpop.f32.mrf.mxu1 }
 0x4f1   : > { %v8514_v34 = vpop.f32.mrf.mxu0 }
 0x4f2   : > { %v8565_v16 = vpop.f32.mrf.mxu1  ;;  %v8515_v26 = vadd.f32 %v8514_v34, %v8464_v0 }
 0x4f3   : > { %v8516_v30 = vpop.f32.mrf.mxu0 }
 0x4f4   : > { %v8567_v28 = vpop.f32.mrf.mxu1  ;;  %v8517_v47 = vadd.f32 %v8516_v30, %v8466_v4  ;;  %v8566_v19 = vadd.f32 %v8565_v16, %v8515_v26 }
 0x4f5   : > { %v8518_v44 = vpop.f32.mrf.mxu0 }
 0x4f6   : > { %v8569_v35 = vpop.f32.mrf.mxu1  ;;  %v8519_v23 = vadd.f32 %v8518_v44, %v8468_v46  ;;  %v8568_v45 = vadd.f32 %v8567_v28, %v8517_v47 }
 0x4f7   : > { %v8520_v24 = vpop.f32.mrf.mxu0 }
 0x4f8   : > { %v8571_v54 = vpop.f32.mrf.mxu1  ;;  %v8570_v39 = vadd.f32 %v8569_v35, %v8519_v23  ;;  %v8521_v53 = vadd.f32 %v8520_v24, %v8470_v20 }
 0x4f9   : > { %v8524_v42 = vpop.f32.mrf.mxu0 }
 0x4fa   : > { %v8575_v13 = vpop.f32.mrf.mxu1  ;;  %v8582_v41 = vadd.f32 %v8570_v39, %v8566_v19  ;;  %v8572_v17 = vadd.f32 %v8571_v54, %v8521_v53  ;;  %v8525_v43 = vadd.f32 %v8524_v42, %v8474_v40 }
 0x4fb   : > { %v8526_v29 = vpop.f32.mrf.mxu0 }
 0x4fc   : > { %v8577_v1 = vpop.f32.mrf.mxu1  ;;  %v8583_v6 = vadd.f32 %v8572_v17, %v8568_v45  ;;  %v8576_v8 = vadd.f32 %v8575_v13, %v8525_v43  ;;  %v8527_v7 = vadd.f32 %v8526_v29, %v8476_v5 }
 0x4fd   : > { %v8528_v61 = vpop.f32.mrf.mxu0 }
 0x4fe   : > { %v8579_v25 = vpop.f32.mrf.mxu1  ;;  %v8584_v56 = vadd.f32 %v8582_v41, %v8576_v8  ;;  %v8578_v27 = vadd.f32 %v8577_v1, %v8527_v7 }
 0x4ff   : > { %v8529_v32 = vpop.f32.mrf.mxu0 }
 0x500   : > { %v8580_v36 = vpop.f32.mrf.mxu1  ;;  %8586 = vst [vmem:[%s164_s28] sm:$0xff] %v8584_v56  ;;  %v8585_v31 = vadd.f32 %v8583_v6, %v8578_v27 }
 0x502   : > { %8587 = vst [vmem:[%s164_s28 + $0x8] sm:$0xff] %v8585_v31 }
 0x503 PF: > { %p12_p0 = scmp.ge.s32.totalorder %s11566_s14, 12   ;;  %s13427_s9 = smov %s11517_s10 }
 0x504   : > { %s13428_s10 = smov %s11521_s11  ;;  %s13429_s11 = smov %s11576_s17 }
 0x505   : > { %s13430_s12 = smov %s11566_s14  ;;  %14 = sbr.rel (!%p12_p0) target bundleno = 3 (0x3), region = 68 }
 0x50a   :  { %8610 = vsyncpa [#allocation3], 1 }
 0x50b   :  { %8612 = vsyncpa [#allocation3 + $0x1], 1 }

</bundles_post_ra>
